<compile_context>
chip_gen: v7x
topology: tpu7x:2x2x1
jax: 0.10.0
libtpu: 0.0.40
codegen_flags: <defaults>
</compile_context>

<pallas_src>
import functools

import jax
import jax.numpy as jnp
from jax.experimental import pallas as pl
from jax.experimental.pallas import tpu as pltpu


def _round_up(x, m):
    return ((x + m - 1) // m) * m


def tree_lstm_kernel(h1_ref, h2_ref, c1_ref, c2_ref, w1_ref, w2_ref, b_ref,
                     h_ref, c_ref, *, dim, matmul_dtype):
    # Row tiles of the four state inputs: (tm, dim) each (dim already padded
    # to a lane multiple).  Weights are full (dim, 5*dim) slabs in VMEM.
    h1 = h1_ref[...].astype(matmul_dtype)
    h2 = h2_ref[...].astype(matmul_dtype)
    w1 = w1_ref[...].astype(matmul_dtype)
    w2 = w2_ref[...].astype(matmul_dtype)

    # concat([h1, h2], -1) @ W  ==  h1 @ W[:dim] + h2 @ W[dim:]
    all_sum = (
        jnp.dot(h1, w1, preferred_element_type=jnp.float32)
        + jnp.dot(h2, w2, preferred_element_type=jnp.float32)
        + b_ref[...].astype(jnp.float32)
    )

    # Gate order matches torch.split: i, f1, f2, o, g (lane-aligned slices,
    # dim is a multiple of 128).
    i_g = all_sum[:, 0 * dim:1 * dim]
    f1_g = all_sum[:, 1 * dim:2 * dim]
    f2_g = all_sum[:, 2 * dim:3 * dim]
    o_g = all_sum[:, 3 * dim:4 * dim]
    g_g = all_sum[:, 4 * dim:5 * dim]

    c1 = c1_ref[...].astype(jnp.float32)
    c2 = c2_ref[...].astype(jnp.float32)

    c = (jax.nn.sigmoid(f1_g) * c1
         + jax.nn.sigmoid(f2_g) * c2
         + jax.nn.sigmoid(i_g) * jnp.tanh(g_g))
    h = jax.nn.sigmoid(o_g) * jnp.tanh(c)

    h_ref[...] = h.astype(h_ref.dtype)
    c_ref[...] = c.astype(c_ref.dtype)


@functools.partial(
    jax.jit, static_argnames=("tm", "matmul_dtype", "single_buffer_weights"))
def tree_lstm_cell(h1, c1, h2, c2, w, b, *, tm=256,
                   matmul_dtype=jnp.bfloat16, single_buffer_weights=True):
    """One TreeLSTM cell step.

    h1, c1, h2, c2 : (batch, dim)
    w              : (2*dim, 5*dim)  (transpose of nn.Linear weight storage)
    b              : (5*dim,)
    Returns (h, c), each (batch, dim), same dtype as h1.
    """
    n, dim = h1.shape
    out_dtype = h1.dtype

    # --- lane / row padding -------------------------------------------------
    dim_p = _round_up(dim, 128)            # lane-dense gates & outputs
    tm_eff = min(tm, _round_up(n, 8))      # big row tile, clamped to batch
    n_pad = _round_up(n, tm_eff)           # no silently dropped rows

    def pad_rows(x):
        return jnp.pad(x, ((0, n_pad - n), (0, dim_p - dim)))

    h1p, h2p, c1p, c2p = pad_rows(h1), pad_rows(h2), pad_rows(c1), pad_rows(c2)

    # Pad each of the 5 gate blocks of W / b separately so gate g occupies
    # columns [g*dim_p, (g+1)*dim_p).  Padded rows/cols are zero, so padded
    # lanes contribute nothing and are sliced away at the end.
    def pad_w(w_half):  # (dim, 5*dim) -> (dim_p, 5*dim_p)
        wg = w_half.reshape(dim, 5, dim)
        wg = jnp.pad(wg, ((0, dim_p - dim), (0, 0), (0, dim_p - dim)))
        return wg.reshape(dim_p, 5 * dim_p)

    w1p = pad_w(w[:dim])
    w2p = pad_w(w[dim:])
    bp = jnp.pad(b.reshape(5, dim), ((0, 0), (0, dim_p - dim)))
    bp = bp.reshape(1, 5 * dim_p)

    # --- block specs ----------------------------------------------------------
    row_spec = pl.BlockSpec((tm_eff, dim_p), lambda i: (i, 0))

    def const_spec(shape):
        if single_buffer_weights:
            # Constant index_map -> no double buffering needed; halves weight
            # VMEM residency (matters on v7x's 64 MiB VMEM for large dim).
            return pl.BlockSpec(shape, lambda i: (0, 0),
                                pipeline_mode=pl.Buffered(1))
        return pl.BlockSpec(shape, lambda i: (0, 0))

    grid = (n_pad // tm_eff,)
    kernel = functools.partial(tree_lstm_kernel, dim=dim_p,
                               matmul_dtype=matmul_dtype)

    h_out, c_out = pl.pallas_call(
        kernel,
        out_shape=(
            jax.ShapeDtypeStruct((n_pad, dim_p), out_dtype),
            jax.ShapeDtypeStruct((n_pad, dim_p), out_dtype),
        ),
        grid_spec=pltpu.PrefetchScalarGridSpec(
            num_scalar_prefetch=0,
            grid=grid,
            in_specs=[
                row_spec, row_spec, row_spec, row_spec,   # h1, h2, c1, c2
                const_spec((dim_p, 5 * dim_p)),           # W[:dim]
                const_spec((dim_p, 5 * dim_p)),           # W[dim:]
                const_spec((1, 5 * dim_p)),               # bias
            ],
            out_specs=[row_spec, row_spec],
        ),
        compiler_params=pltpu.CompilerParams(
            dimension_semantics=("parallel",),
            vmem_limit_bytes=64 * 1024 * 1024,
        ),
    )(h1p, h2p, c1p, c2p, w1p, w2p, bp)

    return h_out[:n, :dim], c_out[:n, :dim]
    # TODO(synk): for very large dim (e.g. d_inner-sized gates), add a K/N
    # blocking loop over the 5*dim axis with a VMEM f32 accumulator instead of
    # holding the full (dim_p, 5*dim_p) weight slabs resident.


def tree_lstm_forward(x1, x2, w, b, e=None, **kw):
    """Mirrors TreeLSTM.forward: accepts tensors or (h, c) tuples; None c/x2."""
    if not isinstance(x1, tuple):
        x1 = (x1, None)
    h1, c1 = x1
    if x2 is None:
        x2 = (jnp.zeros_like(h1), jnp.zeros_like(h1))
    elif not isinstance(x2, tuple):
        x2 = (x2, None)
    h2, c2 = x2
    if c1 is None:
        c1 = jnp.zeros_like(h1)
    if c2 is None:
        c2 = jnp.zeros_like(h2)
    return tree_lstm_cell(h1, c1, h2, c2, w, b, **kw)


def reference_tree_lstm(h1, c1, h2, c2, w, b):
    """Pure-JAX f32 reference mirroring the PyTorch forward."""
    all_sum = jnp.concatenate([h1, h2], axis=1) @ w + b
    i, f1, f2, o, g = jnp.split(all_sum, 5, axis=1)
    c = (jax.nn.sigmoid(f1) * c1 + jax.nn.sigmoid(f2) * c2
         + jax.nn.sigmoid(i) * jnp.tanh(g))
    h = jax.nn.sigmoid(o) * jnp.tanh(c)
    return h, c


if __name__ == "__main__":
    batch, dim = 6, 200   # module default dim; exercises lane & row padding

    key = jax.random.PRNGKey(0)
    k1, k2, k3, k4, kw, kb = jax.random.split(key, 6)
    h1 = jax.random.normal(k1, (batch, dim), dtype=jnp.float32)
    c1 = jax.random.normal(k2, (batch, dim), dtype=jnp.float32)
    h2 = jax.random.normal(k3, (batch, dim), dtype=jnp.float32)
    c2 = jax.random.normal(k4, (batch, dim), dtype=jnp.float32)

    # nn.Linear(2*dim, 5*dim) parameters, stored so that all_sum = x @ w + b.
    w = jax.random.normal(kw, (2 * dim, 5 * dim), dtype=jnp.float32) * 0.05
    b = jax.random.normal(kb, (5 * dim,), dtype=jnp.float32) * 0.05

    try:
        h, c = tree_lstm_forward((h1, c1), (h2, c2), w, b,
                                 single_buffer_weights=True)
        h, c = jax.block_until_ready((h, c))
    except Exception:
        # Fallback if this JAX build rejects pipeline_mode=pl.Buffered(1).
        h, c = tree_lstm_forward((h1, c1), (h2, c2), w, b,
                                 single_buffer_weights=False)
        h, c = jax.block_until_ready((h, c))

    h_ref, c_ref = reference_tree_lstm(h1, c1, h2, c2, w, b)
    assert h.shape == (batch, dim) and c.shape == (batch, dim)
    # bf16 matmuls (f32 accumulation) vs f32 reference -> relaxed tolerance.
    assert jnp.allclose(h, h_ref, atol=2e-2, rtol=2e-2), "h mismatch vs reference"
    assert jnp.allclose(c, c_ref, atol=2e-2, rtol=2e-2), "c mismatch vs reference"

    print("KERNEL_OK")
</pallas_src>

<mosaic_0001>
module attributes {stable_mosaic.version = 11 : i64} {
  func.func @tree_lstm_kernel(%arg0: i32, %arg1: memref<8x256xf32, #tpu.memory_space<vmem>>, %arg2: memref<8x256xf32, #tpu.memory_space<vmem>>, %arg3: memref<8x256xf32, #tpu.memory_space<vmem>>, %arg4: memref<8x256xf32, #tpu.memory_space<vmem>>, %arg5: memref<256x1280xf32, #tpu.memory_space<vmem>>, %arg6: memref<256x1280xf32, #tpu.memory_space<vmem>>, %arg7: memref<1x1280xf32, #tpu.memory_space<vmem>>, %arg8: memref<8x256xf32, #tpu.memory_space<vmem>>, %arg9: memref<8x256xf32, #tpu.memory_space<vmem>>) attributes {dimension_semantics = [#tpu.dimension_semantics<parallel>], iteration_bounds = array<i64: 1>, scalar_prefetch = 0 : i64, scratch_operands = 0 : i64, tpu.core_type = #tpu.core_type<tc>, window_params = [{transform_indices = @transform_0, window_bounds = array<i64: 8, 256>}, {transform_indices = @transform_1, window_bounds = array<i64: 8, 256>}, {transform_indices = @transform_2, window_bounds = array<i64: 8, 256>}, {transform_indices = @transform_3, window_bounds = array<i64: 8, 256>}, {pipeline_mode = #tpu.pipeline_mode<synchronous>, transform_indices = @transform_4, window_bounds = array<i64: 256, 1280>}, {pipeline_mode = #tpu.pipeline_mode<synchronous>, transform_indices = @transform_5, window_bounds = array<i64: 256, 1280>}, {pipeline_mode = #tpu.pipeline_mode<synchronous>, transform_indices = @transform_6, window_bounds = array<i64: 1, 1280>}, {transform_indices = @transform_7, window_bounds = array<i64: 8, 256>}, {transform_indices = @transform_8, window_bounds = array<i64: 8, 256>}]} {
    %c0 = arith.constant 0 : index
    %c0_0 = arith.constant 0 : index
    %0 = vector.load %arg1[%c0, %c0_0] : memref<8x256xf32, #tpu.memory_space<vmem>>, vector<8x256xf32>
    %1 = arith.truncf %0 : vector<8x256xf32> to vector<8x256xbf16>
    %c0_1 = arith.constant 0 : index
    %c0_2 = arith.constant 0 : index
    %2 = vector.load %arg2[%c0_1, %c0_2] : memref<8x256xf32, #tpu.memory_space<vmem>>, vector<8x256xf32>
    %3 = arith.truncf %2 : vector<8x256xf32> to vector<8x256xbf16>
    %c0_3 = arith.constant 0 : index
    %c0_4 = arith.constant 0 : index
    %4 = vector.load %arg5[%c0_3, %c0_4] : memref<256x1280xf32, #tpu.memory_space<vmem>>, vector<256x1280xf32>
    %5 = arith.truncf %4 : vector<256x1280xf32> to vector<256x1280xbf16>
    %c0_5 = arith.constant 0 : index
    %c0_6 = arith.constant 0 : index
    %6 = vector.load %arg6[%c0_5, %c0_6] : memref<256x1280xf32, #tpu.memory_space<vmem>>, vector<256x1280xf32>
    %7 = arith.truncf %6 : vector<256x1280xf32> to vector<256x1280xbf16>
    %cst = arith.constant dense<0.000000e+00> : vector<8x1280xf32>
    %8 = tpu.matmul %1, %5, %cst {dimension_numbers = #tpu.dot_dimension_numbers<[1], [0], [0], [1], [0, 0, 1, 1], [], []>} : vector<8x256xbf16>, vector<256x1280xbf16>, vector<8x1280xf32> -> vector<8x1280xf32>
    %cst_7 = arith.constant dense<0.000000e+00> : vector<8x1280xf32>
    %9 = tpu.matmul %3, %7, %cst_7 {dimension_numbers = #tpu.dot_dimension_numbers<[1], [0], [0], [1], [0, 0, 1, 1], [], []>} : vector<8x256xbf16>, vector<256x1280xbf16>, vector<8x1280xf32> -> vector<8x1280xf32>
    %10 = arith.addf %8, %9 : vector<8x1280xf32>
    %c0_8 = arith.constant 0 : index
    %c0_9 = arith.constant 0 : index
    %11 = vector.load %arg7[%c0_8, %c0_9] : memref<1x1280xf32, #tpu.memory_space<vmem>>, vector<1x1280xf32>
    %12 = vector.broadcast %11 : vector<1x1280xf32> to vector<8x1280xf32>
    %13 = arith.addf %10, %12 : vector<8x1280xf32>
    %14 = vector.extract_strided_slice %13 {offsets = [0, 0], sizes = [8, 256], strides = [1, 1]} : vector<8x1280xf32> to vector<8x256xf32>
    %15 = vector.extract_strided_slice %13 {offsets = [0, 256], sizes = [8, 256], strides = [1, 1]} : vector<8x1280xf32> to vector<8x256xf32>
    %16 = vector.extract_strided_slice %13 {offsets = [0, 512], sizes = [8, 256], strides = [1, 1]} : vector<8x1280xf32> to vector<8x256xf32>
    %17 = vector.extract_strided_slice %13 {offsets = [0, 768], sizes = [8, 256], strides = [1, 1]} : vector<8x1280xf32> to vector<8x256xf32>
    %18 = vector.extract_strided_slice %13 {offsets = [0, 1024], sizes = [8, 256], strides = [1, 1]} : vector<8x1280xf32> to vector<8x256xf32>
    %c0_10 = arith.constant 0 : index
    %c0_11 = arith.constant 0 : index
    %19 = vector.load %arg3[%c0_10, %c0_11] : memref<8x256xf32, #tpu.memory_space<vmem>>, vector<8x256xf32>
    %c0_12 = arith.constant 0 : index
    %c0_13 = arith.constant 0 : index
    %20 = vector.load %arg4[%c0_12, %c0_13] : memref<8x256xf32, #tpu.memory_space<vmem>>, vector<8x256xf32>
    %21 = arith.negf %15 : vector<8x256xf32>
    %22 = math.exp %21 : vector<8x256xf32>
    %cst_14 = arith.constant 1.000000e+00 : f32
    %23 = vector.broadcast %cst_14 : f32 to vector<8x256xf32>
    %24 = arith.addf %23, %22 : vector<8x256xf32>
    %25 = arith.divf %23, %24 : vector<8x256xf32>
    %26 = arith.mulf %25, %19 : vector<8x256xf32>
    %27 = arith.negf %16 : vector<8x256xf32>
    %28 = math.exp %27 : vector<8x256xf32>
    %cst_15 = arith.constant 1.000000e+00 : f32
    %29 = vector.broadcast %cst_15 : f32 to vector<8x256xf32>
    %30 = arith.addf %29, %28 : vector<8x256xf32>
    %31 = arith.divf %29, %30 : vector<8x256xf32>
    %32 = arith.mulf %31, %20 : vector<8x256xf32>
    %33 = arith.addf %26, %32 : vector<8x256xf32>
    %34 = arith.negf %14 : vector<8x256xf32>
    %35 = math.exp %34 : vector<8x256xf32>
    %cst_16 = arith.constant 1.000000e+00 : f32
    %36 = vector.broadcast %cst_16 : f32 to vector<8x256xf32>
    %37 = arith.addf %36, %35 : vector<8x256xf32>
    %38 = arith.divf %36, %37 : vector<8x256xf32>
    %39 = math.tanh %18 : vector<8x256xf32>
    %40 = arith.mulf %38, %39 : vector<8x256xf32>
    %41 = arith.addf %33, %40 : vector<8x256xf32>
    %42 = arith.negf %17 : vector<8x256xf32>
    %43 = math.exp %42 : vector<8x256xf32>
    %cst_17 = arith.constant 1.000000e+00 : f32
    %44 = vector.broadcast %cst_17 : f32 to vector<8x256xf32>
    %45 = arith.addf %44, %43 : vector<8x256xf32>
    %46 = arith.divf %44, %45 : vector<8x256xf32>
    %47 = math.tanh %41 : vector<8x256xf32>
    %48 = arith.mulf %46, %47 : vector<8x256xf32>
    %c0_18 = arith.constant 0 : index
    %c0_19 = arith.constant 0 : index
    %49 = vector.load %arg8[%c0_18, %c0_19] : memref<8x256xf32, #tpu.memory_space<vmem>>, vector<8x256xf32>
    tpu.vector_store %arg8[%c0_18, %c0_19], %48 {strides = array<i32>} : memref<8x256xf32, #tpu.memory_space<vmem>>, vector<8x256xf32>,
    %c0_20 = arith.constant 0 : index
    %c0_21 = arith.constant 0 : index
    %50 = vector.load %arg9[%c0_20, %c0_21] : memref<8x256xf32, #tpu.memory_space<vmem>>, vector<8x256xf32>
    tpu.vector_store %arg9[%c0_20, %c0_21], %41 {strides = array<i32>} : memref<8x256xf32, #tpu.memory_space<vmem>>, vector<8x256xf32>,
    return
  }
  func.func @transform_0(%arg0: i32) -> (i32, i32) {
    %c0_i32 = arith.constant 0 : i32
    %c0_i32_0 = arith.constant 0 : i32
    return %arg0, %c0_i32 : i32, i32
  }
  func.func @transform_1(%arg0: i32) -> (i32, i32) {
    %c0_i32 = arith.constant 0 : i32
    %c0_i32_0 = arith.constant 0 : i32
    return %arg0, %c0_i32 : i32, i32
  }
  func.func @transform_2(%arg0: i32) -> (i32, i32) {
    %c0_i32 = arith.constant 0 : i32
    %c0_i32_0 = arith.constant 0 : i32
    return %arg0, %c0_i32 : i32, i32
  }
  func.func @transform_3(%arg0: i32) -> (i32, i32) {
    %c0_i32 = arith.constant 0 : i32
    %c0_i32_0 = arith.constant 0 : i32
    return %arg0, %c0_i32 : i32, i32
  }
  func.func @transform_4(%arg0: i32) -> (i32, i32) {
    %c0_i32 = arith.constant 0 : i32
    %c0_i32_0 = arith.constant 0 : i32
    %c0_i32_1 = arith.constant 0 : i32
    return %c0_i32, %c0_i32_0 : i32, i32
  }
  func.func @transform_5(%arg0: i32) -> (i32, i32) {
    %c0_i32 = arith.constant 0 : i32
    %c0_i32_0 = arith.constant 0 : i32
    %c0_i32_1 = arith.constant 0 : i32
    return %c0_i32, %c0_i32_0 : i32, i32
  }
  func.func @transform_6(%arg0: i32) -> (i32, i32) {
    %c0_i32 = arith.constant 0 : i32
    %c0_i32_0 = arith.constant 0 : i32
    %c0_i32_1 = arith.constant 0 : i32
    return %c0_i32, %c0_i32_0 : i32, i32
  }
  func.func @transform_7(%arg0: i32) -> (i32, i32) {
    %c0_i32 = arith.constant 0 : i32
    %c0_i32_0 = arith.constant 0 : i32
    return %arg0, %c0_i32 : i32, i32
  }
  func.func @transform_8(%arg0: i32) -> (i32, i32) {
    %c0_i32 = arith.constant 0 : i32
    %c0_i32_0 = arith.constant 0 : i32
    return %arg0, %c0_i32 : i32, i32
  }
}

module attributes {stable_mosaic.version = 11 : i64} {
  func.func @tree_lstm_kernel(%arg0: i32, %arg1: memref<8x256xf32, #tpu.memory_space<vmem>>, %arg2: memref<8x256xf32, #tpu.memory_space<vmem>>, %arg3: memref<8x256xf32, #tpu.memory_space<vmem>>, %arg4: memref<8x256xf32, #tpu.memory_space<vmem>>, %arg5: memref<256x1280xf32, #tpu.memory_space<vmem>>, %arg6: memref<256x1280xf32, #tpu.memory_space<vmem>>, %arg7: memref<1x1280xf32, #tpu.memory_space<vmem>>, %arg8: memref<8x256xf32, #tpu.memory_space<vmem>>, %arg9: memref<8x256xf32, #tpu.memory_space<vmem>>) attributes {dimension_semantics = [#tpu.dimension_semantics<parallel>], iteration_bounds = array<i64: 1>, scalar_prefetch = 0 : i64, scratch_operands = 0 : i64, tpu.core_type = #tpu.core_type<tc>, window_params = [{transform_indices = @transform_0, window_bounds = array<i64: 8, 256>}, {transform_indices = @transform_1, window_bounds = array<i64: 8, 256>}, {transform_indices = @transform_2, window_bounds = array<i64: 8, 256>}, {transform_indices = @transform_3, window_bounds = array<i64: 8, 256>}, {pipeline_mode = #tpu.pipeline_mode<synchronous>, transform_indices = @transform_4, window_bounds = array<i64: 256, 1280>}, {pipeline_mode = #tpu.pipeline_mode<synchronous>, transform_indices = @transform_5, window_bounds = array<i64: 256, 1280>}, {pipeline_mode = #tpu.pipeline_mode<synchronous>, transform_indices = @transform_6, window_bounds = array<i64: 1, 1280>}, {transform_indices = @transform_7, window_bounds = array<i64: 8, 256>}, {transform_indices = @transform_8, window_bounds = array<i64: 8, 256>}]} {
    %c0 = arith.constant 0 : index
    %c0_0 = arith.constant 0 : index
    %0 = vector.load %arg1[%c0, %c0_0] : memref<8x256xf32, #tpu.memory_space<vmem>>, vector<8x256xf32>
    %1 = arith.truncf %0 : vector<8x256xf32> to vector<8x256xbf16>
    %c0_1 = arith.constant 0 : index
    %c0_2 = arith.constant 0 : index
    %2 = vector.load %arg2[%c0_1, %c0_2] : memref<8x256xf32, #tpu.memory_space<vmem>>, vector<8x256xf32>
    %3 = arith.truncf %2 : vector<8x256xf32> to vector<8x256xbf16>
    %c0_3 = arith.constant 0 : index
    %c0_4 = arith.constant 0 : index
    %4 = vector.load %arg5[%c0_3, %c0_4] : memref<256x1280xf32, #tpu.memory_space<vmem>>, vector<256x1280xf32>
    %5 = arith.truncf %4 : vector<256x1280xf32> to vector<256x1280xbf16>
    %c0_5 = arith.constant 0 : index
    %c0_6 = arith.constant 0 : index
    %6 = vector.load %arg6[%c0_5, %c0_6] : memref<256x1280xf32, #tpu.memory_space<vmem>>, vector<256x1280xf32>
    %7 = arith.truncf %6 : vector<256x1280xf32> to vector<256x1280xbf16>
    %cst = arith.constant dense<0.000000e+00> : vector<8x1280xf32>
    %8 = tpu.matmul %1, %5, %cst {dimension_numbers = #tpu.dot_dimension_numbers<[1], [0], [0], [1], [0, 0, 1, 1], [], []>} : vector<8x256xbf16>, vector<256x1280xbf16>, vector<8x1280xf32> -> vector<8x1280xf32>
    %cst_7 = arith.constant dense<0.000000e+00> : vector<8x1280xf32>
    %9 = tpu.matmul %3, %7, %cst_7 {dimension_numbers = #tpu.dot_dimension_numbers<[1], [0], [0], [1], [0, 0, 1, 1], [], []>} : vector<8x256xbf16>, vector<256x1280xbf16>, vector<8x1280xf32> -> vector<8x1280xf32>
    %10 = arith.addf %8, %9 : vector<8x1280xf32>
    %c0_8 = arith.constant 0 : index
    %c0_9 = arith.constant 0 : index
    %11 = vector.load %arg7[%c0_8, %c0_9] : memref<1x1280xf32, #tpu.memory_space<vmem>>, vector<1x1280xf32>
    %12 = vector.broadcast %11 : vector<1x1280xf32> to vector<8x1280xf32>
    %13 = arith.addf %10, %12 : vector<8x1280xf32>
    %14 = vector.extract_strided_slice %13 {offsets = [0, 0], sizes = [8, 256], strides = [1, 1]} : vector<8x1280xf32> to vector<8x256xf32>
    %15 = vector.extract_strided_slice %13 {offsets = [0, 256], sizes = [8, 256], strides = [1, 1]} : vector<8x1280xf32> to vector<8x256xf32>
    %16 = vector.extract_strided_slice %13 {offsets = [0, 512], sizes = [8, 256], strides = [1, 1]} : vector<8x1280xf32> to vector<8x256xf32>
    %17 = vector.extract_strided_slice %13 {offsets = [0, 768], sizes = [8, 256], strides = [1, 1]} : vector<8x1280xf32> to vector<8x256xf32>
    %18 = vector.extract_strided_slice %13 {offsets = [0, 1024], sizes = [8, 256], strides = [1, 1]} : vector<8x1280xf32> to vector<8x256xf32>
    %c0_10 = arith.constant 0 : index
    %c0_11 = arith.constant 0 : index
    %19 = vector.load %arg3[%c0_10, %c0_11] : memref<8x256xf32, #tpu.memory_space<vmem>>, vector<8x256xf32>
    %c0_12 = arith.constant 0 : index
    %c0_13 = arith.constant 0 : index
    %20 = vector.load %arg4[%c0_12, %c0_13] : memref<8x256xf32, #tpu.memory_space<vmem>>, vector<8x256xf32>
    %21 = arith.negf %15 : vector<8x256xf32>
    %22 = math.exp %21 : vector<8x256xf32>
    %cst_14 = arith.constant 1.000000e+00 : f32
    %23 = vector.broadcast %cst_14 : f32 to vector<8x256xf32>
    %24 = arith.addf %23, %22 : vector<8x256xf32>
    %25 = arith.divf %23, %24 : vector<8x256xf32>
    %26 = arith.mulf %25, %19 : vector<8x256xf32>
    %27 = arith.negf %16 : vector<8x256xf32>
    %28 = math.exp %27 : vector<8x256xf32>
    %cst_15 = arith.constant 1.000000e+00 : f32
    %29 = vector.broadcast %cst_15 : f32 to vector<8x256xf32>
    %30 = arith.addf %29, %28 : vector<8x256xf32>
    %31 = arith.divf %29, %30 : vector<8x256xf32>
    %32 = arith.mulf %31, %20 : vector<8x256xf32>
    %33 = arith.addf %26, %32 : vector<8x256xf32>
    %34 = arith.negf %14 : vector<8x256xf32>
    %35 = math.exp %34 : vector<8x256xf32>
    %cst_16 = arith.constant 1.000000e+00 : f32
    %36 = vector.broadcast %cst_16 : f32 to vector<8x256xf32>
    %37 = arith.addf %36, %35 : vector<8x256xf32>
    %38 = arith.divf %36, %37 : vector<8x256xf32>
    %39 = math.tanh %18 : vector<8x256xf32>
    %40 = arith.mulf %38, %39 : vector<8x256xf32>
    %41 = arith.addf %33, %40 : vector<8x256xf32>
    %42 = arith.negf %17 : vector<8x256xf32>
    %43 = math.exp %42 : vector<8x256xf32>
    %cst_17 = arith.constant 1.000000e+00 : f32
    %44 = vector.broadcast %cst_17 : f32 to vector<8x256xf32>
    %45 = arith.addf %44, %43 : vector<8x256xf32>
    %46 = arith.divf %44, %45 : vector<8x256xf32>
    %47 = math.tanh %41 : vector<8x256xf32>
    %48 = arith.mulf %46, %47 : vector<8x256xf32>
    %c0_18 = arith.constant 0 : index
    %c0_19 = arith.constant 0 : index
    %49 = vector.load %arg8[%c0_18, %c0_19] : memref<8x256xf32, #tpu.memory_space<vmem>>, vector<8x256xf32>
    tpu.vector_store %arg8[%c0_18, %c0_19], %48 {strides = array<i32>} : memref<8x256xf32, #tpu.memory_space<vmem>>, vector<8x256xf32>,
    %c0_20 = arith.constant 0 : index
    %c0_21 = arith.constant 0 : index
    %50 = vector.load %arg9[%c0_20, %c0_21] : memref<8x256xf32, #tpu.memory_space<vmem>>, vector<8x256xf32>
    tpu.vector_store %arg9[%c0_20, %c0_21], %41 {strides = array<i32>} : memref<8x256xf32, #tpu.memory_space<vmem>>, vector<8x256xf32>,
    return
  }
  func.func @transform_0(%arg0: i32) -> (i32, i32) {
    %c0_i32 = arith.constant 0 : i32
    %c0_i32_0 = arith.constant 0 : i32
    return %arg0, %c0_i32 : i32, i32
  }
  func.func @transform_1(%arg0: i32) -> (i32, i32) {
    %c0_i32 = arith.constant 0 : i32
    %c0_i32_0 = arith.constant 0 : i32
    return %arg0, %c0_i32 : i32, i32
  }
  func.func @transform_2(%arg0: i32) -> (i32, i32) {
    %c0_i32 = arith.constant 0 : i32
    %c0_i32_0 = arith.constant 0 : i32
    return %arg0, %c0_i32 : i32, i32
  }
  func.func @transform_3(%arg0: i32) -> (i32, i32) {
    %c0_i32 = arith.constant 0 : i32
    %c0_i32_0 = arith.constant 0 : i32
    return %arg0, %c0_i32 : i32, i32
  }
  func.func @transform_4(%arg0: i32) -> (i32, i32) {
    %c0_i32 = arith.constant 0 : i32
    %c0_i32_0 = arith.constant 0 : i32
    %c0_i32_1 = arith.constant 0 : i32
    return %c0_i32, %c0_i32_0 : i32, i32
  }
  func.func @transform_5(%arg0: i32) -> (i32, i32) {
    %c0_i32 = arith.constant 0 : i32
    %c0_i32_0 = arith.constant 0 : i32
    %c0_i32_1 = arith.constant 0 : i32
    return %c0_i32, %c0_i32_0 : i32, i32
  }
  func.func @transform_6(%arg0: i32) -> (i32, i32) {
    %c0_i32 = arith.constant 0 : i32
    %c0_i32_0 = arith.constant 0 : i32
    %c0_i32_1 = arith.constant 0 : i32
    return %c0_i32, %c0_i32_0 : i32, i32
  }
  func.func @transform_7(%arg0: i32) -> (i32, i32) {
    %c0_i32 = arith.constant 0 : i32
    %c0_i32_0 = arith.constant 0 : i32
    return %arg0, %c0_i32 : i32, i32
  }
  func.func @transform_8(%arg0: i32) -> (i32, i32) {
    %c0_i32 = arith.constant 0 : i32
    %c0_i32_0 = arith.constant 0 : i32
    return %arg0, %c0_i32 : i32, i32
  }
}

</mosaic_0001>

<bundles_post_ra>
// kernel: tree_lstm_cell.1
= control target key start
LH: loop header
LB: loop body
LE: loop exit
PB: predicated region body
PF: predicated region fallthrough
CT: control target
= control target key end

     0   :  { %14 = vsyncpa [#allocation3], 0  ;;  %s2185_s0 = inlined_call_operand.hbm [shape: f32[8,256], index: 0, kind: input, shape index: {}]   ;;  %s2186_s1 = inlined_call_operand.hbm [shape: f32[8,256], index: 1, kind: input, shape index: {}]   ;;  %s2187_s2 = inlined_call_operand.hbm [shape: f32[8,256], index: 2, kind: input, shape index: {}]   ;;  %s2188_s3 = inlined_call_operand.hbm [shape: f32[8,256], index: 3, kind: input, shape index: {}]   ;;  %s2189_s4 = inlined_call_operand.hbm [shape: f32[256,1280], index: 4, kind: input, shape index: {}]   ;;  %s2190_s5 = inlined_call_operand.hbm [shape: f32[256,1280], index: 5, kind: input, shape index: {}]   ;;  %s2191_s6 = inlined_call_operand.hbm [shape: f32[1,1280], index: 6, kind: input, shape index: {}]   ;;  %s2192_s7 = inlined_call_operand.hbm [shape: f32[8,256], index: 7, kind: output, shape index: {0}]   ;;  %s2193_s8 = inlined_call_operand.hbm [shape: f32[8,256], index: 8, kind: output, shape index: {1}]  }
   0x1   :  { %15 = vsyncpa [#allocation6], 0 }
   0x2   :  { %16 = vsyncpa [#allocation9], 0 }
   0x3   :  { %17 = vsyncpa [#allocation12], 0 }
   0x4   :  { %18 = vsyncpa [#allocation4], 0 }
   0x5   :  { %19 = vsyncpa [#allocation16], 0  ;;  %s1930_s27 = smov [#allocation5]   ;;  %s1931_s29 = smov [#allocation8]  }
   0x6   :  { %s36_s28 = sshll.u32 %s1930_s27, 4  ;;  %s56_s30 = sshll.u32 %s1931_s29, 4  ;;  %s37_s28 = int_to_ptr.vmem [resolvable:$true] %s36_s28  ;;  %s57_s30 = int_to_ptr.vmem [resolvable:$true] %s56_s30 }
   0x7   :  { %s1720_s11 = scalar_lea.hbm %s2186_s1, 256 }
   0x8   :  { %p1721_p0 = scmp.ne.s32.totalorder %s2186_s1, %s1720_s11  ;;  %p1724_p1 = scmp.lt.u32.totalorder %s1720_s11, %s2186_s1 }
   0xa   :  { %p1726_p2 = pnand %p1724_p1, %p1721_p0 }
   0xc   :  { %1729 = shalt.err (!%p1726_p2)
}
   0xd   :  { %s1730_s16 = scalar_lea.vmem %s37_s28, 256  ;;  %p1735_p4 = scmp.lt.s32.totalorder %s37_s28, %s37_s28 }
   0xe   :  { %p1731_p3 = scmp.ne.s32.totalorder %s37_s28, %s1730_s16  ;;  %p1736_p5 = scmp.lt.s32.totalorder %s1730_s16, %s1730_s16 }
  0x10   :  { %p1737_p6 = por %p1736_p5, %p1735_p4 }
  0x12   :  { %p1738_p7 = pnand %p1737_p6, %p1731_p3 }
  0x14   :  { %1741 = shalt.err (!%p1738_p7)
}
  0x15   :  { %39 = dma.hbm_to_vmem [thread:$0]  %s2186_s1, 256, %s37_s28, [#allocation6]  }
  0x16   :  { %s1742_s21 = scalar_lea.hbm %s2188_s3, 256 }
  0x17   :  { %p1743_p8 = scmp.ne.s32.totalorder %s2188_s3, %s1742_s21  ;;  %p1746_p9 = scmp.lt.u32.totalorder %s1742_s21, %s2188_s3 }
  0x19   :  { %p1748_p10 = pnand %p1746_p9, %p1743_p8 }
  0x1b   :  { %1751 = shalt.err (!%p1748_p10)
}
  0x1c   :  { %s1752_s26 = scalar_lea.vmem %s57_s30, 256  ;;  %p1757_p12 = scmp.lt.s32.totalorder %s57_s30, %s57_s30 }
  0x1d   :  { %p1753_p11 = scmp.ne.s32.totalorder %s57_s30, %s1752_s26  ;;  %p1758_p13 = scmp.lt.s32.totalorder %s1752_s26, %s1752_s26 }
  0x1f   :  { %p1759_p0 = por %p1758_p13, %p1757_p12 }
  0x21   :  { %p1760_p1 = pnand %p1759_p0, %p1753_p11 }
  0x23   :  { %1763 = shalt.err (!%p1760_p1)
}
  0x24   :  { %59 = dma.hbm_to_vmem [thread:$0]  %s2188_s3, 256, %s57_s30, [#allocation9]  }
  0x25   :  { %s1932_s28 = smov [#allocation11]   ;;  %s1933_s9 = smov [#allocation2]  }
  0x26   :  { %s77_s29 = sshll.u32 %s1932_s28, 4  ;;  %s26_s10 = sshll.u32 %s1933_s9, 4  ;;  %s78_s29 = int_to_ptr.vmem [resolvable:$true] %s77_s29  ;;  %s27_s10 = int_to_ptr.vmem [resolvable:$true] %s26_s10 }
  0x27   :  { %s1764_s13 = scalar_lea.hbm %s2190_s5, 40960 }
  0x28   :  { %p1765_p2 = scmp.ne.s32.totalorder %s2190_s5, %s1764_s13  ;;  %p1768_p3 = scmp.lt.u32.totalorder %s1764_s13, %s2190_s5 }
  0x2a   :  { %p1770_p4 = pnand %p1768_p3, %p1765_p2 }
  0x2c   :  { %1773 = shalt.err (!%p1770_p4)
}
  0x2d   :  { %s1774_s3 = scalar_lea.vmem %s78_s29, 40960  ;;  %p1779_p6 = scmp.lt.s32.totalorder %s78_s29, %s78_s29 }
  0x2e   :  { %p1775_p5 = scmp.ne.s32.totalorder %s78_s29, %s1774_s3  ;;  %p1780_p7 = scmp.lt.s32.totalorder %s1774_s3, %s1774_s3 }
  0x30   :  { %p1781_p8 = por %p1780_p7, %p1779_p6 }
  0x32   :  { %p1782_p9 = pnand %p1781_p8, %p1775_p5 }
  0x34   :  { %1785 = shalt.err (!%p1782_p9)
}
  0x35   :  { %s1934_s30 = smov 1280   ;;  %s1935_s18 = smov 80  }
  0x36   :  { %83 = dma.hbm_to_vmem [thread:$0]  %s2190_s5, 40960, %s78_s29, [#allocation12], %s1934_s30, %s1934_s30, %s1935_s18  }
  0x37   :  { %s1786_s23 = scalar_lea.hbm %s2185_s0, 256 }
  0x38   :  { %p1787_p10 = scmp.ne.s32.totalorder %s2185_s0, %s1786_s23  ;;  %p1790_p11 = scmp.lt.u32.totalorder %s1786_s23, %s2185_s0 }
  0x3a   :  { %p1792_p12 = pnand %p1790_p11, %p1787_p10 }
  0x3c   :  { %1795 = shalt.err (!%p1792_p12)
}
  0x3d   :  { %s1796_s27 = scalar_lea.vmem %s27_s10, 256  ;;  %p1801_p0 = scmp.lt.s32.totalorder %s27_s10, %s27_s10 }
  0x3e   :  { %p1797_p13 = scmp.ne.s32.totalorder %s27_s10, %s1796_s27  ;;  %p1802_p1 = scmp.lt.s32.totalorder %s1796_s27, %s1796_s27 }
  0x40   :  { %p1803_p2 = por %p1802_p1, %p1801_p0 }
  0x42   :  { %p1804_p3 = pnand %p1803_p2, %p1797_p13 }
  0x44   :  { %1807 = shalt.err (!%p1804_p3)
}
  0x45   :  { %29 = dma.hbm_to_vmem [thread:$0]  %s2185_s0, 256, %s27_s10, [#allocation3]  }
  0x46   :  { %s1936_s29 = smov [#allocation7]   ;;  %s1937_s11 = smov [#allocation10]  }
  0x47   :  { %s46_s9 = sshll.u32 %s1936_s29, 4  ;;  %s65_s12 = sshll.u32 %s1937_s11, 4  ;;  %s47_s9 = int_to_ptr.vmem [resolvable:$true] %s46_s9  ;;  %s2037_s12 = int_to_ptr.vmem [resolvable:$true] %s65_s12 }
  0x48   :  { %s1808_s15 = scalar_lea.hbm %s2187_s2, 256 }
  0x49   :  { %p1809_p4 = scmp.ne.s32.totalorder %s2187_s2, %s1808_s15  ;;  %p1812_p5 = scmp.lt.u32.totalorder %s1808_s15, %s2187_s2 }
  0x4b   :  { %p1814_p6 = pnand %p1812_p5, %p1809_p4 }
  0x4d   :  { %1817 = shalt.err (!%p1814_p6)
}
  0x4e   :  { %s1818_s0 = scalar_lea.vmem %s47_s9, 256  ;;  %p1823_p8 = scmp.lt.s32.totalorder %s47_s9, %s47_s9 }
  0x4f   :  { %p1819_p7 = scmp.ne.s32.totalorder %s47_s9, %s1818_s0  ;;  %p1824_p9 = scmp.lt.s32.totalorder %s1818_s0, %s1818_s0 }
  0x51   :  { %p1825_p10 = por %p1824_p9, %p1823_p8 }
  0x53   :  { %p1826_p11 = pnand %p1825_p10, %p1819_p7 }
  0x55   :  { %1829 = shalt.err (!%p1826_p11)
}
  0x56   :  { %49 = dma.hbm_to_vmem [thread:$0]  %s2187_s2, 256, %s47_s9, [#allocation6]  }
  0x57   :  { %s1830_s23 = scalar_lea.hbm %s2189_s4, 40960 }
  0x58   :  { %p1831_p12 = scmp.ne.s32.totalorder %s2189_s4, %s1830_s23  ;;  %p1834_p13 = scmp.lt.u32.totalorder %s1830_s23, %s2189_s4 }
  0x5a   :  { %p1836_p0 = pnand %p1834_p13, %p1831_p12 }
  0x5c   :  { %1839 = shalt.err (!%p1836_p0)
}
  0x5d   :  { %s1840_s27 = scalar_lea.vmem %s2037_s12, 40960  ;;  %p1845_p2 = scmp.lt.s32.totalorder %s2037_s12, %s2037_s12 }
  0x5e   :  { %p1841_p1 = scmp.ne.s32.totalorder %s2037_s12, %s1840_s27  ;;  %p1846_p3 = scmp.lt.s32.totalorder %s1840_s27, %s1840_s27 }
  0x60   :  { %p1847_p4 = por %p1846_p3, %p1845_p2 }
  0x62   :  { %p1848_p5 = pnand %p1847_p4, %p1841_p1 }
  0x64   :  { %1851 = shalt.err (!%p1848_p5)
}
  0x65   :  { %71 = dma.hbm_to_vmem [thread:$0]  %s2189_s4, 40960, %s2037_s12, [#allocation9], %s1934_s30, %s1934_s30, %s1935_s18  }
  0x66   :  { %s1938_s28 = smov [#allocation13]   ;;  %s1852_s13 = scalar_lea.hbm %s2191_s6, 160 }
  0x67   :  { %s90_s29 = sshll.u32 %s1938_s28, 4  ;;  %p1853_p6 = scmp.ne.s32.totalorder %s2191_s6, %s1852_s13  ;;  %s91_s29 = int_to_ptr.vmem [resolvable:$true] %s90_s29 }
  0x68   :  { %p1856_p7 = scmp.lt.u32.totalorder %s1852_s13, %s2191_s6 }
  0x6a   :  { %p1858_p8 = pnand %p1856_p7, %p1853_p6 }
  0x6c   :  { %1861 = shalt.err (!%p1858_p8)
}
  0x6d   :  { %s1862_s3 = scalar_lea.vmem %s91_s29, 160  ;;  %p1867_p10 = scmp.lt.s32.totalorder %s91_s29, %s91_s29 }
  0x6e   :  { %p1863_p9 = scmp.ne.s32.totalorder %s91_s29, %s1862_s3  ;;  %p1868_p11 = scmp.lt.s32.totalorder %s1862_s3, %s1862_s3 }
  0x70   :  { %p1869_p12 = por %p1868_p11, %p1867_p10 }
  0x72   :  { %p1870_p13 = pnand %p1869_p12, %p1863_p9 }
  0x74   :  { %1873 = shalt.err (!%p1870_p13)
}
  0x75   :  { %93 = dma.hbm_to_vmem [thread:$0]  %s2191_s6, 160, %s91_s29, [#allocation12]  }
  0x76   :  { %1918 = dma.done.wait [#allocation3], 256  }
  0x77   :  { %1919 = vsyncadd [#allocation3], 4294967040 }
  0x78   :  { %1920 = dma.done.wait [#allocation6], 512  }
  0x79   :  { %1921 = vsyncadd [#allocation6], 4294966784 }
  0x7a   :  { %1922 = dma.done.wait [#allocation9], 41216  }
  0x7b   :  { %1923 = vsyncadd [#allocation9], 4294926080 }
  0x7c   :  { %1924 = dma.done.wait [#allocation12], 41120  }
  0x7d   :  { %1925 = vsyncadd [#allocation12], 4294926176  ;;  %v604_v0 = vld [vmem:[#allocation11 + $0x8] sm:$0xff]  ;;  %v614_v1 = vld [vmem:[#allocation11 + $0x58] sm:$0xff]  ;;  %s1939_s6 = smov [#allocation15]  }
  0x7e   :  { %v606_v2 = vld [vmem:[#allocation11 + $0x18] sm:$0xff]  ;;  %v924_v3 = vpack.c.bf16 %v614_v1, %v604_v0  ;;  %v616_v4 = vld [vmem:[#allocation11 + $0x68] sm:$0xff]  ;;  %v603_v5 = vld [vmem:[#allocation11] sm:$0xff]  ;;  %s1645_s18 = sshll.u32 %s1939_s6, 4  ;;  %s1646_s18 = int_to_ptr.vmem [resolvable:$true] %s1645_s18 }
  0x7f   :  { %v613_v6 = vld [vmem:[#allocation11 + $0x50] sm:$0xff]  ;;  %v926_v7 = vpack.c.bf16 %v616_v4, %v606_v2  ;;  %v615_v10 = vld [vmem:[#allocation11 + $0x60] sm:$0xff]  ;;  %v624_v11 = vld [vmem:[#allocation11 + $0xa8] sm:$0xff]  ;;  %s1874_s12 = scalar_lea.vmem %s1646_s18, 256  ;;  %p1879_p1 = scmp.lt.s32.totalorder %s1646_s18, %s1646_s18 }
  0x80   :  { %v923_v8 = vpack.c.bf16 %v613_v6, %v603_v5  ;;  %v605_v9 = vld [vmem:[#allocation11 + $0x10] sm:$0xff]  ;;  %1083 = vmatprep.subr.bf16.mxu0 %v924_v3  ;;  %v634_v13 = vld [vmem:[#allocation11 + $0xf8] sm:$0xff]  ;;  %v636_v15 = vld [vmem:[#allocation11 + $0x108] sm:$0xff]  ;;  %p1875_p0 = scmp.ne.s32.totalorder %s1646_s18, %s1874_s12  ;;  %p1880_p2 = scmp.lt.s32.totalorder %s1874_s12, %s1874_s12 }
  0x81   :  { %v925_v12 = vpack.c.bf16 %v615_v10, %v605_v9  ;;  %v626_v14 = vld [vmem:[#allocation11 + $0xb8] sm:$0xff]  ;;  %1124 = vmatprep.subr.bf16.mxu1 %v926_v7  ;;  %v934_v16 = vpack.c.bf16 %v634_v13, %v624_v11  ;;  %v623_v18 = vld [vmem:[#allocation11 + $0xa0] sm:$0xff]  ;;  %v633_v19 = vld [vmem:[#allocation11 + $0xf0] sm:$0xff] }
  0x82   :  { %1084 = vmatpush1.bf16.msra.mxu0 %v923_v8  ;;  %v936_v17 = vpack.c.bf16 %v636_v15, %v626_v14  ;;  %v625_v20 = vld [vmem:[#allocation11 + $0xb0] sm:$0xff]  ;;  %v933_v21 = vpack.c.bf16 %v633_v19, %v623_v18  ;;  %v635_v22 = vld [vmem:[#allocation11 + $0x100] sm:$0xff]  ;;  %v644_v23 = vld [vmem:[#allocation11 + $0x148] sm:$0xff]  ;;  %p1881_p3 = por %p1880_p2, %p1879_p1 }
  0x83   :  { %1125 = vmatpush1.bf16.msra.mxu1 %v925_v12  ;;  %v654_v24 = vld [vmem:[#allocation11 + $0x198] sm:$0xff]  ;;  %1085 = vmatprep.subr.bf16.mxu0 %v934_v16  ;;  %v935_v25 = vpack.c.bf16 %v635_v22, %v625_v20  ;;  %v656_v28 = vld [vmem:[#allocation11 + $0x1a8] sm:$0xff]  ;;  %v643_v29 = vld [vmem:[#allocation11 + $0x140] sm:$0xff] }
  0x84   :  { %1126 = vmatprep.subr.bf16.mxu1 %v936_v17  ;;  %v944_v26 = vpack.c.bf16 %v654_v24, %v644_v23  ;;  %v646_v27 = vld [vmem:[#allocation11 + $0x158] sm:$0xff]  ;;  %v653_v31 = vld [vmem:[#allocation11 + $0x190] sm:$0xff]  ;;  %v655_v33 = vld [vmem:[#allocation11 + $0x1a0] sm:$0xff]  ;;  %p1882_p4 = pnand %p1881_p3, %p1875_p0 }
  0x85   :  { %v946_v30 = vpack.c.bf16 %v656_v28, %v646_v27  ;;  %v645_v32 = vld [vmem:[#allocation11 + $0x150] sm:$0xff]  ;;  %v943_v34 = vpack.c.bf16 %v653_v31, %v643_v29  ;;  %v664_v35 = vld [vmem:[#allocation11 + $0x1e8] sm:$0xff]  ;;  %v674_v36 = vld [vmem:[#allocation11 + $0x238] sm:$0xff] }
  0x86   :  { %1086 = vmatpush1.bf16.msra.mxu0 %v933_v21  ;;  %v666_v37 = vld [vmem:[#allocation11 + $0x1f8] sm:$0xff]  ;;  %v945_v38 = vpack.c.bf16 %v655_v33, %v645_v32  ;;  %v954_v39 = vpack.c.bf16 %v674_v36, %v664_v35  ;;  %v676_v40 = vld [vmem:[#allocation11 + $0x248] sm:$0xff]  ;;  %v663_v41 = vld [vmem:[#allocation11 + $0x1e0] sm:$0xff] }
  0x87   :  { %1127 = vmatpush1.bf16.msra.mxu1 %v935_v25  ;;  %1087 = vmatprep.subr.bf16.mxu0 %v944_v26  ;;  %v673_v42 = vld [vmem:[#allocation11 + $0x230] sm:$0xff]  ;;  %v956_v43 = vpack.c.bf16 %v676_v40, %v666_v37  ;;  %v675_v45 = vld [vmem:[#allocation11 + $0x240] sm:$0xff]  ;;  %v684_v46 = vld [vmem:[#allocation11 + $0x288] sm:$0xff] }
  0x88   :  { %1128 = vmatprep.subr.bf16.mxu1 %v946_v30  ;;  %v665_v44 = vld [vmem:[#allocation11 + $0x1f0] sm:$0xff]  ;;  %v694_v47 = vld [vmem:[#allocation11 + $0x2d8] sm:$0xff]  ;;  %v696_v49 = vld [vmem:[#allocation11 + $0x2e8] sm:$0xff]  ;;  %v953_v50 = vpack.c.bf16 %v673_v42, %v663_v41 }
  0x89   :  { %v686_v48 = vld [vmem:[#allocation11 + $0x298] sm:$0xff]  ;;  %v955_v51 = vpack.c.bf16 %v675_v45, %v665_v44  ;;  %v964_v52 = vpack.c.bf16 %v694_v47, %v684_v46  ;;  %v683_v53 = vld [vmem:[#allocation11 + $0x280] sm:$0xff]  ;;  %v693_v54 = vld [vmem:[#allocation11 + $0x2d0] sm:$0xff] }
  0x8a   :  { %1088 = vmatpush1.bf16.msra.mxu0 %v943_v34  ;;  %v685_v55 = vld [vmem:[#allocation11 + $0x290] sm:$0xff]  ;;  %v966_v56 = vpack.c.bf16 %v696_v49, %v686_v48  ;;  %v695_v57 = vld [vmem:[#allocation11 + $0x2e0] sm:$0xff]  ;;  %v704_v58 = vld [vmem:[#allocation11 + $0x328] sm:$0xff]  ;;  %v963_v62 = vpack.c.bf16 %v693_v54, %v683_v53 }
  0x8b   :  { %1129 = vmatpush1.bf16.msra.mxu1 %v945_v38  ;;  %1089 = vmatprep.subr.bf16.mxu0 %v954_v39  ;;  %v714_v59 = vld [vmem:[#allocation11 + $0x378] sm:$0xff]  ;;  %v716_v61 = vld [vmem:[#allocation11 + $0x388] sm:$0xff]  ;;  %v965_v63 = vpack.c.bf16 %v695_v57, %v685_v55  ;;  %v703_v1 = vld [vmem:[#allocation11 + $0x320] sm:$0xff] }
  0x8c   :  { %1130 = vmatprep.subr.bf16.mxu1 %v956_v43  ;;  %v706_v60 = vld [vmem:[#allocation11 + $0x338] sm:$0xff]  ;;  %v974_v0 = vpack.c.bf16 %v714_v59, %v704_v58  ;;  %v713_v2 = vld [vmem:[#allocation11 + $0x370] sm:$0xff]  ;;  %v715_v5 = vld [vmem:[#allocation11 + $0x380] sm:$0xff] }
  0x8d   :  { %v705_v3 = vld [vmem:[#allocation11 + $0x330] sm:$0xff]  ;;  %v976_v4 = vpack.c.bf16 %v716_v61, %v706_v60  ;;  %v724_v6 = vld [vmem:[#allocation11 + $0x3c8] sm:$0xff]  ;;  %v734_v7 = vld [vmem:[#allocation11 + $0x418] sm:$0xff]  ;;  %v973_v10 = vpack.c.bf16 %v713_v2, %v703_v1 }
  0x8e   :  { %1090 = vmatpush1.bf16.msra.mxu0 %v953_v50  ;;  %v726_v8 = vld [vmem:[#allocation11 + $0x3d8] sm:$0xff]  ;;  %v736_v9 = vld [vmem:[#allocation11 + $0x428] sm:$0xff]  ;;  %v975_v11 = vpack.c.bf16 %v715_v5, %v705_v3  ;;  %v984_v12 = vpack.c.bf16 %v734_v7, %v724_v6  ;;  %v723_v13 = vld [vmem:[#allocation11 + $0x3c0] sm:$0xff] }
  0x8f   :  { %1131 = vmatpush1.bf16.msra.mxu1 %v955_v51  ;;  %1091 = vmatprep.subr.bf16.mxu0 %v964_v52  ;;  %v733_v14 = vld [vmem:[#allocation11 + $0x410] sm:$0xff]  ;;  %v986_v16 = vpack.c.bf16 %v736_v9, %v726_v8  ;;  %v735_v17 = vld [vmem:[#allocation11 + $0x420] sm:$0xff]  ;;  %v744_v18 = vld [vmem:[#allocation11 + $0x468] sm:$0xff] }
  0x90   :  { %1132 = vmatprep.subr.bf16.mxu1 %v966_v56  ;;  %v725_v15 = vld [vmem:[#allocation11 + $0x3d0] sm:$0xff]  ;;  %v754_v19 = vld [vmem:[#allocation11 + $0x4b8] sm:$0xff]  ;;  %v756_v21 = vld [vmem:[#allocation11 + $0x4c8] sm:$0xff]  ;;  %v983_v22 = vpack.c.bf16 %v733_v14, %v723_v13 }
  0x91   :  { %v746_v20 = vld [vmem:[#allocation11 + $0x478] sm:$0xff]  ;;  %v985_v23 = vpack.c.bf16 %v735_v17, %v725_v15  ;;  %v994_v24 = vpack.c.bf16 %v754_v19, %v744_v18  ;;  %v743_v25 = vld [vmem:[#allocation11 + $0x460] sm:$0xff]  ;;  %v753_v26 = vld [vmem:[#allocation11 + $0x4b0] sm:$0xff] }
  0x92   :  { %1092 = vmatpush1.bf16.msra.mxu0 %v963_v62  ;;  %v745_v27 = vld [vmem:[#allocation11 + $0x470] sm:$0xff]  ;;  %v996_v28 = vpack.c.bf16 %v756_v21, %v746_v20  ;;  %v755_v29 = vld [vmem:[#allocation11 + $0x4c0] sm:$0xff]  ;;  %v764_v30 = vld [vmem:[#allocation11 + $0x508] sm:$0xff]  ;;  %v993_v34 = vpack.c.bf16 %v753_v26, %v743_v25 }
  0x93   :  { %1133 = vmatpush1.bf16.msra.mxu1 %v965_v63  ;;  %1093 = vmatprep.subr.bf16.mxu0 %v974_v0  ;;  %v774_v31 = vld [vmem:[#allocation11 + $0x558] sm:$0xff]  ;;  %v776_v33 = vld [vmem:[#allocation11 + $0x568] sm:$0xff]  ;;  %v995_v35 = vpack.c.bf16 %v755_v29, %v745_v27  ;;  %v763_v37 = vld [vmem:[#allocation11 + $0x500] sm:$0xff] }
  0x94   :  { %1134 = vmatprep.subr.bf16.mxu1 %v976_v4  ;;  %v766_v32 = vld [vmem:[#allocation11 + $0x518] sm:$0xff]  ;;  %v1004_v36 = vpack.c.bf16 %v774_v31, %v764_v30  ;;  %v773_v38 = vld [vmem:[#allocation11 + $0x550] sm:$0xff]  ;;  %v775_v41 = vld [vmem:[#allocation11 + $0x560] sm:$0xff] }
  0x95   :  { %v765_v39 = vld [vmem:[#allocation11 + $0x510] sm:$0xff]  ;;  %v1006_v40 = vpack.c.bf16 %v776_v33, %v766_v32  ;;  %v784_v42 = vld [vmem:[#allocation11 + $0x5a8] sm:$0xff]  ;;  %v794_v43 = vld [vmem:[#allocation11 + $0x5f8] sm:$0xff]  ;;  %v1003_v46 = vpack.c.bf16 %v773_v38, %v763_v37 }
  0x96   :  { %1094 = vmatpush1.bf16.msra.mxu0 %v973_v10  ;;  %v786_v44 = vld [vmem:[#allocation11 + $0x5b8] sm:$0xff]  ;;  %v796_v45 = vld [vmem:[#allocation11 + $0x608] sm:$0xff]  ;;  %v1005_v47 = vpack.c.bf16 %v775_v41, %v765_v39  ;;  %v1014_v48 = vpack.c.bf16 %v794_v43, %v784_v42  ;;  %v783_v49 = vld [vmem:[#allocation11 + $0x5a0] sm:$0xff] }
  0x97   :  { %1135 = vmatpush1.bf16.msra.mxu1 %v975_v11  ;;  %1095 = vmatprep.subr.bf16.mxu0 %v984_v12  ;;  %v793_v50 = vld [vmem:[#allocation11 + $0x5f0] sm:$0xff]  ;;  %v1016_v52 = vpack.c.bf16 %v796_v45, %v786_v44  ;;  %v795_v53 = vld [vmem:[#allocation11 + $0x600] sm:$0xff]  ;;  %v804_v54 = vld [vmem:[#allocation11 + $0x648] sm:$0xff] }
  0x98   :  { %1136 = vmatprep.subr.bf16.mxu1 %v986_v16  ;;  %v785_v51 = vld [vmem:[#allocation11 + $0x5b0] sm:$0xff]  ;;  %v814_v55 = vld [vmem:[#allocation11 + $0x698] sm:$0xff]  ;;  %v816_v57 = vld [vmem:[#allocation11 + $0x6a8] sm:$0xff]  ;;  %v1013_v58 = vpack.c.bf16 %v793_v50, %v783_v49 }
  0x99   :  { %v806_v56 = vld [vmem:[#allocation11 + $0x658] sm:$0xff]  ;;  %v1015_v59 = vpack.c.bf16 %v795_v53, %v785_v51  ;;  %v1024_v60 = vpack.c.bf16 %v814_v55, %v804_v54  ;;  %v803_v61 = vld [vmem:[#allocation11 + $0x640] sm:$0xff]  ;;  %v813_v62 = vld [vmem:[#allocation11 + $0x690] sm:$0xff] }
  0x9a   :  { %1096 = vmatpush1.bf16.msra.mxu0 %v983_v22  ;;  %v805_v63 = vld [vmem:[#allocation11 + $0x650] sm:$0xff]  ;;  %v1026_v0 = vpack.c.bf16 %v816_v57, %v806_v56  ;;  %v815_v1 = vld [vmem:[#allocation11 + $0x6a0] sm:$0xff]  ;;  %v824_v2 = vld [vmem:[#allocation11 + $0x6e8] sm:$0xff]  ;;  %v1023_v6 = vpack.c.bf16 %v813_v62, %v803_v61 }
  0x9b   :  { %1137 = vmatpush1.bf16.msra.mxu1 %v985_v23  ;;  %1097 = vmatprep.subr.bf16.mxu0 %v994_v24  ;;  %v834_v3 = vld [vmem:[#allocation11 + $0x738] sm:$0xff]  ;;  %v836_v5 = vld [vmem:[#allocation11 + $0x748] sm:$0xff]  ;;  %v823_v7 = vld [vmem:[#allocation11 + $0x6e0] sm:$0xff]  ;;  %v1025_v8 = vpack.c.bf16 %v815_v1, %v805_v63 }
  0x9c   :  { %1138 = vmatprep.subr.bf16.mxu1 %v996_v28  ;;  %v826_v4 = vld [vmem:[#allocation11 + $0x6f8] sm:$0xff]  ;;  %v1034_v9 = vpack.c.bf16 %v834_v3, %v824_v2  ;;  %v833_v10 = vld [vmem:[#allocation11 + $0x730] sm:$0xff]  ;;  %v835_v12 = vld [vmem:[#allocation11 + $0x740] sm:$0xff] }
  0x9d   :  { %v825_v11 = vld [vmem:[#allocation11 + $0x6f0] sm:$0xff]  ;;  %v1036_v13 = vpack.c.bf16 %v836_v5, %v826_v4  ;;  %v844_v14 = vld [vmem:[#allocation11 + $0x788] sm:$0xff]  ;;  %v854_v15 = vld [vmem:[#allocation11 + $0x7d8] sm:$0xff]  ;;  %v1033_v20 = vpack.c.bf16 %v833_v10, %v823_v7 }
  0x9e   :  { %1098 = vmatpush1.bf16.msra.mxu0 %v993_v34  ;;  %v120_v16 = vld [vmem:[#allocation5 + $0x8] sm:$0xff]  ;;  %v856_v18 = vld [vmem:[#allocation11 + $0x7e8] sm:$0xff]  ;;  %v1035_v21 = vpack.c.bf16 %v835_v12, %v825_v11  ;;  %v1044_v22 = vpack.c.bf16 %v854_v15, %v844_v14  ;;  %v843_v23 = vld [vmem:[#allocation11 + $0x780] sm:$0xff] }
  0x9f   :  { %1139 = vmatpush1.bf16.msra.mxu1 %v995_v35  ;;  %1099 = vmatprep.subr.bf16.mxu0 %v1004_v36  ;;  %v846_v17 = vld [vmem:[#allocation11 + $0x798] sm:$0xff]  ;;  %v2083_v19 = vpack.c.bf16 %v120_v16, %v120_v16  ;;  %v853_v24 = vld [vmem:[#allocation11 + $0x7d0] sm:$0xff]  ;;  %v855_v27 = vld [vmem:[#allocation11 + $0x7e0] sm:$0xff] }
  0xa0   :  { %1140 = vmatprep.subr.bf16.mxu1 %v1006_v40  ;;  %v845_v25 = vld [vmem:[#allocation11 + $0x790] sm:$0xff]  ;;  %v1046_v26 = vpack.c.bf16 %v856_v18, %v846_v17  ;;  %v864_v28 = vld [vmem:[#allocation11 + $0x828] sm:$0xff]  ;;  %v874_v29 = vld [vmem:[#allocation11 + $0x878] sm:$0xff]  ;;  %v1043_v32 = vpack.c.bf16 %v853_v24, %v843_v23 }
  0xa1   :  { %1115 = vmatprep.mubr.bf16.mxu0 %v2083_v19  ;;  %v866_v30 = vld [vmem:[#allocation11 + $0x838] sm:$0xff]  ;;  %v876_v31 = vld [vmem:[#allocation11 + $0x888] sm:$0xff]  ;;  %1156 = vmatprep.mubr.bf16.mxu1 %v2083_v19  ;;  %v1045_v33 = vpack.c.bf16 %v855_v27, %v845_v25  ;;  %v1054_v34 = vpack.c.bf16 %v874_v29, %v864_v28  ;;  %v863_v35 = vld [vmem:[#allocation11 + $0x820] sm:$0xff] }
  0xa2   :  { %1100 = vmatpush1.bf16.msra.mxu0 %v1003_v46  ;;  %v873_v36 = vld [vmem:[#allocation11 + $0x870] sm:$0xff]  ;;  %v1056_v38 = vpack.c.bf16 %v876_v31, %v866_v30  ;;  %v875_v39 = vld [vmem:[#allocation11 + $0x880] sm:$0xff]  ;;  %v884_v40 = vld [vmem:[#allocation11 + $0x8c8] sm:$0xff] }
  0xa3   :  { %1141 = vmatpush1.bf16.msra.mxu1 %v1005_v47  ;;  %1101 = vmatprep.subr.bf16.mxu0 %v1014_v48  ;;  %v865_v37 = vld [vmem:[#allocation11 + $0x830] sm:$0xff]  ;;  %v894_v41 = vld [vmem:[#allocation11 + $0x918] sm:$0xff]  ;;  %v896_v43 = vld [vmem:[#allocation11 + $0x928] sm:$0xff]  ;;  %v1053_v44 = vpack.c.bf16 %v873_v36, %v863_v35 }
  0xa4   :  { %1142 = vmatprep.subr.bf16.mxu1 %v1016_v52  ;;  %v886_v42 = vld [vmem:[#allocation11 + $0x8d8] sm:$0xff]  ;;  %v1055_v45 = vpack.c.bf16 %v875_v39, %v865_v37  ;;  %v1064_v46 = vpack.c.bf16 %v894_v41, %v884_v40  ;;  %v883_v47 = vld [vmem:[#allocation11 + $0x8c0] sm:$0xff]  ;;  %v893_v48 = vld [vmem:[#allocation11 + $0x910] sm:$0xff] }
  0xa5   :  { %v885_v49 = vld [vmem:[#allocation11 + $0x8d0] sm:$0xff]  ;;  %v1066_v50 = vpack.c.bf16 %v896_v43, %v886_v42  ;;  %v895_v51 = vld [vmem:[#allocation11 + $0x920] sm:$0xff]  ;;  %v904_v52 = vld [vmem:[#allocation11 + $0x968] sm:$0xff]  ;;  %v1063_v56 = vpack.c.bf16 %v893_v48, %v883_v47 }
  0xa6   :  { %1102 = vmatpush1.bf16.msra.mxu0 %v1013_v58  ;;  %v914_v53 = vld [vmem:[#allocation11 + $0x9b8] sm:$0xff]  ;;  %v916_v55 = vld [vmem:[#allocation11 + $0x9c8] sm:$0xff]  ;;  %v1065_v57 = vpack.c.bf16 %v895_v51, %v885_v49  ;;  %v905_v61 = vld [vmem:[#allocation11 + $0x970] sm:$0xff] }
  0xa7   :  { %1143 = vmatpush1.bf16.msra.mxu1 %v1015_v59  ;;  %1103 = vmatprep.subr.bf16.mxu0 %v1024_v60  ;;  %v906_v54 = vld [vmem:[#allocation11 + $0x978] sm:$0xff]  ;;  %v1074_v58 = vpack.c.bf16 %v914_v53, %v904_v52  ;;  %v903_v59 = vld [vmem:[#allocation11 + $0x960] sm:$0xff]  ;;  %v913_v60 = vld [vmem:[#allocation11 + $0x9b0] sm:$0xff] }
  0xa8   :  { %1144 = vmatprep.subr.bf16.mxu1 %v1026_v0  ;;  %v1076_v62 = vpack.c.bf16 %v916_v55, %v906_v54  ;;  %v915_v63 = vld [vmem:[#allocation11 + $0x9c0] sm:$0xff]  ;;  %v608_v0 = vld [vmem:[#allocation11 + $0x28] sm:$0xff]  ;;  %v618_v1 = vld [vmem:[#allocation11 + $0x78] sm:$0xff]  ;;  %v1073_v4 = vpack.c.bf16 %v913_v60, %v903_v59 }
  0xa9   :  { %v610_v2 = vld [vmem:[#allocation11 + $0x38] sm:$0xff]  ;;  %v620_v3 = vld [vmem:[#allocation11 + $0x88] sm:$0xff]  ;;  %v119_v5 = vld [vmem:[#allocation5] sm:$0xff]  ;;  %v928_v7 = vpack.c.bf16 %v618_v1, %v608_v0 }
  0xaa   :  { %1104 = vmatpush1.bf16.msra.mxu0 %v1023_v6  ;;  %v1075_v6 = vpack.c.bf16 %v915_v63, %v905_v61  ;;  %v609_v10 = vld [vmem:[#allocation11 + $0x30] sm:$0xff]  ;;  %v930_v11 = vpack.c.bf16 %v620_v3, %v610_v2  ;;  %v619_v12 = vld [vmem:[#allocation11 + $0x80] sm:$0xff]  ;;  %v638_v14 = vld [vmem:[#allocation11 + $0x118] sm:$0xff]  ;;  %v2087_v15 = vpack.c.bf16 %v119_v5, %v119_v5 }
  0xab   :  { %1145 = vmatpush1.bf16.msra.mxu1 %v1025_v8  ;;  %1105 = vmatprep.subr.bf16.mxu0 %v1034_v9  ;;  %v607_v8 = vld [vmem:[#allocation11 + $0x20] sm:$0xff]  ;;  %v617_v9 = vld [vmem:[#allocation11 + $0x70] sm:$0xff]  ;;  %v630_v16 = vld [vmem:[#allocation11 + $0xd8] sm:$0xff] }
  0xac   :  { %1146 = vmatprep.subr.bf16.mxu1 %v1036_v13  ;;  %v628_v13 = vld [vmem:[#allocation11 + $0xc8] sm:$0xff]  ;;  %v927_v18 = vpack.c.bf16 %v617_v9, %v607_v8  ;;  %v637_v23 = vld [vmem:[#allocation11 + $0x110] sm:$0xff]  ;;  %v658_v28 = vld [vmem:[#allocation11 + $0x1b8] sm:$0xff] }
  0xad   :  { %v640_v17 = vld [vmem:[#allocation11 + $0x128] sm:$0xff]  ;;  %v629_v24 = vld [vmem:[#allocation11 + $0xd0] sm:$0xff]  ;;  %v650_v29 = vld [vmem:[#allocation11 + $0x178] sm:$0xff] }
  0xae   :  { %1106 = vmatpush1.bf16.msra.mxu0 %v1033_v20  ;;  %v929_v20 = vpack.c.bf16 %v619_v12, %v609_v10  ;;  %v940_v25 = vpack.c.bf16 %v640_v17, %v630_v16  ;;  %v648_v27 = vld [vmem:[#allocation11 + $0x168] sm:$0xff]  ;;  %v657_v35 = vld [vmem:[#allocation11 + $0x1b0] sm:$0xff]  ;;  %v678_v40 = vld [vmem:[#allocation11 + $0x258] sm:$0xff] }
  0xaf   :  { %1147 = vmatpush1.bf16.msra.mxu1 %v1035_v21  ;;  %1107 = vmatprep.subr.bf16.mxu0 %v1044_v22  ;;  %v938_v21 = vpack.c.bf16 %v638_v14, %v628_v13  ;;  %v627_v22 = vld [vmem:[#allocation11 + $0xc0] sm:$0xff]  ;;  %v660_v30 = vld [vmem:[#allocation11 + $0x1c8] sm:$0xff]  ;;  %v649_v36 = vld [vmem:[#allocation11 + $0x170] sm:$0xff] }
  0xb0   :  { %1148 = vmatprep.subr.bf16.mxu1 %v1046_v26  ;;  %v639_v26 = vld [vmem:[#allocation11 + $0x120] sm:$0xff]  ;;  %v937_v31 = vpack.c.bf16 %v637_v23, %v627_v22  ;;  %v950_v37 = vpack.c.bf16 %v660_v30, %v650_v29  ;;  %v668_v39 = vld [vmem:[#allocation11 + $0x208] sm:$0xff]  ;;  %v670_v41 = vld [vmem:[#allocation11 + $0x218] sm:$0xff] }
  0xb1   :  { %v680_v42 = vld [vmem:[#allocation11 + $0x268] sm:$0xff]  ;;  %v677_v47 = vld [vmem:[#allocation11 + $0x250] sm:$0xff]  ;;  %v698_v52 = vld [vmem:[#allocation11 + $0x2f8] sm:$0xff] }
  0xb2   :  { %1108 = vmatpush1.bf16.msra.mxu0 %v1043_v32  ;;  %v939_v32 = vpack.c.bf16 %v639_v26, %v629_v24  ;;  %v669_v48 = vld [vmem:[#allocation11 + $0x210] sm:$0xff]  ;;  %v960_v49 = vpack.c.bf16 %v680_v42, %v670_v41  ;;  %v688_v51 = vld [vmem:[#allocation11 + $0x2a8] sm:$0xff]  ;;  %v690_v53 = vld [vmem:[#allocation11 + $0x2b8] sm:$0xff] }
  0xb3   :  { %1149 = vmatpush1.bf16.msra.mxu1 %v1045_v33  ;;  %1109 = vmatprep.subr.bf16.mxu0 %v1054_v34  ;;  %v948_v33 = vpack.c.bf16 %v658_v28, %v648_v27  ;;  %v647_v34 = vld [vmem:[#allocation11 + $0x160] sm:$0xff]  ;;  %v700_v54 = vld [vmem:[#allocation11 + $0x308] sm:$0xff]  ;;  %v697_v59 = vld [vmem:[#allocation11 + $0x2f0] sm:$0xff] }
  0xb4   :  { %1150 = vmatprep.subr.bf16.mxu1 %v1056_v38  ;;  %v659_v38 = vld [vmem:[#allocation11 + $0x1c0] sm:$0xff]  ;;  %v947_v43 = vpack.c.bf16 %v657_v35, %v647_v34  ;;  %v689_v60 = vld [vmem:[#allocation11 + $0x2b0] sm:$0xff]  ;;  %v970_v61 = vpack.c.bf16 %v700_v54, %v690_v53  ;;  %v708_v63 = vld [vmem:[#allocation11 + $0x348] sm:$0xff] }
  0xb5   :  { %v718_v0 = vld [vmem:[#allocation11 + $0x398] sm:$0xff]  ;;  %v720_v2 = vld [vmem:[#allocation11 + $0x3a8] sm:$0xff]  ;;  %v709_v8 = vld [vmem:[#allocation11 + $0x350] sm:$0xff] }
  0xb6   :  { %1110 = vmatpush1.bf16.msra.mxu0 %v1053_v44  ;;  %v949_v44 = vpack.c.bf16 %v659_v38, %v649_v36  ;;  %v710_v1 = vld [vmem:[#allocation11 + $0x358] sm:$0xff]  ;;  %v978_v5 = vpack.c.bf16 %v718_v0, %v708_v63  ;;  %v719_v10 = vld [vmem:[#allocation11 + $0x3a0] sm:$0xff]  ;;  %v740_v14 = vld [vmem:[#allocation11 + $0x448] sm:$0xff] }
  0xb7   :  { %1151 = vmatpush1.bf16.msra.mxu1 %v1055_v45  ;;  %1111 = vmatprep.subr.bf16.mxu0 %v1064_v46  ;;  %v958_v45 = vpack.c.bf16 %v678_v40, %v668_v39  ;;  %v667_v46 = vld [vmem:[#allocation11 + $0x200] sm:$0xff]  ;;  %v980_v9 = vpack.c.bf16 %v720_v2, %v710_v1  ;;  %v738_v12 = vld [vmem:[#allocation11 + $0x438] sm:$0xff]  ;;  %v979_v17 = vpack.c.bf16 %v719_v10, %v709_v8  ;;  %v729_v22 = vld [vmem:[#allocation11 + $0x3f0] sm:$0xff] }
  0xb8   :  { %1152 = vmatprep.subr.bf16.mxu1 %v1066_v50  ;;  %v679_v50 = vld [vmem:[#allocation11 + $0x260] sm:$0xff]  ;;  %v957_v55 = vpack.c.bf16 %v677_v47, %v667_v46  ;;  %v730_v13 = vld [vmem:[#allocation11 + $0x3f8] sm:$0xff]  ;;  %v760_v28 = vld [vmem:[#allocation11 + $0x4e8] sm:$0xff] }
  0xb9   :  { %v990_v23 = vpack.c.bf16 %v740_v14, %v730_v13  ;;  %v739_v24 = vld [vmem:[#allocation11 + $0x440] sm:$0xff]  ;;  %v758_v26 = vld [vmem:[#allocation11 + $0x4d8] sm:$0xff]  ;;  %v749_v34 = vld [vmem:[#allocation11 + $0x490] sm:$0xff] }
  0xba   :  { %1112 = vmatpush1.bf16.msra.mxu0 %v1063_v56  ;;  %v959_v56 = vpack.c.bf16 %v679_v50, %v669_v48  ;;  %v750_v27 = vld [vmem:[#allocation11 + $0x498] sm:$0xff]  ;;  %v989_v30 = vpack.c.bf16 %v739_v24, %v729_v22  ;;  %v759_v36 = vld [vmem:[#allocation11 + $0x4e0] sm:$0xff]  ;;  %v780_v40 = vld [vmem:[#allocation11 + $0x588] sm:$0xff] }
  0xbb   :  { %1153 = vmatpush1.bf16.msra.mxu1 %v1065_v57  ;;  %1113 = vmatprep.subr.bf16.mxu0 %v1074_v58  ;;  %v968_v57 = vpack.c.bf16 %v698_v52, %v688_v51  ;;  %v687_v58 = vld [vmem:[#allocation11 + $0x2a0] sm:$0xff]  ;;  %v1000_v35 = vpack.c.bf16 %v760_v28, %v750_v27  ;;  %v778_v38 = vld [vmem:[#allocation11 + $0x578] sm:$0xff]  ;;  %v999_v42 = vpack.c.bf16 %v759_v36, %v749_v34  ;;  %v769_v46 = vld [vmem:[#allocation11 + $0x530] sm:$0xff] }
  0xbc   :  { %1154 = vmatprep.subr.bf16.mxu1 %v1076_v62  ;;  %v699_v62 = vld [vmem:[#allocation11 + $0x300] sm:$0xff]  ;;  %v967_v3 = vpack.c.bf16 %v697_v59, %v687_v58  ;;  %v770_v39 = vld [vmem:[#allocation11 + $0x538] sm:$0xff]  ;;  %v800_v52 = vld [vmem:[#allocation11 + $0x628] sm:$0xff] }
  0xbd   :  { %v1010_v47 = vpack.c.bf16 %v780_v40, %v770_v39  ;;  %v779_v48 = vld [vmem:[#allocation11 + $0x580] sm:$0xff]  ;;  %v798_v50 = vld [vmem:[#allocation11 + $0x618] sm:$0xff]  ;;  %v789_v58 = vld [vmem:[#allocation11 + $0x5d0] sm:$0xff] }
  0xbe   :  { %1114 = vmatpush1.bf16.msra.mxu0 %v1073_v4  ;;  %v969_v4 = vpack.c.bf16 %v699_v62, %v689_v60  ;;  %v790_v51 = vld [vmem:[#allocation11 + $0x5d8] sm:$0xff]  ;;  %v1009_v54 = vpack.c.bf16 %v779_v48, %v769_v46  ;;  %v799_v60 = vld [vmem:[#allocation11 + $0x620] sm:$0xff]  ;;  %v820_v0 = vld [vmem:[#allocation11 + $0x6c8] sm:$0xff] }
  0xbf   :  { %1155 = vmatpush1.bf16.msra.mxu1 %v1075_v6  ;;  %1165 = vmatprep.subr.bf16.mxu0 %v928_v7  ;;  %v707_v6 = vld [vmem:[#allocation11 + $0x340] sm:$0xff]  ;;  %v717_v7 = vld [vmem:[#allocation11 + $0x390] sm:$0xff]  ;;  %v1020_v59 = vpack.c.bf16 %v800_v52, %v790_v51  ;;  %v818_v62 = vld [vmem:[#allocation11 + $0x6b8] sm:$0xff]  ;;  %v1019_v2 = vpack.c.bf16 %v799_v60, %v789_v58 }
  0xc0   :  { %1206 = vmatprep.subr.bf16.mxu1 %v930_v11  ;;  %v728_v11 = vld [vmem:[#allocation11 + $0x3e8] sm:$0xff]  ;;  %v977_v16 = vpack.c.bf16 %v717_v7, %v707_v6  ;;  %v810_v63 = vld [vmem:[#allocation11 + $0x678] sm:$0xff]  ;;  %v809_v6 = vld [vmem:[#allocation11 + $0x670] sm:$0xff] }
  0xc1   :  { %1116 = vmatmul.mubr.bf16.vlgmr.msra.gmra.mrb[0].mxu0 %v2087_v15  ;;  %v1030_v7 = vpack.c.bf16 %v820_v0, %v810_v63  ;;  %v819_v8 = vld [vmem:[#allocation11 + $0x6c0] sm:$0xff]  ;;  %v838_v10 = vld [vmem:[#allocation11 + $0x758] sm:$0xff] }
  0xc2   :  { %1157 = vmatmul.mubr.bf16.vlgmr.msra.gmra.mrb[0].mxu1 %v2087_v15  ;;  %1166 = vmatpush1.bf16.msra.mxu0 %v927_v18  ;;  %v988_v18 = vpack.c.bf16 %v738_v12, %v728_v11  ;;  %v830_v11 = vld [vmem:[#allocation11 + $0x718] sm:$0xff]  ;;  %v840_v12 = vld [vmem:[#allocation11 + $0x768] sm:$0xff]  ;;  %v1029_v14 = vpack.c.bf16 %v819_v8, %v809_v6  ;;  %v839_v22 = vld [vmem:[#allocation11 + $0x760] sm:$0xff] }
  0xc3   :  { %1207 = vmatpush1.bf16.msra.mxu1 %v929_v20  ;;  %1167 = vmatprep.subr.bf16.mxu0 %v938_v21  ;;  %v727_v20 = vld [vmem:[#allocation11 + $0x3e0] sm:$0xff]  ;;  %v737_v21 = vld [vmem:[#allocation11 + $0x430] sm:$0xff]  ;;  %v858_v24 = vld [vmem:[#allocation11 + $0x7f8] sm:$0xff] }
  0xc4   :  { %1208 = vmatprep.subr.bf16.mxu1 %v940_v25  ;;  %1197 = vmatprep.mubr.bf16.mxu0 %v2083_v19  ;;  %v748_v25 = vld [vmem:[#allocation11 + $0x488] sm:$0xff]  ;;  %v987_v29 = vpack.c.bf16 %v737_v21, %v727_v20  ;;  %v829_v20 = vld [vmem:[#allocation11 + $0x710] sm:$0xff]  ;;  %v1040_v21 = vpack.c.bf16 %v840_v12, %v830_v11  ;;  %v859_v34 = vld [vmem:[#allocation11 + $0x800] sm:$0xff] }
  0xc5   :  { %1238 = vmatprep.mubr.bf16.mxu1 %v2083_v19  ;;  %v1039_v28 = vpack.c.bf16 %v839_v22, %v829_v20  ;;  %v878_v36 = vld [vmem:[#allocation11 + $0x898] sm:$0xff]  ;;  %v879_v46 = vld [vmem:[#allocation11 + $0x8a0] sm:$0xff]  ;;  %v133_v20 = vld [vmem:[#allocation10 + $0x50] sm:$0xff] }
  0xc6   :  { %1168 = vmatpush1.bf16.msra.mxu0 %v937_v31  ;;  %v998_v31 = vpack.c.bf16 %v758_v26, %v748_v25  ;;  %v850_v25 = vld [vmem:[#allocation11 + $0x7b8] sm:$0xff]  ;;  %v860_v26 = vld [vmem:[#allocation11 + $0x808] sm:$0xff]  ;;  %v899_v58 = vld [vmem:[#allocation11 + $0x940] sm:$0xff] }
  0xc7   :  { %1209 = vmatpush1.bf16.msra.mxu1 %v939_v32  ;;  %1169 = vmatprep.subr.bf16.mxu0 %v948_v33  ;;  %v747_v32 = vld [vmem:[#allocation11 + $0x480] sm:$0xff]  ;;  %v757_v33 = vld [vmem:[#allocation11 + $0x4d0] sm:$0xff]  ;;  %v898_v48 = vld [vmem:[#allocation11 + $0x938] sm:$0xff] }
  0xc8   :  { %1210 = vmatprep.subr.bf16.mxu1 %v950_v37  ;;  %v768_v37 = vld [vmem:[#allocation11 + $0x528] sm:$0xff]  ;;  %v997_v41 = vpack.c.bf16 %v757_v33, %v747_v32  ;;  %v849_v32 = vld [vmem:[#allocation11 + $0x7b0] sm:$0xff]  ;;  %v1050_v33 = vpack.c.bf16 %v860_v26, %v850_v25  ;;  %v918_v60 = vld [vmem:[#allocation11 + $0x9d8] sm:$0xff] }
  0xc9   :  { %v1049_v40 = vpack.c.bf16 %v859_v34, %v849_v32  ;;  %v919_v6 = vld [vmem:[#allocation11 + $0x9e0] sm:$0xff]  ;;  %v622_v8 = vld [vmem:[#allocation11 + $0x98] sm:$0xff]  ;;  %v116_v26 = vld [vmem:[#allocation2 + $0x8] sm:$0xff] }
  0xca   :  { %1170 = vmatpush1.bf16.msra.mxu0 %v947_v43  ;;  %v1008_v43 = vpack.c.bf16 %v778_v38, %v768_v37  ;;  %v870_v37 = vld [vmem:[#allocation11 + $0x858] sm:$0xff]  ;;  %v880_v38 = vld [vmem:[#allocation11 + $0x8a8] sm:$0xff] }
  0xcb   :  { %1211 = vmatpush1.bf16.msra.mxu1 %v949_v44  ;;  %1171 = vmatprep.subr.bf16.mxu0 %v958_v45  ;;  %v767_v44 = vld [vmem:[#allocation11 + $0x520] sm:$0xff]  ;;  %v777_v45 = vld [vmem:[#allocation11 + $0x570] sm:$0xff]  ;;  %v642_v22 = vld [vmem:[#allocation11 + $0x138] sm:$0xff] }
  0xcc   :  { %1212 = vmatprep.subr.bf16.mxu1 %v960_v49  ;;  %v788_v49 = vld [vmem:[#allocation11 + $0x5c8] sm:$0xff]  ;;  %v1007_v53 = vpack.c.bf16 %v777_v45, %v767_v44  ;;  %v869_v44 = vld [vmem:[#allocation11 + $0x850] sm:$0xff]  ;;  %v1060_v45 = vpack.c.bf16 %v880_v38, %v870_v37  ;;  %v174_v37 = vld [vmem:[#allocation10 + $0x198] sm:$0xff]  ;;  %v2094_v38 = vpack.c.bf16 %v116_v26, %v116_v26 }
  0xcd   :  { %v1059_v52 = vpack.c.bf16 %v879_v46, %v869_v44  ;;  %v652_v34 = vld [vmem:[#allocation11 + $0x188] sm:$0xff]  ;;  %v163_v44 = vld [vmem:[#allocation10 + $0x140] sm:$0xff]  ;;  %v173_v46 = vld [vmem:[#allocation10 + $0x190] sm:$0xff] }
  0xce   :  { %1172 = vmatpush1.bf16.msra.mxu0 %v957_v55  ;;  %v1018_v55 = vpack.c.bf16 %v798_v50, %v788_v49  ;;  %v890_v49 = vld [vmem:[#allocation11 + $0x8f8] sm:$0xff]  ;;  %v900_v50 = vld [vmem:[#allocation11 + $0x948] sm:$0xff] }
  0xcf   :  { %1213 = vmatpush1.bf16.msra.mxu1 %v959_v56  ;;  %1173 = vmatprep.subr.bf16.mxu0 %v968_v57  ;;  %v787_v56 = vld [vmem:[#allocation11 + $0x5c0] sm:$0xff]  ;;  %v797_v57 = vld [vmem:[#allocation11 + $0x610] sm:$0xff] }
  0xd0   :  { %1214 = vmatprep.subr.bf16.mxu1 %v970_v61  ;;  %v808_v61 = vld [vmem:[#allocation11 + $0x668] sm:$0xff]  ;;  %v1017_v1 = vpack.c.bf16 %v797_v57, %v787_v56  ;;  %v889_v56 = vld [vmem:[#allocation11 + $0x8f0] sm:$0xff]  ;;  %v1070_v57 = vpack.c.bf16 %v900_v50, %v890_v49  ;;  %v194_v50 = vld [vmem:[#allocation10 + $0x238] sm:$0xff] }
  0xd1   :  { %v1069_v0 = vpack.c.bf16 %v899_v58, %v889_v56  ;;  %v184_v49 = vld [vmem:[#allocation10 + $0x1e8] sm:$0xff]  ;;  %v183_v56 = vld [vmem:[#allocation10 + $0x1e0] sm:$0xff]  ;;  %v193_v58 = vld [vmem:[#allocation10 + $0x230] sm:$0xff] }
  0xd2   :  { %1174 = vmatpush1.bf16.msra.mxu0 %v967_v3  ;;  %v1028_v3 = vpack.c.bf16 %v818_v62, %v808_v61  ;;  %v910_v61 = vld [vmem:[#allocation11 + $0x998] sm:$0xff]  ;;  %v920_v62 = vld [vmem:[#allocation11 + $0x9e8] sm:$0xff] }
  0xd3   :  { %1215 = vmatpush1.bf16.msra.mxu1 %v969_v4  ;;  %1175 = vmatprep.subr.bf16.mxu0 %v978_v5  ;;  %v807_v4 = vld [vmem:[#allocation11 + $0x660] sm:$0xff]  ;;  %v817_v5 = vld [vmem:[#allocation11 + $0x6b0] sm:$0xff] }
  0xd4   :  { %1216 = vmatprep.subr.bf16.mxu1 %v980_v9  ;;  %v828_v9 = vld [vmem:[#allocation11 + $0x708] sm:$0xff]  ;;  %v1027_v13 = vpack.c.bf16 %v817_v5, %v807_v4  ;;  %v909_v4 = vld [vmem:[#allocation11 + $0x990] sm:$0xff]  ;;  %v1080_v5 = vpack.c.bf16 %v920_v62, %v910_v61 }
  0xd5   :  { %v1079_v12 = vpack.c.bf16 %v919_v6, %v909_v4  ;;  %v204_v61 = vld [vmem:[#allocation10 + $0x288] sm:$0xff] }
  0xd6   :  { %1176 = vmatpush1.bf16.msra.mxu0 %v977_v16  ;;  %v1038_v16 = vpack.c.bf16 %v838_v10, %v828_v9  ;;  %v124_v9 = vld [vmem:[#allocation10 + $0x8] sm:$0xff]  ;;  %v134_v10 = vld [vmem:[#allocation10 + $0x58] sm:$0xff] }
  0xd7   :  { %1217 = vmatpush1.bf16.msra.mxu1 %v979_v17  ;;  %1177 = vmatprep.subr.bf16.mxu0 %v988_v18  ;;  %v827_v17 = vld [vmem:[#allocation11 + $0x700] sm:$0xff]  ;;  %v837_v18 = vld [vmem:[#allocation11 + $0x750] sm:$0xff]  ;;  %v712_v6 = vld [vmem:[#allocation11 + $0x368] sm:$0xff] }
  0xd8   :  { %1218 = vmatprep.subr.bf16.mxu1 %v990_v23  ;;  %v848_v23 = vld [vmem:[#allocation11 + $0x7a8] sm:$0xff]  ;;  %v1037_v27 = vpack.c.bf16 %v837_v18, %v827_v17  ;;  %v123_v17 = vld [vmem:[#allocation10] sm:$0xff]  ;;  %v444_v18 = vpack.c.bf16 %v134_v10, %v124_v9  ;;  %v234_v9 = vld [vmem:[#allocation10 + $0x378] sm:$0xff] }
  0xda   :  { %1178 = vmatpush1.bf16.msra.mxu0 %v987_v29  ;;  %v1048_v29 = vpack.c.bf16 %v858_v24, %v848_v23  ;;  %v144_v23 = vld [vmem:[#allocation10 + $0xa8] sm:$0xff]  ;;  %v154_v24 = vld [vmem:[#allocation10 + $0xf8] sm:$0xff] }
  0xdb   :  { %1219 = vmatpush1.bf16.msra.mxu1 %v989_v30  ;;  %1179 = vmatprep.subr.bf16.mxu0 %v998_v31  ;;  %v847_v30 = vld [vmem:[#allocation11 + $0x7a0] sm:$0xff]  ;;  %v857_v31 = vld [vmem:[#allocation11 + $0x7f0] sm:$0xff]  ;;  %v454_v32 = vpack.c.bf16 %v154_v24, %v144_v23  ;;  %v254_v23 = vld [vmem:[#allocation10 + $0x418] sm:$0xff] }
  0xdc   :  { %1220 = vmatprep.subr.bf16.mxu1 %v1000_v35  ;;  %v868_v35 = vld [vmem:[#allocation11 + $0x848] sm:$0xff]  ;;  %v1047_v39 = vpack.c.bf16 %v857_v31, %v847_v30  ;;  %v641_v30 = vld [vmem:[#allocation11 + $0x130] sm:$0xff]  ;;  %v143_v31 = vld [vmem:[#allocation10 + $0xa0] sm:$0xff] }
  0xde   :  { %1180 = vmatpush1.bf16.msra.mxu0 %v997_v41  ;;  %v1058_v41 = vpack.c.bf16 %v878_v36, %v868_v35  ;;  %v662_v35 = vld [vmem:[#allocation11 + $0x1d8] sm:$0xff]  ;;  %v164_v36 = vld [vmem:[#allocation10 + $0x148] sm:$0xff] }
  0xdf   :  { %1221 = vmatpush1.bf16.msra.mxu1 %v999_v42  ;;  %1181 = vmatprep.subr.bf16.mxu0 %v1008_v43  ;;  %v867_v42 = vld [vmem:[#allocation11 + $0x840] sm:$0xff]  ;;  %v877_v43 = vld [vmem:[#allocation11 + $0x890] sm:$0xff] }
  0xe0   :  { %1222 = vmatprep.subr.bf16.mxu1 %v1010_v47  ;;  %v888_v47 = vld [vmem:[#allocation11 + $0x8e8] sm:$0xff]  ;;  %v1057_v51 = vpack.c.bf16 %v877_v43, %v867_v42  ;;  %v651_v42 = vld [vmem:[#allocation11 + $0x180] sm:$0xff]  ;;  %v661_v43 = vld [vmem:[#allocation11 + $0x1d0] sm:$0xff] }
  0xe2   :  { %1182 = vmatpush1.bf16.msra.mxu0 %v1007_v53  ;;  %v1068_v53 = vpack.c.bf16 %v898_v48, %v888_v47  ;;  %v672_v47 = vld [vmem:[#allocation11 + $0x228] sm:$0xff]  ;;  %v682_v48 = vld [vmem:[#allocation11 + $0x278] sm:$0xff] }
  0xe3   :  { %1223 = vmatpush1.bf16.msra.mxu1 %v1009_v54  ;;  %1183 = vmatprep.subr.bf16.mxu0 %v1018_v55  ;;  %v887_v54 = vld [vmem:[#allocation11 + $0x8e0] sm:$0xff]  ;;  %v897_v55 = vld [vmem:[#allocation11 + $0x930] sm:$0xff] }
  0xe4   :  { %1224 = vmatprep.subr.bf16.mxu1 %v1020_v59  ;;  %v908_v59 = vld [vmem:[#allocation11 + $0x988] sm:$0xff]  ;;  %v1067_v63 = vpack.c.bf16 %v897_v55, %v887_v54  ;;  %v671_v54 = vld [vmem:[#allocation11 + $0x220] sm:$0xff]  ;;  %v681_v55 = vld [vmem:[#allocation11 + $0x270] sm:$0xff] }
  0xe5   :  { %v961_v62 = vpack.c.bf16 %v681_v55, %v671_v54  ;;  %v283_v54 = vld [vmem:[#allocation10 + $0x500] sm:$0xff] }
  0xe6   :  { %1184 = vmatpush1.bf16.msra.mxu0 %v1017_v1  ;;  %v1078_v1 = vpack.c.bf16 %v918_v60, %v908_v59  ;;  %v692_v59 = vld [vmem:[#allocation11 + $0x2c8] sm:$0xff]  ;;  %v702_v60 = vld [vmem:[#allocation11 + $0x318] sm:$0xff] }
  0xe7   :  { %1225 = vmatpush1.bf16.msra.mxu1 %v1019_v2  ;;  %1185 = vmatprep.subr.bf16.mxu0 %v1028_v3  ;;  %v907_v2 = vld [vmem:[#allocation11 + $0x980] sm:$0xff]  ;;  %v917_v3 = vld [vmem:[#allocation11 + $0x9d0] sm:$0xff] }
  0xe8   :  { %1226 = vmatprep.subr.bf16.mxu1 %v1030_v7  ;;  %v612_v7 = vld [vmem:[#allocation11 + $0x48] sm:$0xff]  ;;  %v1077_v11 = vpack.c.bf16 %v917_v3, %v907_v2  ;;  %v701_v2 = vld [vmem:[#allocation11 + $0x310] sm:$0xff]  ;;  %v203_v3 = vld [vmem:[#allocation10 + $0x280] sm:$0xff] }
  0xea   :  { %1186 = vmatpush1.bf16.msra.mxu0 %v1027_v13  ;;  %v932_v13 = vpack.c.bf16 %v622_v8, %v612_v7  ;;  %v722_v7 = vld [vmem:[#allocation11 + $0x3b8] sm:$0xff]  ;;  %v224_v8 = vld [vmem:[#allocation10 + $0x328] sm:$0xff] }
  0xeb   :  { %1227 = vmatpush1.bf16.msra.mxu1 %v1029_v14  ;;  %1187 = vmatprep.subr.bf16.mxu0 %v1038_v16  ;;  %v611_v14 = vld [vmem:[#allocation11 + $0x40] sm:$0xff]  ;;  %v621_v16 = vld [vmem:[#allocation11 + $0x90] sm:$0xff] }
  0xec   :  { %1228 = vmatprep.subr.bf16.mxu1 %v1040_v21  ;;  %v632_v21 = vld [vmem:[#allocation11 + $0xe8] sm:$0xff]  ;;  %v931_v25 = vpack.c.bf16 %v621_v16, %v611_v14  ;;  %v721_v14 = vld [vmem:[#allocation11 + $0x3b0] sm:$0xff]  ;;  %v223_v16 = vld [vmem:[#allocation10 + $0x320] sm:$0xff] }
  0xee   :  { %1188 = vmatpush1.bf16.msra.mxu0 %v1037_v27  ;;  %v443_v27 = vpack.c.bf16 %v133_v20, %v123_v17  ;;  %v494_v17 = vpack.c.bf16 %v234_v9, %v224_v8  ;;  %v732_v20 = vld [vmem:[#allocation11 + $0x408] sm:$0xff] }
  0xef   :  { %1229 = vmatpush1.bf16.msra.mxu1 %v1039_v28  ;;  %1189 = vmatprep.subr.bf16.mxu0 %v1048_v29  ;;  %v942_v28 = vpack.c.bf16 %v642_v22, %v632_v21  ;;  %v631_v29 = vld [vmem:[#allocation11 + $0xe0] sm:$0xff]  ;;  %v742_v21 = vld [vmem:[#allocation11 + $0x458] sm:$0xff]  ;;  %v244_v22 = vld [vmem:[#allocation10 + $0x3c8] sm:$0xff] }
  0xf0   :  { %1230 = vmatprep.subr.bf16.mxu1 %v1050_v33  ;;  %v153_v33 = vld [vmem:[#allocation10 + $0xf0] sm:$0xff]  ;;  %v992_v26 = vpack.c.bf16 %v742_v21, %v732_v20  ;;  %v344_v20 = vld [vmem:[#allocation10 + $0x6e8] sm:$0xff]  ;;  %v354_v21 = vld [vmem:[#allocation10 + $0x738] sm:$0xff] }
  0xf2   :  { %1190 = vmatpush1.bf16.msra.mxu0 %v1047_v39  ;;  %v941_v39 = vpack.c.bf16 %v641_v30, %v631_v29  ;;  %v243_v29 = vld [vmem:[#allocation10 + $0x3c0] sm:$0xff]  ;;  %v504_v30 = vpack.c.bf16 %v254_v23, %v244_v22 }
  0xf3   :  { %1231 = vmatpush1.bf16.msra.mxu1 %v1049_v40  ;;  %1191 = vmatprep.subr.bf16.mxu0 %v1058_v41  ;;  %v453_v40 = vpack.c.bf16 %v153_v33, %v143_v31  ;;  %v952_v41 = vpack.c.bf16 %v662_v35, %v652_v34  ;;  %v253_v31 = vld [vmem:[#allocation10 + $0x410] sm:$0xff]  ;;  %v762_v33 = vld [vmem:[#allocation11 + $0x4f8] sm:$0xff]  ;;  %v264_v34 = vld [vmem:[#allocation10 + $0x468] sm:$0xff] }
  0xf4   :  { %1232 = vmatprep.subr.bf16.mxu1 %v1060_v45  ;;  %v464_v45 = vpack.c.bf16 %v174_v37, %v164_v36  ;;  %v274_v35 = vld [vmem:[#allocation10 + $0x4b8] sm:$0xff]  ;;  %v503_v37 = vpack.c.bf16 %v253_v31, %v243_v29  ;;  %v353_v29 = vld [vmem:[#allocation10 + $0x730] sm:$0xff] }
  0xf5   :  { %v862_v31 = vld [vmem:[#allocation11 + $0x818] sm:$0xff] }
  0xf6   :  { %1192 = vmatpush1.bf16.msra.mxu0 %v1057_v51  ;;  %v951_v51 = vpack.c.bf16 %v661_v43, %v651_v42  ;;  %v263_v42 = vld [vmem:[#allocation10 + $0x460] sm:$0xff]  ;;  %v514_v43 = vpack.c.bf16 %v274_v35, %v264_v34 }
  0xf7   :  { %1233 = vmatpush1.bf16.msra.mxu1 %v1059_v52  ;;  %1193 = vmatprep.subr.bf16.mxu0 %v1068_v53  ;;  %v463_v52 = vpack.c.bf16 %v173_v46, %v163_v44  ;;  %v962_v53 = vpack.c.bf16 %v682_v48, %v672_v47  ;;  %v273_v44 = vld [vmem:[#allocation10 + $0x4b0] sm:$0xff]  ;;  %v782_v46 = vld [vmem:[#allocation11 + $0x598] sm:$0xff]  ;;  %v284_v47 = vld [vmem:[#allocation10 + $0x508] sm:$0xff] }
  0xf8   :  { %1234 = vmatprep.subr.bf16.mxu1 %v1070_v57  ;;  %v474_v57 = vpack.c.bf16 %v194_v50, %v184_v49  ;;  %v294_v48 = vld [vmem:[#allocation10 + $0x558] sm:$0xff]  ;;  %v513_v50 = vpack.c.bf16 %v273_v44, %v263_v42  ;;  %v373_v42 = vld [vmem:[#allocation10 + $0x7d0] sm:$0xff] }
  0xf9   :  { %v524_v55 = vpack.c.bf16 %v294_v48, %v284_v47  ;;  %v882_v44 = vld [vmem:[#allocation11 + $0x8b8] sm:$0xff] }
  0xfa   :  { %1194 = vmatpush1.bf16.msra.mxu0 %v1067_v63  ;;  %v473_v63 = vpack.c.bf16 %v193_v58, %v183_v56  ;;  %v293_v56 = vld [vmem:[#allocation10 + $0x550] sm:$0xff]  ;;  %v802_v58 = vld [vmem:[#allocation11 + $0x638] sm:$0xff] }
  0xfb   :  { %1235 = vmatpush1.bf16.msra.mxu1 %v1069_v0  ;;  %1195 = vmatprep.subr.bf16.mxu0 %v1078_v1  ;;  %v972_v0 = vpack.c.bf16 %v702_v60, %v692_v59  ;;  %v691_v1 = vld [vmem:[#allocation11 + $0x2c0] sm:$0xff]  ;;  %v304_v59 = vld [vmem:[#allocation10 + $0x5a8] sm:$0xff]  ;;  %v314_v60 = vld [vmem:[#allocation10 + $0x5f8] sm:$0xff] }
  0xfc   :  { %1236 = vmatprep.subr.bf16.mxu1 %v1080_v5  ;;  %v213_v5 = vld [vmem:[#allocation10 + $0x2d0] sm:$0xff]  ;;  %v971_v10 = vpack.c.bf16 %v701_v2, %v691_v1  ;;  %v303_v1 = vld [vmem:[#allocation10 + $0x5a0] sm:$0xff]  ;;  %v534_v2 = vpack.c.bf16 %v314_v60, %v304_v59 }
  0xfe   :  { %1196 = vmatpush1.bf16.msra.mxu0 %v1077_v11  ;;  %v483_v11 = vpack.c.bf16 %v213_v5, %v203_v3  ;;  %v313_v3 = vld [vmem:[#allocation10 + $0x5f0] sm:$0xff]  ;;  %v822_v5 = vld [vmem:[#allocation11 + $0x6d8] sm:$0xff] }
  0xff   :  { %1237 = vmatpush1.bf16.msra.mxu1 %v1079_v12  ;;  %1247 = vmatprep.subr.bf16.mxu0 %v932_v13  ;;  %v982_v12 = vpack.c.bf16 %v722_v7, %v712_v6  ;;  %v711_v13 = vld [vmem:[#allocation11 + $0x360] sm:$0xff]  ;;  %v324_v6 = vld [vmem:[#allocation10 + $0x648] sm:$0xff]  ;;  %v334_v7 = vld [vmem:[#allocation10 + $0x698] sm:$0xff]  ;;  %v533_v9 = vpack.c.bf16 %v313_v3, %v303_v1 }
 0x100   :  { %1288 = vmatprep.subr.bf16.mxu1 %v444_v18  ;;  %v233_v18 = vld [vmem:[#allocation10 + $0x370] sm:$0xff]  ;;  %v981_v24 = vpack.c.bf16 %v721_v14, %v711_v13  ;;  %v323_v13 = vld [vmem:[#allocation10 + $0x640] sm:$0xff]  ;;  %v544_v14 = vpack.c.bf16 %v334_v7, %v324_v6  ;;  %v922_v3 = vld [vmem:[#allocation11 + $0x9f8] sm:$0xff] }
 0x101   :  { %1198 = vmatmul.mubr.bf16.vlgmr.msra.gmra.mrb[4].mxu0 %v2087_v15  ;;  %v413_v1 = vld [vmem:[#allocation10 + $0x910] sm:$0xff] }
 0x102   :  { %1239 = vmatmul.mubr.bf16.vlgmr.msra.gmra.mrb[4].mxu1 %v2087_v15  ;;  %1248 = vmatpush1.bf16.msra.mxu0 %v931_v25  ;;  %v493_v25 = vpack.c.bf16 %v233_v18, %v223_v16  ;;  %v333_v16 = vld [vmem:[#allocation10 + $0x690] sm:$0xff]  ;;  %v842_v18 = vld [vmem:[#allocation11 + $0x778] sm:$0xff] }
 0x103   :  { %1289 = vmatpush1.bf16.msra.mxu1 %v443_v27  ;;  %1249 = vmatprep.subr.bf16.mxu0 %v942_v28  ;;  %v731_v27 = vld [vmem:[#allocation11 + $0x400] sm:$0xff]  ;;  %v741_v28 = vld [vmem:[#allocation11 + $0x450] sm:$0xff]  ;;  %v543_v23 = vpack.c.bf16 %v333_v16, %v323_v13  ;;  %v136_v16 = vld [vmem:[#allocation10 + $0x68] sm:$0xff] }
 0x104   :  { %1290 = vmatprep.subr.bf16.mxu1 %v454_v32  ;;  %1279 = vmatprep.mubr.bf16.mxu0 %v2083_v19  ;;  %v214_v19 = vld [vmem:[#allocation10 + $0x2d8] sm:$0xff]  ;;  %v752_v32 = vld [vmem:[#allocation11 + $0x4a8] sm:$0xff]  ;;  %v991_v36 = vpack.c.bf16 %v741_v28, %v731_v27  ;;  %v343_v27 = vld [vmem:[#allocation10 + $0x6e0] sm:$0xff]  ;;  %v554_v28 = vpack.c.bf16 %v354_v21, %v344_v20 }
 0x105   :  { %1320 = vmatprep.mubr.bf16.mxu1 %v2094_v38  ;;  %v484_v4 = vpack.c.bf16 %v214_v19, %v204_v61  ;;  %v523_v19 = vpack.c.bf16 %v293_v56, %v283_v54  ;;  %v553_v35 = vpack.c.bf16 %v353_v29, %v343_v27  ;;  %v393_v54 = vld [vmem:[#allocation10 + $0x870] sm:$0xff]  ;;  %v902_v56 = vld [vmem:[#allocation11 + $0x958] sm:$0xff]  ;;  %v115_v21 = vld [vmem:[#allocation2] sm:$0xff] }
 0x106   :  { %1250 = vmatpush1.bf16.msra.mxu0 %v941_v39  ;;  %v1002_v39 = vpack.c.bf16 %v762_v33, %v752_v32  ;;  %v364_v32 = vld [vmem:[#allocation10 + $0x788] sm:$0xff]  ;;  %v374_v33 = vld [vmem:[#allocation10 + $0x7d8] sm:$0xff]  ;;  %v433_v13 = vld [vmem:[#allocation10 + $0x9b0] sm:$0xff] }
 0x107   :  { %1291 = vmatpush1.bf16.msra.mxu1 %v453_v40  ;;  %1251 = vmatprep.subr.bf16.mxu0 %v952_v41  ;;  %v751_v40 = vld [vmem:[#allocation11 + $0x4a0] sm:$0xff]  ;;  %v761_v41 = vld [vmem:[#allocation11 + $0x4f0] sm:$0xff]  ;;  %v146_v29 = vld [vmem:[#allocation10 + $0xb8] sm:$0xff] }
 0x108   :  { %1292 = vmatprep.subr.bf16.mxu1 %v464_v45  ;;  %v772_v45 = vld [vmem:[#allocation11 + $0x548] sm:$0xff]  ;;  %v1001_v49 = vpack.c.bf16 %v761_v41, %v751_v40  ;;  %v363_v40 = vld [vmem:[#allocation10 + $0x780] sm:$0xff]  ;;  %v564_v41 = vpack.c.bf16 %v374_v33, %v364_v32  ;;  %v158_v32 = vld [vmem:[#allocation10 + $0x118] sm:$0xff]  ;;  %v2099_v33 = vpack.c.bf16 %v115_v21, %v115_v21 }
 0x109   :  { %v563_v48 = vpack.c.bf16 %v373_v42, %v363_v40  ;;  %v147_v40 = vld [vmem:[#allocation10 + $0xc0] sm:$0xff]  ;;  %v157_v42 = vld [vmem:[#allocation10 + $0x110] sm:$0xff] }
 0x10a   :  { %1252 = vmatpush1.bf16.msra.mxu0 %v951_v51  ;;  %v1012_v51 = vpack.c.bf16 %v782_v46, %v772_v45  ;;  %v384_v45 = vld [vmem:[#allocation10 + $0x828] sm:$0xff]  ;;  %v394_v46 = vld [vmem:[#allocation10 + $0x878] sm:$0xff] }
 0x10b   :  { %1293 = vmatpush1.bf16.msra.mxu1 %v463_v52  ;;  %1253 = vmatprep.subr.bf16.mxu0 %v962_v53  ;;  %v771_v52 = vld [vmem:[#allocation11 + $0x540] sm:$0xff]  ;;  %v781_v53 = vld [vmem:[#allocation11 + $0x590] sm:$0xff] }
 0x10c   :  { %1294 = vmatprep.subr.bf16.mxu1 %v474_v57  ;;  %v792_v57 = vld [vmem:[#allocation11 + $0x5e8] sm:$0xff]  ;;  %v1011_v61 = vpack.c.bf16 %v781_v53, %v771_v52  ;;  %v383_v52 = vld [vmem:[#allocation10 + $0x820] sm:$0xff]  ;;  %v574_v53 = vpack.c.bf16 %v394_v46, %v384_v45  ;;  %v178_v46 = vld [vmem:[#allocation10 + $0x1b8] sm:$0xff] }
 0x10d   :  { %v573_v60 = vpack.c.bf16 %v393_v54, %v383_v52  ;;  %v168_v45 = vld [vmem:[#allocation10 + $0x168] sm:$0xff]  ;;  %v167_v52 = vld [vmem:[#allocation10 + $0x160] sm:$0xff]  ;;  %v177_v54 = vld [vmem:[#allocation10 + $0x1b0] sm:$0xff] }
 0x10e   :  { %1254 = vmatpush1.bf16.msra.mxu0 %v961_v62  ;;  %v1022_v62 = vpack.c.bf16 %v802_v58, %v792_v57  ;;  %v404_v57 = vld [vmem:[#allocation10 + $0x8c8] sm:$0xff]  ;;  %v414_v58 = vld [vmem:[#allocation10 + $0x918] sm:$0xff] }
 0x10f   :  { %1295 = vmatpush1.bf16.msra.mxu1 %v473_v63  ;;  %1255 = vmatprep.subr.bf16.mxu0 %v972_v0  ;;  %v791_v63 = vld [vmem:[#allocation11 + $0x5e0] sm:$0xff]  ;;  %v801_v0 = vld [vmem:[#allocation11 + $0x630] sm:$0xff] }
 0x110   :  { %1296 = vmatprep.subr.bf16.mxu1 %v484_v4  ;;  %v812_v4 = vld [vmem:[#allocation11 + $0x688] sm:$0xff]  ;;  %v1021_v8 = vpack.c.bf16 %v801_v0, %v791_v63  ;;  %v403_v63 = vld [vmem:[#allocation10 + $0x8c0] sm:$0xff]  ;;  %v584_v0 = vpack.c.bf16 %v414_v58, %v404_v57  ;;  %v198_v57 = vld [vmem:[#allocation10 + $0x258] sm:$0xff] }
 0x111   :  { %v583_v7 = vpack.c.bf16 %v413_v1, %v403_v63  ;;  %v206_v1 = vld [vmem:[#allocation10 + $0x298] sm:$0xff] }
 0x112   :  { %1256 = vmatpush1.bf16.msra.mxu0 %v971_v10  ;;  %v1032_v10 = vpack.c.bf16 %v822_v5, %v812_v4  ;;  %v424_v4 = vld [vmem:[#allocation10 + $0x968] sm:$0xff]  ;;  %v434_v5 = vld [vmem:[#allocation10 + $0x9b8] sm:$0xff] }
 0x113   :  { %1297 = vmatpush1.bf16.msra.mxu1 %v483_v11  ;;  %1257 = vmatprep.subr.bf16.mxu0 %v982_v12  ;;  %v811_v11 = vld [vmem:[#allocation11 + $0x680] sm:$0xff]  ;;  %v821_v12 = vld [vmem:[#allocation11 + $0x6d0] sm:$0xff] }
 0x114   :  { %1298 = vmatprep.subr.bf16.mxu1 %v494_v17  ;;  %v832_v17 = vld [vmem:[#allocation11 + $0x728] sm:$0xff]  ;;  %v1031_v22 = vpack.c.bf16 %v821_v12, %v811_v11  ;;  %v423_v11 = vld [vmem:[#allocation10 + $0x960] sm:$0xff]  ;;  %v594_v12 = vpack.c.bf16 %v434_v5, %v424_v4  ;;  %v218_v4 = vld [vmem:[#allocation10 + $0x2f8] sm:$0xff] }
 0x116   :  { %1258 = vmatpush1.bf16.msra.mxu0 %v981_v24  ;;  %v1042_v24 = vpack.c.bf16 %v842_v18, %v832_v17  ;;  %v128_v17 = vld [vmem:[#allocation10 + $0x28] sm:$0xff]  ;;  %v138_v18 = vld [vmem:[#allocation10 + $0x78] sm:$0xff] }
 0x117   :  { %1299 = vmatpush1.bf16.msra.mxu1 %v493_v25  ;;  %1259 = vmatprep.subr.bf16.mxu0 %v992_v26  ;;  %v831_v25 = vld [vmem:[#allocation11 + $0x720] sm:$0xff]  ;;  %v841_v26 = vld [vmem:[#allocation11 + $0x770] sm:$0xff]  ;;  %v448_v27 = vpack.c.bf16 %v138_v18, %v128_v17  ;;  %v238_v17 = vld [vmem:[#allocation10 + $0x398] sm:$0xff] }
 0x118   :  { %1300 = vmatprep.subr.bf16.mxu1 %v504_v30  ;;  %v852_v30 = vld [vmem:[#allocation11 + $0x7c8] sm:$0xff]  ;;  %v1041_v34 = vpack.c.bf16 %v841_v26, %v831_v25  ;;  %v135_v25 = vld [vmem:[#allocation10 + $0x60] sm:$0xff] }
 0x119   :  { %v127_v26 = vld [vmem:[#allocation10 + $0x20] sm:$0xff] }
 0x11a   :  { %1260 = vmatpush1.bf16.msra.mxu0 %v991_v36  ;;  %v1052_v36 = vpack.c.bf16 %v862_v31, %v852_v30  ;;  %v156_v30 = vld [vmem:[#allocation10 + $0x108] sm:$0xff] }
 0x11b   :  { %1301 = vmatpush1.bf16.msra.mxu1 %v503_v37  ;;  %1261 = vmatprep.subr.bf16.mxu0 %v1002_v39  ;;  %v851_v37 = vld [vmem:[#allocation11 + $0x7c0] sm:$0xff]  ;;  %v861_v39 = vld [vmem:[#allocation11 + $0x810] sm:$0xff]  ;;  %v148_v31 = vld [vmem:[#allocation10 + $0xc8] sm:$0xff] }
 0x11c   :  { %1302 = vmatprep.subr.bf16.mxu1 %v514_v43  ;;  %v872_v43 = vld [vmem:[#allocation11 + $0x868] sm:$0xff]  ;;  %v1051_v47 = vpack.c.bf16 %v861_v39, %v851_v37  ;;  %v145_v37 = vld [vmem:[#allocation10 + $0xb0] sm:$0xff]  ;;  %v155_v39 = vld [vmem:[#allocation10 + $0x100] sm:$0xff] }
 0x11e   :  { %1262 = vmatpush1.bf16.msra.mxu0 %v1001_v49  ;;  %v1062_v49 = vpack.c.bf16 %v882_v44, %v872_v43  ;;  %v166_v43 = vld [vmem:[#allocation10 + $0x158] sm:$0xff]  ;;  %v176_v44 = vld [vmem:[#allocation10 + $0x1a8] sm:$0xff] }
 0x11f   :  { %1303 = vmatpush1.bf16.msra.mxu1 %v513_v50  ;;  %1263 = vmatprep.subr.bf16.mxu0 %v1012_v51  ;;  %v871_v50 = vld [vmem:[#allocation11 + $0x860] sm:$0xff]  ;;  %v881_v51 = vld [vmem:[#allocation11 + $0x8b0] sm:$0xff] }
 0x120   :  { %1304 = vmatprep.subr.bf16.mxu1 %v524_v55  ;;  %v892_v55 = vld [vmem:[#allocation11 + $0x908] sm:$0xff]  ;;  %v1061_v59 = vpack.c.bf16 %v881_v51, %v871_v50  ;;  %v165_v50 = vld [vmem:[#allocation10 + $0x150] sm:$0xff]  ;;  %v175_v51 = vld [vmem:[#allocation10 + $0x1a0] sm:$0xff] }
 0x121   :  { %v465_v58 = vpack.c.bf16 %v175_v51, %v165_v50  ;;  %v267_v50 = vld [vmem:[#allocation10 + $0x480] sm:$0xff] }
 0x122   :  { %1264 = vmatpush1.bf16.msra.mxu0 %v1011_v61  ;;  %v1072_v61 = vpack.c.bf16 %v902_v56, %v892_v55  ;;  %v186_v55 = vld [vmem:[#allocation10 + $0x1f8] sm:$0xff]  ;;  %v196_v56 = vld [vmem:[#allocation10 + $0x248] sm:$0xff] }
 0x123   :  { %1305 = vmatpush1.bf16.msra.mxu1 %v523_v19  ;;  %1265 = vmatprep.subr.bf16.mxu0 %v1022_v62  ;;  %v891_v19 = vld [vmem:[#allocation11 + $0x900] sm:$0xff]  ;;  %v901_v62 = vld [vmem:[#allocation11 + $0x950] sm:$0xff] }
 0x124   :  { %1306 = vmatprep.subr.bf16.mxu1 %v534_v2  ;;  %v912_v2 = vld [vmem:[#allocation11 + $0x9a8] sm:$0xff]  ;;  %v1071_v6 = vpack.c.bf16 %v901_v62, %v891_v19  ;;  %v195_v19 = vld [vmem:[#allocation10 + $0x240] sm:$0xff] }
 0x125   :  { %v187_v62 = vld [vmem:[#allocation10 + $0x200] sm:$0xff] }
 0x126   :  { %1266 = vmatpush1.bf16.msra.mxu0 %v1021_v8  ;;  %v1082_v8 = vpack.c.bf16 %v922_v3, %v912_v2  ;;  %v216_v2 = vld [vmem:[#allocation10 + $0x2e8] sm:$0xff] }
 0x127   :  { %1307 = vmatpush1.bf16.msra.mxu1 %v533_v9  ;;  %1267 = vmatprep.subr.bf16.mxu0 %v1032_v10  ;;  %v911_v9 = vld [vmem:[#allocation11 + $0x9a0] sm:$0xff]  ;;  %v921_v10 = vld [vmem:[#allocation11 + $0x9f0] sm:$0xff]  ;;  %v208_v3 = vld [vmem:[#allocation10 + $0x2a8] sm:$0xff] }
 0x128   :  { %1308 = vmatprep.subr.bf16.mxu1 %v544_v14  ;;  %v126_v14 = vld [vmem:[#allocation10 + $0x18] sm:$0xff]  ;;  %v1081_v20 = vpack.c.bf16 %v921_v10, %v911_v9  ;;  %v215_v9 = vld [vmem:[#allocation10 + $0x2e0] sm:$0xff] }
 0x129   :  { %v207_v10 = vld [vmem:[#allocation10 + $0x2a0] sm:$0xff] }
 0x12a   :  { %1268 = vmatpush1.bf16.msra.mxu0 %v1031_v22  ;;  %v593_v22 = vpack.c.bf16 %v433_v13, %v423_v11  ;;  %v488_v11 = vpack.c.bf16 %v218_v4, %v208_v3  ;;  %v226_v13 = vld [vmem:[#allocation10 + $0x338] sm:$0xff] }
 0x12b   :  { %1309 = vmatpush1.bf16.msra.mxu1 %v543_v23  ;;  %1269 = vmatprep.subr.bf16.mxu0 %v1042_v24  ;;  %v446_v23 = vpack.c.bf16 %v136_v16, %v126_v14  ;;  %v125_v24 = vld [vmem:[#allocation10 + $0x10] sm:$0xff]  ;;  %v236_v14 = vld [vmem:[#allocation10 + $0x388] sm:$0xff] }
 0x12c   :  { %1310 = vmatprep.subr.bf16.mxu1 %v554_v28  ;;  %v137_v28 = vld [vmem:[#allocation10 + $0x70] sm:$0xff]  ;;  %v228_v16 = vld [vmem:[#allocation10 + $0x348] sm:$0xff]  ;;  %v496_v21 = vpack.c.bf16 %v236_v14, %v226_v13  ;;  %v338_v14 = vld [vmem:[#allocation10 + $0x6b8] sm:$0xff] }
 0x12d   :  { %v328_v13 = vld [vmem:[#allocation10 + $0x668] sm:$0xff] }
 0x12e   :  { %1270 = vmatpush1.bf16.msra.mxu0 %v1041_v34  ;;  %v445_v34 = vpack.c.bf16 %v135_v25, %v125_v24  ;;  %v227_v24 = vld [vmem:[#allocation10 + $0x340] sm:$0xff]  ;;  %v498_v25 = vpack.c.bf16 %v238_v17, %v228_v16 }
 0x12f   :  { %1311 = vmatpush1.bf16.msra.mxu1 %v553_v35  ;;  %1271 = vmatprep.subr.bf16.mxu0 %v1052_v36  ;;  %v447_v35 = vpack.c.bf16 %v137_v28, %v127_v26  ;;  %v456_v36 = vpack.c.bf16 %v156_v30, %v146_v29  ;;  %v237_v26 = vld [vmem:[#allocation10 + $0x390] sm:$0xff]  ;;  %v256_v28 = vld [vmem:[#allocation10 + $0x428] sm:$0xff]  ;;  %v258_v30 = vld [vmem:[#allocation10 + $0x438] sm:$0xff] }
 0x130   :  { %1312 = vmatprep.subr.bf16.mxu1 %v564_v41  ;;  %v458_v41 = vpack.c.bf16 %v158_v32, %v148_v31  ;;  %v248_v29 = vld [vmem:[#allocation10 + $0x3e8] sm:$0xff]  ;;  %v497_v32 = vpack.c.bf16 %v237_v26, %v227_v24  ;;  %v337_v24 = vld [vmem:[#allocation10 + $0x6b0] sm:$0xff] }
 0x131   :  { %v356_v26 = vld [vmem:[#allocation10 + $0x748] sm:$0xff] }
 0x132   :  { %1272 = vmatpush1.bf16.msra.mxu0 %v1051_v47  ;;  %v455_v47 = vpack.c.bf16 %v155_v39, %v145_v37  ;;  %v247_v37 = vld [vmem:[#allocation10 + $0x3e0] sm:$0xff]  ;;  %v508_v39 = vpack.c.bf16 %v258_v30, %v248_v29 }
 0x133   :  { %1313 = vmatpush1.bf16.msra.mxu1 %v563_v48  ;;  %1273 = vmatprep.subr.bf16.mxu0 %v1062_v49  ;;  %v457_v48 = vpack.c.bf16 %v157_v42, %v147_v40  ;;  %v466_v49 = vpack.c.bf16 %v176_v44, %v166_v43  ;;  %v257_v40 = vld [vmem:[#allocation10 + $0x430] sm:$0xff]  ;;  %v276_v42 = vld [vmem:[#allocation10 + $0x4c8] sm:$0xff]  ;;  %v278_v44 = vld [vmem:[#allocation10 + $0x4d8] sm:$0xff] }
 0x134   :  { %1314 = vmatprep.subr.bf16.mxu1 %v574_v53  ;;  %v468_v53 = vpack.c.bf16 %v178_v46, %v168_v45  ;;  %v268_v43 = vld [vmem:[#allocation10 + $0x488] sm:$0xff]  ;;  %v507_v46 = vpack.c.bf16 %v257_v40, %v247_v37  ;;  %v357_v37 = vld [vmem:[#allocation10 + $0x750] sm:$0xff] }
 0x135   :  { %v518_v51 = vpack.c.bf16 %v278_v44, %v268_v43  ;;  %v376_v40 = vld [vmem:[#allocation10 + $0x7e8] sm:$0xff] }
 0x136   :  { %1274 = vmatpush1.bf16.msra.mxu0 %v1061_v59  ;;  %v467_v59 = vpack.c.bf16 %v177_v54, %v167_v52  ;;  %v277_v52 = vld [vmem:[#allocation10 + $0x4d0] sm:$0xff]  ;;  %v296_v54 = vld [vmem:[#allocation10 + $0x568] sm:$0xff] }
 0x137   :  { %1315 = vmatpush1.bf16.msra.mxu1 %v573_v60  ;;  %1275 = vmatprep.subr.bf16.mxu0 %v1072_v61  ;;  %v476_v60 = vpack.c.bf16 %v196_v56, %v186_v55  ;;  %v185_v61 = vld [vmem:[#allocation10 + $0x1f0] sm:$0xff]  ;;  %v288_v55 = vld [vmem:[#allocation10 + $0x528] sm:$0xff]  ;;  %v298_v56 = vld [vmem:[#allocation10 + $0x578] sm:$0xff] }
 0x138   :  { %1316 = vmatprep.subr.bf16.mxu1 %v584_v0  ;;  %v197_v0 = vld [vmem:[#allocation10 + $0x250] sm:$0xff]  ;;  %v475_v5 = vpack.c.bf16 %v195_v19, %v185_v61  ;;  %v287_v61 = vld [vmem:[#allocation10 + $0x520] sm:$0xff]  ;;  %v528_v19 = vpack.c.bf16 %v298_v56, %v288_v55 }
 0x13a   :  { %1276 = vmatpush1.bf16.msra.mxu0 %v1071_v6  ;;  %v477_v6 = vpack.c.bf16 %v197_v0, %v187_v62  ;;  %v297_v62 = vld [vmem:[#allocation10 + $0x570] sm:$0xff]  ;;  %v316_v0 = vld [vmem:[#allocation10 + $0x608] sm:$0xff] }
 0x13b   :  { %1317 = vmatpush1.bf16.msra.mxu1 %v583_v7  ;;  %1277 = vmatprep.subr.bf16.mxu0 %v1082_v8  ;;  %v486_v7 = vpack.c.bf16 %v216_v2, %v206_v1  ;;  %v205_v8 = vld [vmem:[#allocation10 + $0x290] sm:$0xff]  ;;  %v308_v1 = vld [vmem:[#allocation10 + $0x5c8] sm:$0xff]  ;;  %v318_v2 = vld [vmem:[#allocation10 + $0x618] sm:$0xff]  ;;  %v527_v4 = vpack.c.bf16 %v297_v62, %v287_v61 }
 0x13c   :  { %1318 = vmatprep.subr.bf16.mxu1 %v594_v12  ;;  %v217_v12 = vld [vmem:[#allocation10 + $0x2f0] sm:$0xff]  ;;  %v485_v18 = vpack.c.bf16 %v215_v9, %v205_v8  ;;  %v307_v8 = vld [vmem:[#allocation10 + $0x5c0] sm:$0xff]  ;;  %v538_v9 = vpack.c.bf16 %v318_v2, %v308_v1  ;;  %v416_v62 = vld [vmem:[#allocation10 + $0x928] sm:$0xff] }
 0x13d   :  { %v397_v61 = vld [vmem:[#allocation10 + $0x890] sm:$0xff] }
 0x13e   :  { %1278 = vmatpush1.bf16.msra.mxu0 %v1081_v20  ;;  %v487_v20 = vpack.c.bf16 %v217_v12, %v207_v10  ;;  %v317_v10 = vld [vmem:[#allocation10 + $0x610] sm:$0xff]  ;;  %v336_v12 = vld [vmem:[#allocation10 + $0x6a8] sm:$0xff] }
 0x13f   :  { %1319 = vmatpush1.bf16.msra.mxu1 %v593_v22  ;;  %1329 = vmatprep.subr.bf16.mxu0 %v446_v23  ;;  %v225_v22 = vld [vmem:[#allocation10 + $0x330] sm:$0xff]  ;;  %v235_v23 = vld [vmem:[#allocation10 + $0x380] sm:$0xff]  ;;  %v537_v17 = vpack.c.bf16 %v317_v10, %v307_v8  ;;  %v436_v10 = vld [vmem:[#allocation10 + $0x9c8] sm:$0xff] }
 0x140   :  { %1370 = vmatprep.subr.bf16.mxu1 %v448_v27  ;;  %v246_v27 = vld [vmem:[#allocation10 + $0x3d8] sm:$0xff]  ;;  %v495_v31 = vpack.c.bf16 %v235_v23, %v225_v22  ;;  %v327_v22 = vld [vmem:[#allocation10 + $0x660] sm:$0xff]  ;;  %v548_v23 = vpack.c.bf16 %v338_v14, %v328_v13  ;;  %v417_v8 = vld [vmem:[#allocation10 + $0x930] sm:$0xff] }
 0x141   :  { %1280 = vmatmul.mubr.bf16.vlgmr.msra.gmra.mrb[8].mxu0 %v2087_v15  ;;  %v188_v15 = vld [vmem:[#allocation10 + $0x208] sm:$0xff]  ;;  %v547_v30 = vpack.c.bf16 %v337_v24, %v327_v22  ;;  %v437_v22 = vld [vmem:[#allocation10 + $0x9d0] sm:$0xff] }
 0x142   :  { %1321 = vmatmul.mubr.bf16.vlgmr.msra.gmra.mrb[8].mxu1 %v2099_v33  ;;  %1330 = vmatpush1.bf16.msra.mxu0 %v445_v34  ;;  %v478_v63 = vpack.c.bf16 %v198_v57, %v188_v15  ;;  %v506_v34 = vpack.c.bf16 %v256_v28, %v246_v27  ;;  %v517_v57 = vpack.c.bf16 %v277_v52, %v267_v50  ;;  %v348_v27 = vld [vmem:[#allocation10 + $0x708] sm:$0xff]  ;;  %v358_v28 = vld [vmem:[#allocation10 + $0x758] sm:$0xff]  ;;  %v377_v50 = vld [vmem:[#allocation10 + $0x7f0] sm:$0xff] }
 0x143   :  { %1371 = vmatpush1.bf16.msra.mxu1 %v447_v35  ;;  %1331 = vmatprep.subr.bf16.mxu0 %v456_v36  ;;  %v245_v35 = vld [vmem:[#allocation10 + $0x3d0] sm:$0xff]  ;;  %v255_v36 = vld [vmem:[#allocation10 + $0x420] sm:$0xff]  ;;  %v396_v52 = vld [vmem:[#allocation10 + $0x888] sm:$0xff] }
 0x144   :  { %1372 = vmatprep.subr.bf16.mxu1 %v458_v41  ;;  %1361 = vmatprep.mubr.bf16.mxu0 %v2094_v38  ;;  %v266_v41 = vld [vmem:[#allocation10 + $0x478] sm:$0xff]  ;;  %v505_v45 = vpack.c.bf16 %v255_v36, %v245_v35  ;;  %v347_v35 = vld [vmem:[#allocation10 + $0x700] sm:$0xff]  ;;  %v558_v36 = vpack.c.bf16 %v358_v28, %v348_v27  ;;  %v140_v24 = vld [vmem:[#allocation10 + $0x88] sm:$0xff] }
 0x145   :  { %1402 = vmatprep.mubr.bf16.mxu1 %v2094_v38  ;;  %v557_v44 = vpack.c.bf16 %v357_v37, %v347_v35  ;;  %v141_v35 = vld [vmem:[#allocation10 + $0x90] sm:$0xff]  ;;  %v160_v37 = vld [vmem:[#allocation10 + $0x128] sm:$0xff] }
 0x146   :  { %1332 = vmatpush1.bf16.msra.mxu0 %v455_v47  ;;  %v516_v47 = vpack.c.bf16 %v276_v42, %v266_v41  ;;  %v368_v41 = vld [vmem:[#allocation10 + $0x7a8] sm:$0xff]  ;;  %v378_v42 = vld [vmem:[#allocation10 + $0x7f8] sm:$0xff] }
 0x147   :  { %1373 = vmatpush1.bf16.msra.mxu1 %v457_v48  ;;  %1333 = vmatprep.subr.bf16.mxu0 %v466_v49  ;;  %v265_v48 = vld [vmem:[#allocation10 + $0x470] sm:$0xff]  ;;  %v275_v49 = vld [vmem:[#allocation10 + $0x4c0] sm:$0xff] }
 0x148   :  { %1374 = vmatprep.subr.bf16.mxu1 %v468_v53  ;;  %v286_v53 = vld [vmem:[#allocation10 + $0x518] sm:$0xff]  ;;  %v515_v15 = vpack.c.bf16 %v275_v49, %v265_v48  ;;  %v367_v48 = vld [vmem:[#allocation10 + $0x7a0] sm:$0xff]  ;;  %v568_v49 = vpack.c.bf16 %v378_v42, %v368_v41 }
 0x149   :  { %v567_v56 = vpack.c.bf16 %v377_v50, %v367_v48  ;;  %v161_v48 = vld [vmem:[#allocation10 + $0x130] sm:$0xff]  ;;  %v180_v50 = vld [vmem:[#allocation10 + $0x1c8] sm:$0xff] }
 0x14a   :  { %1334 = vmatpush1.bf16.msra.mxu0 %v465_v58  ;;  %v526_v58 = vpack.c.bf16 %v296_v54, %v286_v53  ;;  %v388_v53 = vld [vmem:[#allocation10 + $0x848] sm:$0xff]  ;;  %v398_v54 = vld [vmem:[#allocation10 + $0x898] sm:$0xff] }
 0x14b   :  { %1375 = vmatpush1.bf16.msra.mxu1 %v467_v59  ;;  %1335 = vmatprep.subr.bf16.mxu0 %v476_v60  ;;  %v285_v59 = vld [vmem:[#allocation10 + $0x510] sm:$0xff]  ;;  %v295_v60 = vld [vmem:[#allocation10 + $0x560] sm:$0xff] }
 0x14c   :  { %1376 = vmatprep.subr.bf16.mxu1 %v478_v63  ;;  %v306_v63 = vld [vmem:[#allocation10 + $0x5b8] sm:$0xff]  ;;  %v525_v3 = vpack.c.bf16 %v295_v60, %v285_v59  ;;  %v387_v59 = vld [vmem:[#allocation10 + $0x840] sm:$0xff]  ;;  %v578_v60 = vpack.c.bf16 %v398_v54, %v388_v53 }
 0x14d   :  { %v577_v2 = vpack.c.bf16 %v397_v61, %v387_v59  ;;  %v181_v59 = vld [vmem:[#allocation10 + $0x1d0] sm:$0xff]  ;;  %v200_v61 = vld [vmem:[#allocation10 + $0x268] sm:$0xff] }
 0x14e   :  { %1336 = vmatpush1.bf16.msra.mxu0 %v475_v5  ;;  %v536_v5 = vpack.c.bf16 %v316_v0, %v306_v63  ;;  %v408_v63 = vld [vmem:[#allocation10 + $0x8e8] sm:$0xff]  ;;  %v418_v0 = vld [vmem:[#allocation10 + $0x938] sm:$0xff] }
 0x14f   :  { %1377 = vmatpush1.bf16.msra.mxu1 %v477_v6  ;;  %1337 = vmatprep.subr.bf16.mxu0 %v486_v7  ;;  %v305_v6 = vld [vmem:[#allocation10 + $0x5b0] sm:$0xff]  ;;  %v315_v7 = vld [vmem:[#allocation10 + $0x600] sm:$0xff] }
 0x150   :  { %1378 = vmatprep.subr.bf16.mxu1 %v488_v11  ;;  %v326_v11 = vld [vmem:[#allocation10 + $0x658] sm:$0xff]  ;;  %v535_v16 = vpack.c.bf16 %v315_v7, %v305_v6  ;;  %v407_v6 = vld [vmem:[#allocation10 + $0x8e0] sm:$0xff]  ;;  %v588_v7 = vpack.c.bf16 %v418_v0, %v408_v63 }
 0x151   :  { %v587_v14 = vpack.c.bf16 %v417_v8, %v407_v6  ;;  %v201_v6 = vld [vmem:[#allocation10 + $0x270] sm:$0xff]  ;;  %v220_v8 = vld [vmem:[#allocation10 + $0x308] sm:$0xff] }
 0x152   :  { %1338 = vmatpush1.bf16.msra.mxu0 %v485_v18  ;;  %v546_v18 = vpack.c.bf16 %v336_v12, %v326_v11  ;;  %v428_v11 = vld [vmem:[#allocation10 + $0x988] sm:$0xff]  ;;  %v438_v12 = vld [vmem:[#allocation10 + $0x9d8] sm:$0xff] }
 0x153   :  { %1379 = vmatpush1.bf16.msra.mxu1 %v487_v20  ;;  %1339 = vmatprep.subr.bf16.mxu0 %v496_v21  ;;  %v325_v20 = vld [vmem:[#allocation10 + $0x650] sm:$0xff]  ;;  %v335_v21 = vld [vmem:[#allocation10 + $0x6a0] sm:$0xff] }
 0x154   :  { %1380 = vmatprep.subr.bf16.mxu1 %v498_v25  ;;  %v346_v25 = vld [vmem:[#allocation10 + $0x6f8] sm:$0xff]  ;;  %v545_v29 = vpack.c.bf16 %v335_v21, %v325_v20  ;;  %v427_v20 = vld [vmem:[#allocation10 + $0x980] sm:$0xff]  ;;  %v598_v21 = vpack.c.bf16 %v438_v12, %v428_v11 }
 0x155   :  { %v597_v28 = vpack.c.bf16 %v437_v22, %v427_v20  ;;  %v230_v20 = vld [vmem:[#allocation10 + $0x358] sm:$0xff]  ;;  %v232_v22 = vld [vmem:[#allocation10 + $0x368] sm:$0xff] }
 0x156   :  { %1340 = vmatpush1.bf16.msra.mxu0 %v495_v31  ;;  %v556_v31 = vpack.c.bf16 %v356_v26, %v346_v25  ;;  %v132_v25 = vld [vmem:[#allocation10 + $0x48] sm:$0xff]  ;;  %v142_v26 = vld [vmem:[#allocation10 + $0x98] sm:$0xff] }
 0x157   :  { %1381 = vmatpush1.bf16.msra.mxu1 %v497_v32  ;;  %1341 = vmatprep.subr.bf16.mxu0 %v506_v34  ;;  %v345_v32 = vld [vmem:[#allocation10 + $0x6f0] sm:$0xff]  ;;  %v355_v34 = vld [vmem:[#allocation10 + $0x740] sm:$0xff] }
 0x158   :  { %1382 = vmatprep.subr.bf16.mxu1 %v508_v39  ;;  %v366_v39 = vld [vmem:[#allocation10 + $0x798] sm:$0xff]  ;;  %v555_v43 = vpack.c.bf16 %v355_v34, %v345_v32  ;;  %v131_v32 = vld [vmem:[#allocation10 + $0x40] sm:$0xff]  ;;  %v452_v34 = vpack.c.bf16 %v142_v26, %v132_v25 }
 0x159   :  { %v451_v42 = vpack.c.bf16 %v141_v35, %v131_v32  ;;  %v250_v32 = vld [vmem:[#allocation10 + $0x3f8] sm:$0xff]  ;;  %v252_v35 = vld [vmem:[#allocation10 + $0x408] sm:$0xff] }
 0x15a   :  { %1342 = vmatpush1.bf16.msra.mxu0 %v505_v45  ;;  %v566_v45 = vpack.c.bf16 %v376_v40, %v366_v39  ;;  %v152_v39 = vld [vmem:[#allocation10 + $0xe8] sm:$0xff]  ;;  %v162_v40 = vld [vmem:[#allocation10 + $0x138] sm:$0xff] }
 0x15b   :  { %1383 = vmatpush1.bf16.msra.mxu1 %v507_v46  ;;  %1343 = vmatprep.subr.bf16.mxu0 %v516_v47  ;;  %v365_v46 = vld [vmem:[#allocation10 + $0x790] sm:$0xff]  ;;  %v375_v47 = vld [vmem:[#allocation10 + $0x7e0] sm:$0xff] }
 0x15c   :  { %1384 = vmatprep.subr.bf16.mxu1 %v518_v51  ;;  %v386_v51 = vld [vmem:[#allocation10 + $0x838] sm:$0xff]  ;;  %v565_v55 = vpack.c.bf16 %v375_v47, %v365_v46  ;;  %v151_v46 = vld [vmem:[#allocation10 + $0xe0] sm:$0xff]  ;;  %v462_v47 = vpack.c.bf16 %v162_v40, %v152_v39 }
 0x15d   :  { %v461_v54 = vpack.c.bf16 %v161_v48, %v151_v46  ;;  %v261_v46 = vld [vmem:[#allocation10 + $0x450] sm:$0xff]  ;;  %v280_v48 = vld [vmem:[#allocation10 + $0x4e8] sm:$0xff] }
 0x15e   :  { %1344 = vmatpush1.bf16.msra.mxu0 %v515_v15  ;;  %v576_v15 = vpack.c.bf16 %v396_v52, %v386_v51  ;;  %v172_v51 = vld [vmem:[#allocation10 + $0x188] sm:$0xff]  ;;  %v182_v52 = vld [vmem:[#allocation10 + $0x1d8] sm:$0xff] }
 0x15f   :  { %1385 = vmatpush1.bf16.msra.mxu1 %v517_v57  ;;  %1345 = vmatprep.subr.bf16.mxu0 %v526_v58  ;;  %v385_v57 = vld [vmem:[#allocation10 + $0x830] sm:$0xff]  ;;  %v395_v58 = vld [vmem:[#allocation10 + $0x880] sm:$0xff] }
 0x160   :  { %1386 = vmatprep.subr.bf16.mxu1 %v528_v19  ;;  %v406_v19 = vld [vmem:[#allocation10 + $0x8d8] sm:$0xff]  ;;  %v575_v1 = vpack.c.bf16 %v395_v58, %v385_v57  ;;  %v171_v57 = vld [vmem:[#allocation10 + $0x180] sm:$0xff]  ;;  %v472_v58 = vpack.c.bf16 %v182_v52, %v172_v51  ;;  %v272_v51 = vld [vmem:[#allocation10 + $0x4a8] sm:$0xff] }
 0x161   :  { %v471_v0 = vpack.c.bf16 %v181_v59, %v171_v57  ;;  %v282_v52 = vld [vmem:[#allocation10 + $0x4f8] sm:$0xff]  ;;  %v269_v59 = vld [vmem:[#allocation10 + $0x490] sm:$0xff] }
 0x162   :  { %1346 = vmatpush1.bf16.msra.mxu0 %v525_v3  ;;  %v586_v3 = vpack.c.bf16 %v416_v62, %v406_v19  ;;  %v192_v19 = vld [vmem:[#allocation10 + $0x228] sm:$0xff]  ;;  %v202_v62 = vld [vmem:[#allocation10 + $0x278] sm:$0xff] }
 0x163   :  { %1387 = vmatpush1.bf16.msra.mxu1 %v527_v4  ;;  %1347 = vmatprep.subr.bf16.mxu0 %v536_v5  ;;  %v405_v4 = vld [vmem:[#allocation10 + $0x8d0] sm:$0xff]  ;;  %v415_v5 = vld [vmem:[#allocation10 + $0x920] sm:$0xff] }
 0x164   :  { %1388 = vmatprep.subr.bf16.mxu1 %v538_v9  ;;  %v426_v9 = vld [vmem:[#allocation10 + $0x978] sm:$0xff]  ;;  %v585_v13 = vpack.c.bf16 %v415_v5, %v405_v4  ;;  %v191_v4 = vld [vmem:[#allocation10 + $0x220] sm:$0xff]  ;;  %v482_v5 = vpack.c.bf16 %v202_v62, %v192_v19  ;;  %v522_v62 = vpack.c.bf16 %v282_v52, %v272_v51 }
 0x165   :  { %v351_v51 = vld [vmem:[#allocation10 + $0x720] sm:$0xff] }
 0x166   :  { %1348 = vmatpush1.bf16.msra.mxu0 %v535_v16  ;;  %v596_v16 = vpack.c.bf16 %v436_v10, %v426_v9  ;;  %v212_v9 = vld [vmem:[#allocation10 + $0x2c8] sm:$0xff]  ;;  %v222_v10 = vld [vmem:[#allocation10 + $0x318] sm:$0xff] }
 0x167   :  { %1389 = vmatpush1.bf16.msra.mxu1 %v537_v17  ;;  %1349 = vmatprep.subr.bf16.mxu0 %v546_v18  ;;  %v425_v17 = vld [vmem:[#allocation10 + $0x970] sm:$0xff]  ;;  %v435_v18 = vld [vmem:[#allocation10 + $0x9c0] sm:$0xff] }
 0x168   :  { %1390 = vmatprep.subr.bf16.mxu1 %v548_v23  ;;  %v130_v23 = vld [vmem:[#allocation10 + $0x38] sm:$0xff]  ;;  %v595_v27 = vpack.c.bf16 %v435_v18, %v425_v17  ;;  %v492_v17 = vpack.c.bf16 %v222_v10, %v212_v9  ;;  %v221_v18 = vld [vmem:[#allocation10 + $0x310] sm:$0xff]  ;;  %v291_v9 = vld [vmem:[#allocation10 + $0x540] sm:$0xff] }
 0x16a   :  { %1350 = vmatpush1.bf16.msra.mxu0 %v545_v29  ;;  %v450_v29 = vpack.c.bf16 %v140_v24, %v130_v23  ;;  %v242_v23 = vld [vmem:[#allocation10 + $0x3b8] sm:$0xff] }
 0x16b   :  { %1391 = vmatpush1.bf16.msra.mxu1 %v547_v30  ;;  %1351 = vmatprep.subr.bf16.mxu0 %v556_v31  ;;  %v129_v30 = vld [vmem:[#allocation10 + $0x30] sm:$0xff]  ;;  %v139_v31 = vld [vmem:[#allocation10 + $0x80] sm:$0xff] }
 0x16c   :  { %1392 = vmatprep.subr.bf16.mxu1 %v558_v36  ;;  %v150_v36 = vld [vmem:[#allocation10 + $0xd8] sm:$0xff]  ;;  %v449_v41 = vpack.c.bf16 %v139_v31, %v129_v30  ;;  %v502_v30 = vpack.c.bf16 %v242_v23, %v232_v22  ;;  %v241_v31 = vld [vmem:[#allocation10 + $0x3b0] sm:$0xff]  ;;  %v311_v22 = vld [vmem:[#allocation10 + $0x5e0] sm:$0xff] }
 0x16e   :  { %1352 = vmatpush1.bf16.msra.mxu0 %v555_v43  ;;  %v460_v43 = vpack.c.bf16 %v160_v37, %v150_v36  ;;  %v262_v36 = vld [vmem:[#allocation10 + $0x458] sm:$0xff] }
 0x16f   :  { %1393 = vmatpush1.bf16.msra.mxu1 %v557_v44  ;;  %1353 = vmatprep.subr.bf16.mxu0 %v566_v45  ;;  %v149_v44 = vld [vmem:[#allocation10 + $0xd0] sm:$0xff]  ;;  %v159_v45 = vld [vmem:[#allocation10 + $0x120] sm:$0xff] }
 0x170   :  { %1394 = vmatprep.subr.bf16.mxu1 %v568_v49  ;;  %v170_v49 = vld [vmem:[#allocation10 + $0x178] sm:$0xff]  ;;  %v459_v53 = vpack.c.bf16 %v159_v45, %v149_v44  ;;  %v512_v45 = vpack.c.bf16 %v262_v36, %v252_v35  ;;  %v331_v35 = vld [vmem:[#allocation10 + $0x680] sm:$0xff] }
 0x172   :  { %1354 = vmatpush1.bf16.msra.mxu0 %v565_v55  ;;  %v470_v55 = vpack.c.bf16 %v180_v50, %v170_v49 }
 0x173   :  { %1395 = vmatpush1.bf16.msra.mxu1 %v567_v56  ;;  %1355 = vmatprep.subr.bf16.mxu0 %v576_v15  ;;  %v169_v56 = vld [vmem:[#allocation10 + $0x170] sm:$0xff]  ;;  %v179_v15 = vld [vmem:[#allocation10 + $0x1c0] sm:$0xff] }
 0x174   :  { %1396 = vmatprep.subr.bf16.mxu1 %v578_v60  ;;  %v190_v60 = vld [vmem:[#allocation10 + $0x218] sm:$0xff]  ;;  %v469_v63 = vpack.c.bf16 %v179_v15, %v169_v56 }
 0x176   :  { %1356 = vmatpush1.bf16.msra.mxu0 %v575_v1  ;;  %v480_v1 = vpack.c.bf16 %v200_v61, %v190_v60  ;;  %v279_v60 = vld [vmem:[#allocation10 + $0x4e0] sm:$0xff] }
 0x177   :  { %1397 = vmatpush1.bf16.msra.mxu1 %v577_v2  ;;  %1357 = vmatprep.subr.bf16.mxu0 %v586_v3  ;;  %v189_v2 = vld [vmem:[#allocation10 + $0x210] sm:$0xff]  ;;  %v199_v3 = vld [vmem:[#allocation10 + $0x260] sm:$0xff] }
 0x178   :  { %1398 = vmatprep.subr.bf16.mxu1 %v588_v7  ;;  %v210_v7 = vld [vmem:[#allocation10 + $0x2b8] sm:$0xff]  ;;  %v479_v11 = vpack.c.bf16 %v199_v3, %v189_v2  ;;  %v271_v61 = vld [vmem:[#allocation10 + $0x4a0] sm:$0xff]  ;;  %v292_v2 = vld [vmem:[#allocation10 + $0x548] sm:$0xff] }
 0x179   :  { %v490_v12 = vpack.c.bf16 %v220_v8, %v210_v7  ;;  %v302_v3 = vld [vmem:[#allocation10 + $0x598] sm:$0xff]  ;;  %v289_v7 = vld [vmem:[#allocation10 + $0x530] sm:$0xff]  ;;  %v299_v8 = vld [vmem:[#allocation10 + $0x580] sm:$0xff] }
 0x17a   :  { %1358 = vmatpush1.bf16.msra.mxu0 %v585_v13  ;;  %v209_v13 = vld [vmem:[#allocation10 + $0x2b0] sm:$0xff]  ;;  %v532_v10 = vpack.c.bf16 %v302_v3, %v292_v2  ;;  %v400_v2 = vld [vmem:[#allocation10 + $0x8a8] sm:$0xff] }
 0x17b   :  { %1399 = vmatpush1.bf16.msra.mxu1 %v587_v14  ;;  %1359 = vmatprep.subr.bf16.mxu0 %v596_v16  ;;  %v219_v14 = vld [vmem:[#allocation10 + $0x300] sm:$0xff]  ;;  %v392_v3 = vld [vmem:[#allocation10 + $0x868] sm:$0xff] }
 0x17c   :  { %1400 = vmatprep.subr.bf16.mxu1 %v598_v21  ;;  %v211_v16 = vld [vmem:[#allocation10 + $0x2c0] sm:$0xff]  ;;  %v240_v21 = vld [vmem:[#allocation10 + $0x3a8] sm:$0xff]  ;;  %v489_v24 = vpack.c.bf16 %v219_v14, %v209_v13  ;;  %v322_v14 = vld [vmem:[#allocation10 + $0x638] sm:$0xff] }
 0x17d   :  { %v491_v25 = vpack.c.bf16 %v221_v18, %v211_v16  ;;  %v500_v26 = vpack.c.bf16 %v240_v21, %v230_v20  ;;  %v312_v13 = vld [vmem:[#allocation10 + $0x5e8] sm:$0xff]  ;;  %v529_v16 = vpack.c.bf16 %v299_v8, %v289_v7  ;;  %v309_v20 = vld [vmem:[#allocation10 + $0x5d0] sm:$0xff]  ;;  %v319_v21 = vld [vmem:[#allocation10 + $0x620] sm:$0xff] }
 0x17e   :  { %1360 = vmatpush1.bf16.msra.mxu0 %v595_v27  ;;  %v229_v27 = vld [vmem:[#allocation10 + $0x350] sm:$0xff]  ;;  %v542_v23 = vpack.c.bf16 %v322_v14, %v312_v13  ;;  %v420_v13 = vld [vmem:[#allocation10 + $0x948] sm:$0xff] }
 0x17f   :  { %1401 = vmatpush1.bf16.msra.mxu1 %v597_v28  ;;  %1411 = vmatprep.subr.bf16.mxu0 %v450_v29  ;;  %v239_v28 = vld [vmem:[#allocation10 + $0x3a0] sm:$0xff]  ;;  %v389_v8 = vld [vmem:[#allocation10 + $0x850] sm:$0xff]  ;;  %v412_v14 = vld [vmem:[#allocation10 + $0x908] sm:$0xff] }
 0x180   :  { %1452 = vmatprep.subr.bf16.mxu1 %v452_v34  ;;  %v231_v29 = vld [vmem:[#allocation10 + $0x360] sm:$0xff]  ;;  %v260_v34 = vld [vmem:[#allocation10 + $0x448] sm:$0xff]  ;;  %v499_v37 = vpack.c.bf16 %v239_v28, %v229_v27  ;;  %v342_v28 = vld [vmem:[#allocation10 + $0x6d8] sm:$0xff] }
 0x181   :  { %1362 = vmatmul.mubr.bf16.vlgmr.msra.gmra.mrb[12].mxu0 %v2099_v33  ;;  %v501_v39 = vpack.c.bf16 %v241_v31, %v231_v29  ;;  %v510_v40 = vpack.c.bf16 %v260_v34, %v250_v32  ;;  %v332_v27 = vld [vmem:[#allocation10 + $0x688] sm:$0xff]  ;;  %v539_v29 = vpack.c.bf16 %v319_v21, %v309_v20  ;;  %v329_v32 = vld [vmem:[#allocation10 + $0x670] sm:$0xff]  ;;  %v339_v34 = vld [vmem:[#allocation10 + $0x6c0] sm:$0xff] }
 0x182   :  { %1403 = vmatmul.mubr.bf16.vlgmr.msra.gmra.mrb[12].mxu1 %v2099_v33  ;;  %1412 = vmatpush1.bf16.msra.mxu0 %v449_v41  ;;  %v249_v41 = vld [vmem:[#allocation10 + $0x3f0] sm:$0xff]  ;;  %v552_v36 = vpack.c.bf16 %v342_v28, %v332_v27  ;;  %v440_v27 = vld [vmem:[#allocation10 + $0x9e8] sm:$0xff] }
 0x183   :  { %1453 = vmatpush1.bf16.msra.mxu1 %v451_v42  ;;  %1413 = vmatprep.subr.bf16.mxu0 %v460_v43  ;;  %v259_v42 = vld [vmem:[#allocation10 + $0x440] sm:$0xff]  ;;  %v409_v21 = vld [vmem:[#allocation10 + $0x8f0] sm:$0xff]  ;;  %v432_v28 = vld [vmem:[#allocation10 + $0x9a8] sm:$0xff] }
 0x184   :  { %1454 = vmatprep.subr.bf16.mxu1 %v462_v47  ;;  %1443 = vmatprep.mubr.bf16.mxu0 %v2094_v38  ;;  %v251_v43 = vld [vmem:[#allocation10 + $0x400] sm:$0xff]  ;;  %v270_v47 = vld [vmem:[#allocation10 + $0x498] sm:$0xff] }
 0x185   :  { %1484 = vmatprep.mubr.bf16.mxu1 %v2094_v38  ;;  %v481_v38 = vpack.c.bf16 %v201_v6, %v191_v4  ;;  %v511_v57 = vpack.c.bf16 %v261_v46, %v251_v43  ;;  %v519_v4 = vpack.c.bf16 %v279_v60, %v269_v59  ;;  %v549_v43 = vpack.c.bf16 %v339_v34, %v329_v32  ;;  %v429_v34 = vld [vmem:[#allocation10 + $0x990] sm:$0xff] }
 0x186   :  { %1414 = vmatpush1.bf16.msra.mxu0 %v459_v53 }
 0x187   :  { %1455 = vmatpush1.bf16.msra.mxu1 %v461_v54  ;;  %1415 = vmatprep.subr.bf16.mxu0 %v470_v55  ;;  %v509_v55 = vpack.c.bf16 %v259_v42, %v249_v41  ;;  %v352_v41 = vld [vmem:[#allocation10 + $0x728] sm:$0xff]  ;;  %v362_v42 = vld [vmem:[#allocation10 + $0x778] sm:$0xff] }
 0x188   :  { %1456 = vmatprep.subr.bf16.mxu1 %v472_v58  ;;  %v520_v58 = vpack.c.bf16 %v280_v48, %v270_v47  ;;  %v349_v47 = vld [vmem:[#allocation10 + $0x710] sm:$0xff]  ;;  %v359_v48 = vld [vmem:[#allocation10 + $0x760] sm:$0xff]  ;;  %v562_v52 = vpack.c.bf16 %v362_v42, %v352_v41 }
 0x18a   :  { %1416 = vmatpush1.bf16.msra.mxu0 %v469_v63  ;;  %v281_v63 = vld [vmem:[#allocation10 + $0x4f0] sm:$0xff] }
 0x18b   :  { %1457 = vmatpush1.bf16.msra.mxu1 %v471_v0  ;;  %1417 = vmatprep.subr.bf16.mxu0 %v480_v1  ;;  %v290_v0 = vld [vmem:[#allocation10 + $0x538] sm:$0xff]  ;;  %v300_v1 = vld [vmem:[#allocation10 + $0x588] sm:$0xff] }
 0x18c   :  { %1458 = vmatprep.subr.bf16.mxu1 %v482_v5  ;;  %v521_v5 = vpack.c.bf16 %v281_v63, %v271_v61  ;;  %v530_v6 = vpack.c.bf16 %v300_v1, %v290_v0  ;;  %v369_v61 = vld [vmem:[#allocation10 + $0x7b0] sm:$0xff]  ;;  %v390_v1 = vld [vmem:[#allocation10 + $0x858] sm:$0xff] }
 0x18d   :  { %v381_v0 = vld [vmem:[#allocation10 + $0x810] sm:$0xff]  ;;  %v580_v7 = vpack.c.bf16 %v400_v2, %v390_v1  ;;  %v2139_v2 = vld [vmem:[#allocation13] sm:$0xff] }
 0x18e   :  { %1418 = vmatpush1.bf16.msra.mxu0 %v479_v11  ;;  %v301_v11 = vld [vmem:[#allocation10 + $0x590] sm:$0xff] }
 0x18f   :  { %1459 = vmatpush1.bf16.msra.mxu1 %v481_v38  ;;  %1419 = vmatprep.subr.bf16.mxu0 %v490_v12  ;;  %v310_v38 = vld [vmem:[#allocation10 + $0x5d8] sm:$0xff]  ;;  %v320_v12 = vld [vmem:[#allocation10 + $0x628] sm:$0xff] }
 0x190   :  { %1460 = vmatprep.subr.bf16.mxu1 %v492_v17  ;;  %v531_v17 = vpack.c.bf16 %v301_v11, %v291_v9  ;;  %v540_v18 = vpack.c.bf16 %v320_v12, %v310_v38  ;;  %v399_v9 = vld [vmem:[#allocation10 + $0x8a0] sm:$0xff]  ;;  %v401_v38 = vld [vmem:[#allocation10 + $0x8b0] sm:$0xff]  ;;  %v410_v12 = vld [vmem:[#allocation10 + $0x8f8] sm:$0xff] }
 0x191   :  { %v590_v20 = vpack.c.bf16 %v420_v13, %v410_v12 }
 0x192   :  { %1420 = vmatpush1.bf16.msra.mxu0 %v489_v24  ;;  %v321_v24 = vld [vmem:[#allocation10 + $0x630] sm:$0xff] }
 0x193   :  { %1461 = vmatpush1.bf16.msra.mxu1 %v491_v25  ;;  %1421 = vmatprep.subr.bf16.mxu0 %v500_v26  ;;  %v330_v25 = vld [vmem:[#allocation10 + $0x678] sm:$0xff]  ;;  %v340_v26 = vld [vmem:[#allocation10 + $0x6c8] sm:$0xff] }
 0x194   :  { %v2109_v44 = vpop.f32.mrb[0].mxu0  ;;  %1462 = vmatprep.subr.bf16.mxu1 %v502_v30  ;;  %v541_v30 = vpack.c.bf16 %v321_v24, %v311_v22  ;;  %v550_v31 = vpack.c.bf16 %v340_v26, %v330_v25  ;;  %v419_v22 = vld [vmem:[#allocation10 + $0x940] sm:$0xff]  ;;  %v421_v25 = vld [vmem:[#allocation10 + $0x950] sm:$0xff]  ;;  %v430_v26 = vld [vmem:[#allocation10 + $0x998] sm:$0xff] }
 0x195   :  { %v2111_v49 = vpop.f32.mrb[0].mxu1  ;;  %v2113_v50 = vpop.f32.mrb[1].mxu0  ;;  %v600_v32 = vpack.c.bf16 %v440_v27, %v430_v26 }
 0x196   :  { %v2115_v53 = vpop.f32.mrb[1].mxu1  ;;  %v1121_v54 = vpop.f32.mrb[2].mxu0  ;;  %1422 = vmatpush1.bf16.msra.mxu0 %v499_v37  ;;  %v341_v37 = vld [vmem:[#allocation10 + $0x6d0] sm:$0xff] }
 0x197   :  { %v1162_v56 = vpop.f32.mrb[2].mxu1  ;;  %1463 = vmatpush1.bf16.msra.mxu1 %v501_v39  ;;  %v1122_v15 = vpop.f32.mrb[3].mxu0  ;;  %1423 = vmatprep.subr.bf16.mxu0 %v510_v40  ;;  %v350_v39 = vld [vmem:[#allocation10 + $0x718] sm:$0xff]  ;;  %v360_v40 = vld [vmem:[#allocation10 + $0x768] sm:$0xff]  ;;  %v361_v54 = vld [vmem:[#allocation10 + $0x770] sm:$0xff] }
 0x198   :  { %v1163_v19 = vpop.f32.mrb[3].mxu1  ;;  %1464 = vmatprep.subr.bf16.mxu1 %v512_v45  ;;  %v551_v45 = vpack.c.bf16 %v341_v37, %v331_v35  ;;  %v560_v46 = vpack.c.bf16 %v360_v40, %v350_v39  ;;  %v380_v56 = vld [vmem:[#allocation10 + $0x808] sm:$0xff]  ;;  %v561_v59 = vpack.c.bf16 %v361_v54, %v351_v51  ;;  %v439_v35 = vld [vmem:[#allocation10 + $0x9e0] sm:$0xff]  ;;  %v441_v39 = vld [vmem:[#allocation10 + $0x9f0] sm:$0xff] }
 0x199   :  { %v372_v15 = vld [vmem:[#allocation10 + $0x7c8] sm:$0xff]  ;;  %v379_v19 = vld [vmem:[#allocation10 + $0x800] sm:$0xff]  ;;  %v599_v40 = vpack.c.bf16 %v439_v35, %v429_v34  ;;  %v1559_v35 = vld [vmem:[#allocation8] sm:$0xff] }
 0x19a   :  { %1424 = vmatpush1.bf16.msra.mxu0 %v509_v55  ;;  %v370_v55 = vld [vmem:[#allocation10 + $0x7b8] sm:$0xff]  ;;  %v431_v37 = vld [vmem:[#allocation10 + $0x9a0] sm:$0xff] }
 0x19b   :  { %1465 = vmatpush1.bf16.msra.mxu1 %v511_v57  ;;  %1425 = vmatprep.subr.bf16.mxu0 %v520_v58  ;;  %v382_v57 = vld [vmem:[#allocation10 + $0x818] sm:$0xff]  ;;  %v559_v58 = vpack.c.bf16 %v359_v48, %v349_v47  ;;  %v570_v60 = vpack.c.bf16 %v380_v56, %v370_v55  ;;  %v601_v41 = vpack.c.bf16 %v441_v39, %v431_v37  ;;  %v1557_v34 = vld [vmem:[#allocation7] sm:$0xff]  ;;  %v1558_v37 = vld [vmem:[#allocation7 + $0x8] sm:$0xff] }
 0x19c   :  { %1466 = vmatprep.subr.bf16.mxu1 %v522_v62  ;;  %v371_v62 = vld [vmem:[#allocation10 + $0x7c0] sm:$0xff]  ;;  %v572_v63 = vpack.c.bf16 %v382_v57, %v372_v15 }
 0x19e   :  { %1426 = vmatpush1.bf16.msra.mxu0 %v519_v4  ;;  %v402_v4 = vld [vmem:[#allocation10 + $0x8b8] sm:$0xff] }
 0x19f   :  { %1467 = vmatpush1.bf16.msra.mxu1 %v521_v5  ;;  %1427 = vmatprep.subr.bf16.mxu0 %v530_v6  ;;  %v569_v5 = vpack.c.bf16 %v379_v19, %v369_v61  ;;  %v571_v6 = vpack.c.bf16 %v381_v0, %v371_v62  ;;  %v582_v11 = vpack.c.bf16 %v402_v4, %v392_v3  ;;  %v1497_v19 = vlaneseq }
 0x1a0   :  { %1468 = vmatprep.subr.bf16.mxu1 %v532_v10  ;;  %v391_v10 = vld [vmem:[#allocation10 + $0x860] sm:$0xff] }
 0x1a1   :  { %v2133_v62 = vshrl.u32 %v1497_v19, 7 }
 0x1a2   :  { %1428 = vmatpush1.bf16.msra.mxu0 %v529_v16  ;;  %v422_v16 = vld [vmem:[#allocation10 + $0x958] sm:$0xff] }
 0x1a3   :  { %1469 = vmatpush1.bf16.msra.mxu1 %v531_v17  ;;  %1429 = vmatprep.subr.bf16.mxu0 %v540_v18  ;;  %v579_v17 = vpack.c.bf16 %v399_v9, %v389_v8  ;;  %v581_v18 = vpack.c.bf16 %v401_v38, %v391_v10  ;;  %v592_v24 = vpack.c.bf16 %v422_v16, %v412_v14  ;;  %v1515_v0 = vsub.s32 4, %v2133_v62 }
 0x1a4   :  { %1470 = vmatprep.subr.bf16.mxu1 %v542_v23  ;;  %v411_v23 = vld [vmem:[#allocation10 + $0x900] sm:$0xff]  ;;  %v1511_v1 = vsub.s32 3, %v2133_v62 }
 0x1a5   :  { %v1516_v4 = vrot.slane %v2139_v2, %v1515_v0 }
 0x1a6   :  { %1430 = vmatpush1.bf16.msra.mxu0 %v539_v29  ;;  %v442_v29 = vld [vmem:[#allocation10 + $0x9f8] sm:$0xff] }
 0x1a7   :  { %1471 = vmatpush1.bf16.msra.mxu1 %v541_v30  ;;  %1431 = vmatprep.subr.bf16.mxu0 %v550_v31  ;;  %v589_v30 = vpack.c.bf16 %v419_v22, %v409_v21  ;;  %v591_v31 = vpack.c.bf16 %v421_v25, %v411_v23 }
 0x1a8   :  { %1472 = vmatprep.subr.bf16.mxu1 %v552_v36  ;;  %v602_v36 = vpack.c.bf16 %v442_v29, %v432_v28 }
 0x1aa   :  { %1432 = vmatpush1.bf16.msra.mxu0 %v549_v43 }
 0x1ab   :  { %1473 = vmatpush1.bf16.msra.mxu1 %v551_v45  ;;  %1433 = vmatprep.subr.bf16.mxu0 %v560_v46 }
 0x1ac   :  { %1474 = vmatprep.subr.bf16.mxu1 %v562_v52 }
 0x1ae   :  { %1434 = vmatpush1.bf16.msra.mxu0 %v559_v58 }
 0x1af   :  { %1475 = vmatpush1.bf16.msra.mxu1 %v561_v59  ;;  %1435 = vmatprep.subr.bf16.mxu0 %v570_v60 }
 0x1b0   :  { %1476 = vmatprep.subr.bf16.mxu1 %v572_v63  ;;  %v1507_v63 = vsub.s32 2, %v2133_v62 }
 0x1b2   :  { %1436 = vmatpush1.bf16.msra.mxu0 %v569_v5  ;;  %v1508_v3 = vrot.slane %v2139_v2, %v1507_v63  ;;  %v1512_v5 = vrot.slane %v2139_v2, %v1511_v1  ;;  %v1523_v1 = vsub.s32 6, %v2133_v62 }
 0x1b3   :  { %1477 = vmatpush1.bf16.msra.mxu1 %v571_v6  ;;  %1437 = vmatprep.subr.bf16.mxu0 %v580_v7 }
 0x1b4   :  { %1478 = vmatprep.subr.bf16.mxu1 %v582_v11 }
 0x1b6   :  { %1438 = vmatpush1.bf16.msra.mxu0 %v579_v17 }
 0x1b7   :  { %1479 = vmatpush1.bf16.msra.mxu1 %v581_v18  ;;  %1439 = vmatprep.subr.bf16.mxu0 %v590_v20 }
 0x1b8   :  { %1480 = vmatprep.subr.bf16.mxu1 %v592_v24 }
 0x1ba   :  { %1440 = vmatpush1.bf16.msra.mxu0 %v589_v30 }
 0x1bb   :  { %1481 = vmatpush1.bf16.msra.mxu1 %v591_v31  ;;  %1441 = vmatprep.subr.bf16.mxu0 %v600_v32 }
 0x1bc   :  { %1482 = vmatprep.subr.bf16.mxu1 %v602_v36 }
 0x1be   :  { %1442 = vmatpush1.bf16.msra.mxu0 %v599_v40 }
 0x1bf   :  { %1483 = vmatpush1.bf16.msra.mxu1 %v601_v41  ;;  %v1560_v41 = vld [vmem:[#allocation8 + $0x8] sm:$0xff] }
 0x1c1   :  { %1444 = vmatmul.mubr.bf16.vlgmr.msra.gmra.mrb[16].mxu0 %v2099_v33 }
 0x1c2   :  { %1485 = vmatmul.mubr.bf16.vlgmr.msra.gmra.mrb[16].mxu1 %v2099_v33 }
 0x1d4   :  { %v1199_v42 = vpop.f32.mrb[4].mxu0 }
 0x1d5   :  { %v2119_v43 = vpop.f32.mrb[4].mxu1  ;;  %v1201_v45 = vpop.f32.mrb[5].mxu0 }
 0x1d6   :  { %v2121_v46 = vpop.f32.mrb[5].mxu1  ;;  %v1203_v47 = vpop.f32.mrb[6].mxu0 }
 0x1d7   :  { %v1244_v48 = vpop.f32.mrb[6].mxu1  ;;  %v1204_v51 = vpop.f32.mrb[7].mxu0 }
 0x1d8   :  { %v1245_v52 = vpop.f32.mrb[7].mxu1 }
 0x214   :  { %v2123_v54 = vpop.f32.mrb[8].mxu0 }
 0x215   :  { %v1322_v55 = vpop.f32.mrb[8].mxu1  ;;  %v2125_v56 = vpop.f32.mrb[9].mxu0 }
 0x216   :  { %v2128_v15 = vadd.f32 %v1322_v55, %v2109_v44  ;;  %v1324_v57 = vpop.f32.mrb[9].mxu1  ;;  %v1285_v33 = vpop.f32.mrb[10].mxu0  ;;  %v1519_v44 = vsub.s32 5, %v2133_v62  ;;  %v1499_v55 = vsub.s32 0, %v2133_v62 }
 0x217   :  { %v2131_v58 = vadd.f32 %v1324_v57, %v2113_v50  ;;  %v1326_v59 = vpop.f32.mrb[10].mxu1  ;;  %v1286_v60 = vpop.f32.mrb[11].mxu0  ;;  %v1503_v57 = vsub.s32 1, %v2133_v62 }
 0x218   :  { %v1327_v61 = vpop.f32.mrb[11].mxu1  ;;  %v1520_v9 = vrot.slane %v2139_v2, %v1519_v44  ;;  %v1500_v59 = vrot.slane %v2139_v2, %v1499_v55  ;;  %v1527_v44 = vsub.s32 7, %v2133_v62 }
 0x219   :  { %v1504_v60 = vrot.slane %v2139_v2, %v1503_v57 }
 0x21a   :  { %v1547_v61 = vadd.f32 %v1500_v59, %v2128_v15  ;;  %v1528_v15 = vrot.slane %v2139_v2, %v1527_v44 }
 0x21b   :  { %v1548_v19 = vadd.f32 %v1504_v60, %v2131_v58 }
 0x21c   :  { %v1665_v63 = vmul.f32 -1.442695, %v1547_v61 }
 0x21d   :  { %v1666_v0 = vmul.f32 -1.442695, %v1548_v19 }
 0x254   :  { %v1363_v50 = vpop.f32.mrb[12].mxu0 }
 0x255   :  { %v1364_v6 = vadd.f32 %v1363_v50, %v2111_v49  ;;  %v1404_v7 = vpop.f32.mrb[12].mxu1  ;;  %v1365_v8 = vpop.f32.mrb[13].mxu0  ;;  %v1494_v50 = vld [vmem:[#allocation13 + $0x8] sm:$0x3] }
 0x256   :  { %v1405_v10 = vadd.f32 %v1404_v7, %v1199_v42  ;;  %v1366_v11 = vadd.f32 %v1365_v8, %v2115_v53  ;;  %v1406_v38 = vpop.f32.mrb[13].mxu1  ;;  %v1367_v12 = vpop.f32.mrb[14].mxu0  ;;  %v1532_v8 = vrot.slane %v1494_v50, %v1499_v55 }
 0x257   :  { %v1549_v13 = vadd.f32 %v1508_v3, %v1364_v6  ;;  %v1407_v14 = vadd.f32 %v1406_v38, %v1201_v45  ;;  %v1408_v16 = vpop.f32.mrb[14].mxu1  ;;  %v1368_v17 = vpop.f32.mrb[15].mxu0  ;;  %v1536_v38 = vrot.slane %v1494_v50, %v1503_v57 }
 0x258   :  { %v1551_v18 = vadd.f32 %v1516_v4, %v1405_v10  ;;  %v1550_v20 = vadd.f32 %v1512_v5, %v1366_v11  ;;  %v1409_v21 = vpop.f32.mrb[15].mxu1  ;;  %v1524_v5 = vrot.slane %v2139_v2, %v1523_v1 }
 0x259   :  { %v1661_v22 = vmul.f32 -1.442695, %v1549_v13  ;;  %v1552_v23 = vadd.f32 %v1520_v9, %v1407_v14 }
 0x25a   :  { %v1663_v24 = vmul.f32 -1.442695, %v1551_v18  ;;  %v1662_v49 = vmul.f32 -1.442695, %v1550_v20 }
 0x25b   :  { %1680 = vpow2.f32 %v1661_v22  ;;  %v1664_v25 = vmul.f32 -1.442695, %v1552_v23 }
 0x25c   :  { %1682 = vpow2.f32 %v1663_v24 }
 0x25d   :  { %1684 = vpow2.f32 %v1662_v49 }
 0x25e   :  { %1686 = vpow2.f32 %v1664_v25 }
 0x265   :  { %v1681_v26 = vpop.eup %1680 }
 0x266   :  { %v1683_v53 = vpop.eup %1682  ;;  %v1567_v27 = vadd.f32 1.0, %v1681_v26 }
 0x267   :  { %v1685_v28 = vpop.eup %1684  ;;  %v1581_v29 = vadd.f32 1.0, %v1683_v53 }
 0x268   :  { %v1687_v30 = vpop.eup %1686  ;;  %1688 = vrcp.f32 %v1567_v27  ;;  %v1568_v31 = vadd.f32 1.0, %v1685_v28 }
 0x269   :  { %1690 = vrcp.f32 %v1581_v29  ;;  %v1582_v32 = vadd.f32 1.0, %v1687_v30 }
 0x26a   :  { %1692 = vrcp.f32 %v1568_v31 }
 0x26b   :  { %1694 = vrcp.f32 %v1582_v32 }
 0x26c   :  { %1696 = vpow2.f32 %v1665_v63 }
 0x26d   :  { %1698 = vpow2.f32 %v1666_v0 }
 0x272   :  { %v1689_v36 = vpop.eup %1688 }
 0x273   :  { %v1691_v39 = vpop.eup %1690  ;;  %v1573_v40 = vmul.f32 %v1689_v36, %v1557_v34 }
 0x274   :  { %v1693_v42 = vpop.eup %1692  ;;  %v1587_v45 = vmul.f32 %v1691_v39, %v1559_v35 }
 0x275   :  { %v1695_v47 = vpop.eup %1694  ;;  %v1574_v48 = vmul.f32 %v1693_v42, %v1558_v37 }
 0x276   :  { %v1588_v51 = vmul.f32 %v1695_v47, %v1560_v41  ;;  %v1589_v52 = vadd.f32 %v1587_v45, %v1573_v40  ;;  %v1697_v3 = vpop.eup %1696 }
 0x277   :  { %v1699_v4 = vpop.eup %1698  ;;  %v1597_v6 = vadd.f32 1.0, %v1697_v3 }
 0x278   :  { %v1590_v33 = vadd.f32 %v1588_v51, %v1574_v48  ;;  %v1598_v9 = vadd.f32 1.0, %v1699_v4 }
 0x279   :  { %1700 = vrcp.f32 %v1597_v6 }
 0x27a   :  { %1702 = vrcp.f32 %v1598_v9 }
 0x294   :  { %v1445_v7 = vpop.f32.mrb[16].mxu0 }
 0x295   :  { %v1446_v58 = vadd.f32 %v1445_v7, %v2119_v43  ;;  %v1486_v10 = vpop.f32.mrb[16].mxu1  ;;  %v1447_v11 = vpop.f32.mrb[17].mxu0 }
 0x296   :  { %v1487_v12 = vadd.f32 %v1486_v10, %v2123_v54  ;;  %v1448_v62 = vadd.f32 %v1447_v11, %v2121_v46  ;;  %v1488_v13 = vpop.f32.mrb[17].mxu1  ;;  %v1449_v14 = vpop.f32.mrb[18].mxu0 }
 0x297   :  { %v1553_v16 = vadd.f32 %v1524_v5, %v1446_v58  ;;  %v1489_v17 = vadd.f32 %v1488_v13, %v2125_v56  ;;  %v1490_v18 = vpop.f32.mrb[18].mxu1  ;;  %v1450_v20 = vpop.f32.mrb[19].mxu0 }
 0x298   :  { %v1555_v21 = vadd.f32 %v1532_v8, %v1487_v12  ;;  %v1554_v2 = vadd.f32 %v1528_v15, %v1448_v62  ;;  %v1491_v22 = vpop.f32.mrb[19].mxu1  ;;  %v1701_v46 = vpop.eup %1700 }
 0x299   :  { %v1667_v43 = vmul.f32 -1.442695, %v1553_v16  ;;  %v1556_v23 = vadd.f32 %v1536_v38, %v1489_v17  ;;  %v1703_v54 = vpop.eup %1702 }
 0x29a   :  { %1704 = vtanh.f32 %v1555_v21  ;;  %v1668_v24 = vmul.f32 -1.442695, %v1554_v2 }
 0x29b   :  { %1706 = vpow2.f32 %v1667_v43 }
 0x29c   :  { %1708 = vpow2.f32 %v1668_v24 }
 0x29d   :  { %1710 = vtanh.f32 %v1556_v23 }
 0x2a4   :  { %v1705_v49 = vpop.eup %1704 }
 0x2a5   :  { %v1707_v25 = vpop.eup %1706  ;;  %v1605_v26 = vmul.f32 %v1705_v49, %v1701_v46 }
 0x2a6   :  { %v1709_v56 = vpop.eup %1708  ;;  %v1615_v53 = vadd.f32 1.0, %v1707_v25 }
 0x2a7   :  { %v1711_v27 = vpop.eup %1710  ;;  %v1607_v28 = vadd.f32 %v1605_v26, %v1589_v52  ;;  %v1616_v29 = vadd.f32 1.0, %v1709_v56 }
 0x2a8   :  { %1712 = vrcp.f32 %v1615_v53  ;;  %v1606_v30 = vmul.f32 %v1711_v27, %v1703_v54 }
 0x2a9   :  { %1627 = vst [vmem:[#allocation15] sm:$0xff] %v1607_v28  ;;  %1714 = vrcp.f32 %v1616_v29 }
 0x2aa   :  { %v1608_v31 = vadd.f32 %v1606_v30, %v1590_v33  ;;  %1716 = vtanh.f32 %v1607_v28 }
 0x2ac   :  { %1628 = vst [vmem:[#allocation15 + $0x8] sm:$0xff] %v1608_v31  ;;  %1718 = vtanh.f32 %v1608_v31 }
 0x2ad   :  { %1885 = shalt.err (!%p1882_p4)
}
 0x2ae   :  { %s1886_s10 = scalar_lea.hbm %s2193_s8, 256 }
 0x2af   :  { %p1887_p5 = scmp.ne.s32.totalorder %s2193_s8, %s1886_s10  ;;  %p1890_p6 = scmp.lt.u32.totalorder %s1886_s10, %s2193_s8 }
 0x2b1   :  { %p1892_p7 = pnand %p1890_p6, %p1887_p5 }
 0x2b3   :  { %1895 = shalt.err (!%p1892_p7)
}
 0x2b4   :  { %1648 = dma.vmem_to_hbm [thread:$0]  %s1646_s18, 256, %s2193_s8, [#allocation16]   ;;  %v1713_v32 = vpop.eup %1712 }
 0x2b5   :  { %v1715_v34 = vpop.eup %1714  ;;  %s1940_s26 = smov [#allocation14]  }
 0x2b6   :  { %v1717_v35 = vpop.eup %1716  ;;  %s1635_s1 = sshll.u32 %s1940_s26, 4  ;;  %s1636_s1 = int_to_ptr.vmem [resolvable:$true] %s1635_s1 }
 0x2b7   :  { %v1623_v36 = vmul.f32 %v1717_v35, %v1713_v32  ;;  %v1719_v37 = vpop.eup %1718  ;;  %s1896_s27 = scalar_lea.vmem %s1636_s1, 256  ;;  %p1901_p9 = scmp.lt.s32.totalorder %s1636_s1, %s1636_s1 }
 0x2b8   :  { %v1624_v39 = vmul.f32 %v1719_v37, %v1715_v34  ;;  %p1897_p8 = scmp.ne.s32.totalorder %s1636_s1, %s1896_s27  ;;  %p1902_p10 = scmp.lt.s32.totalorder %s1896_s27, %s1896_s27 }
 0x2b9   :  { %1625 = vst [vmem:[#allocation14] sm:$0xff] %v1623_v36 }
 0x2ba   :  { %1626 = vst [vmem:[#allocation14 + $0x8] sm:$0xff] %v1624_v39  ;;  %p1903_p11 = por %p1902_p10, %p1901_p9 }
 0x2bc   :  { %p1904_p12 = pnand %p1903_p11, %p1897_p8 }
 0x2be   :  { %1907 = shalt.err (!%p1904_p12)
}
 0x2bf   :  { %s1908_s5 = scalar_lea.hbm %s2192_s7, 256 }
 0x2c0   :  { %p1909_p13 = scmp.ne.s32.totalorder %s2192_s7, %s1908_s5  ;;  %p1912_p0 = scmp.lt.u32.totalorder %s1908_s5, %s2192_s7 }
 0x2c2   :  { %p1914_p1 = pnand %p1912_p0, %p1909_p13 }
 0x2c4   :  { %1917 = shalt.err (!%p1914_p1)
}
 0x2c5   :  { %1638 = dma.vmem_to_hbm [thread:$0]  %s1636_s1, 256, %s2192_s7, [#allocation4]  }
 0x2c6   :  { %1926 = dma.done.wait [#allocation4], 256  }
 0x2c7   :  { %1927 = vsyncadd [#allocation4], 4294967040 }
 0x2c8   :  { %1928 = dma.done.wait [#allocation16], 256  }
 0x2c9   :  { %1929 = vsyncadd [#allocation16], 4294967040 }
 0x2ca   :  { %1655 = vsyncpa [#allocation3], 1 }
 0x2cb   :  { %1656 = vsyncpa [#allocation6], 1 }
 0x2cc   :  { %1657 = vsyncpa [#allocation9], 1 }
 0x2cd   :  { %1658 = vsyncpa [#allocation12], 1 }
 0x2ce   :  { %1659 = vsyncpa [#allocation4], 1 }
 0x2cf   :  { %1660 = vsyncpa [#allocation16], 1 }

// kernel: tree_lstm_cell.1
= control target key start
LH: loop header
LB: loop body
LE: loop exit
PB: predicated region body
PF: predicated region fallthrough
CT: control target
= control target key end

     0   :  { %14 = vsyncpa [#allocation3], 0  ;;  %s2185_s0 = inlined_call_operand.hbm [shape: f32[8,256], index: 0, kind: input, shape index: {}]   ;;  %s2186_s1 = inlined_call_operand.hbm [shape: f32[8,256], index: 1, kind: input, shape index: {}]   ;;  %s2187_s2 = inlined_call_operand.hbm [shape: f32[8,256], index: 2, kind: input, shape index: {}]   ;;  %s2188_s3 = inlined_call_operand.hbm [shape: f32[8,256], index: 3, kind: input, shape index: {}]   ;;  %s2189_s4 = inlined_call_operand.hbm [shape: f32[256,1280], index: 4, kind: input, shape index: {}]   ;;  %s2190_s5 = inlined_call_operand.hbm [shape: f32[256,1280], index: 5, kind: input, shape index: {}]   ;;  %s2191_s6 = inlined_call_operand.hbm [shape: f32[1,1280], index: 6, kind: input, shape index: {}]   ;;  %s2192_s7 = inlined_call_operand.hbm [shape: f32[8,256], index: 7, kind: output, shape index: {0}]   ;;  %s2193_s8 = inlined_call_operand.hbm [shape: f32[8,256], index: 8, kind: output, shape index: {1}]  }
   0x1   :  { %15 = vsyncpa [#allocation6], 0 }
   0x2   :  { %16 = vsyncpa [#allocation9], 0 }
   0x3   :  { %17 = vsyncpa [#allocation12], 0 }
   0x4   :  { %18 = vsyncpa [#allocation4], 0 }
   0x5   :  { %19 = vsyncpa [#allocation16], 0  ;;  %s1930_s27 = smov [#allocation5]   ;;  %s1931_s29 = smov [#allocation8]  }
   0x6   :  { %s36_s28 = sshll.u32 %s1930_s27, 4  ;;  %s56_s30 = sshll.u32 %s1931_s29, 4  ;;  %s37_s28 = int_to_ptr.vmem [resolvable:$true] %s36_s28  ;;  %s57_s30 = int_to_ptr.vmem [resolvable:$true] %s56_s30 }
   0x7   :  { %s1720_s11 = scalar_lea.hbm %s2186_s1, 256 }
   0x8   :  { %p1721_p0 = scmp.ne.s32.totalorder %s2186_s1, %s1720_s11  ;;  %p1724_p1 = scmp.lt.u32.totalorder %s1720_s11, %s2186_s1 }
   0xa   :  { %p1726_p2 = pnand %p1724_p1, %p1721_p0 }
   0xc   :  { %1729 = shalt.err (!%p1726_p2)
}
   0xd   :  { %s1730_s16 = scalar_lea.vmem %s37_s28, 256  ;;  %p1735_p4 = scmp.lt.s32.totalorder %s37_s28, %s37_s28 }
   0xe   :  { %p1731_p3 = scmp.ne.s32.totalorder %s37_s28, %s1730_s16  ;;  %p1736_p5 = scmp.lt.s32.totalorder %s1730_s16, %s1730_s16 }
  0x10   :  { %p1737_p6 = por %p1736_p5, %p1735_p4 }
  0x12   :  { %p1738_p7 = pnand %p1737_p6, %p1731_p3 }
  0x14   :  { %1741 = shalt.err (!%p1738_p7)
}
  0x15   :  { %39 = dma.hbm_to_vmem [thread:$0]  %s2186_s1, 256, %s37_s28, [#allocation6]  }
  0x16   :  { %s1742_s21 = scalar_lea.hbm %s2188_s3, 256 }
  0x17   :  { %p1743_p8 = scmp.ne.s32.totalorder %s2188_s3, %s1742_s21  ;;  %p1746_p9 = scmp.lt.u32.totalorder %s1742_s21, %s2188_s3 }
  0x19   :  { %p1748_p10 = pnand %p1746_p9, %p1743_p8 }
  0x1b   :  { %1751 = shalt.err (!%p1748_p10)
}
  0x1c   :  { %s1752_s26 = scalar_lea.vmem %s57_s30, 256  ;;  %p1757_p12 = scmp.lt.s32.totalorder %s57_s30, %s57_s30 }
  0x1d   :  { %p1753_p11 = scmp.ne.s32.totalorder %s57_s30, %s1752_s26  ;;  %p1758_p13 = scmp.lt.s32.totalorder %s1752_s26, %s1752_s26 }
  0x1f   :  { %p1759_p0 = por %p1758_p13, %p1757_p12 }
  0x21   :  { %p1760_p1 = pnand %p1759_p0, %p1753_p11 }
  0x23   :  { %1763 = shalt.err (!%p1760_p1)
}
  0x24   :  { %59 = dma.hbm_to_vmem [thread:$0]  %s2188_s3, 256, %s57_s30, [#allocation9]  }
  0x25   :  { %s1932_s28 = smov [#allocation11]   ;;  %s1933_s9 = smov [#allocation2]  }
  0x26   :  { %s77_s29 = sshll.u32 %s1932_s28, 4  ;;  %s26_s10 = sshll.u32 %s1933_s9, 4  ;;  %s78_s29 = int_to_ptr.vmem [resolvable:$true] %s77_s29  ;;  %s27_s10 = int_to_ptr.vmem [resolvable:$true] %s26_s10 }
  0x27   :  { %s1764_s13 = scalar_lea.hbm %s2190_s5, 40960 }
  0x28   :  { %p1765_p2 = scmp.ne.s32.totalorder %s2190_s5, %s1764_s13  ;;  %p1768_p3 = scmp.lt.u32.totalorder %s1764_s13, %s2190_s5 }
  0x2a   :  { %p1770_p4 = pnand %p1768_p3, %p1765_p2 }
  0x2c   :  { %1773 = shalt.err (!%p1770_p4)
}
  0x2d   :  { %s1774_s3 = scalar_lea.vmem %s78_s29, 40960  ;;  %p1779_p6 = scmp.lt.s32.totalorder %s78_s29, %s78_s29 }
  0x2e   :  { %p1775_p5 = scmp.ne.s32.totalorder %s78_s29, %s1774_s3  ;;  %p1780_p7 = scmp.lt.s32.totalorder %s1774_s3, %s1774_s3 }
  0x30   :  { %p1781_p8 = por %p1780_p7, %p1779_p6 }
  0x32   :  { %p1782_p9 = pnand %p1781_p8, %p1775_p5 }
  0x34   :  { %1785 = shalt.err (!%p1782_p9)
}
  0x35   :  { %s1934_s30 = smov 1280   ;;  %s1935_s18 = smov 80  }
  0x36   :  { %83 = dma.hbm_to_vmem [thread:$0]  %s2190_s5, 40960, %s78_s29, [#allocation12], %s1934_s30, %s1934_s30, %s1935_s18  }
  0x37   :  { %s1786_s23 = scalar_lea.hbm %s2185_s0, 256 }
  0x38   :  { %p1787_p10 = scmp.ne.s32.totalorder %s2185_s0, %s1786_s23  ;;  %p1790_p11 = scmp.lt.u32.totalorder %s1786_s23, %s2185_s0 }
  0x3a   :  { %p1792_p12 = pnand %p1790_p11, %p1787_p10 }
  0x3c   :  { %1795 = shalt.err (!%p1792_p12)
}
  0x3d   :  { %s1796_s27 = scalar_lea.vmem %s27_s10, 256  ;;  %p1801_p0 = scmp.lt.s32.totalorder %s27_s10, %s27_s10 }
  0x3e   :  { %p1797_p13 = scmp.ne.s32.totalorder %s27_s10, %s1796_s27  ;;  %p1802_p1 = scmp.lt.s32.totalorder %s1796_s27, %s1796_s27 }
  0x40   :  { %p1803_p2 = por %p1802_p1, %p1801_p0 }
  0x42   :  { %p1804_p3 = pnand %p1803_p2, %p1797_p13 }
  0x44   :  { %1807 = shalt.err (!%p1804_p3)
}
  0x45   :  { %29 = dma.hbm_to_vmem [thread:$0]  %s2185_s0, 256, %s27_s10, [#allocation3]  }
  0x46   :  { %s1936_s29 = smov [#allocation7]   ;;  %s1937_s11 = smov [#allocation10]  }
  0x47   :  { %s46_s9 = sshll.u32 %s1936_s29, 4  ;;  %s65_s12 = sshll.u32 %s1937_s11, 4  ;;  %s47_s9 = int_to_ptr.vmem [resolvable:$true] %s46_s9  ;;  %s2037_s12 = int_to_ptr.vmem [resolvable:$true] %s65_s12 }
  0x48   :  { %s1808_s15 = scalar_lea.hbm %s2187_s2, 256 }
  0x49   :  { %p1809_p4 = scmp.ne.s32.totalorder %s2187_s2, %s1808_s15  ;;  %p1812_p5 = scmp.lt.u32.totalorder %s1808_s15, %s2187_s2 }
  0x4b   :  { %p1814_p6 = pnand %p1812_p5, %p1809_p4 }
  0x4d   :  { %1817 = shalt.err (!%p1814_p6)
}
  0x4e   :  { %s1818_s0 = scalar_lea.vmem %s47_s9, 256  ;;  %p1823_p8 = scmp.lt.s32.totalorder %s47_s9, %s47_s9 }
  0x4f   :  { %p1819_p7 = scmp.ne.s32.totalorder %s47_s9, %s1818_s0  ;;  %p1824_p9 = scmp.lt.s32.totalorder %s1818_s0, %s1818_s0 }
  0x51   :  { %p1825_p10 = por %p1824_p9, %p1823_p8 }
  0x53   :  { %p1826_p11 = pnand %p1825_p10, %p1819_p7 }
  0x55   :  { %1829 = shalt.err (!%p1826_p11)
}
  0x56   :  { %49 = dma.hbm_to_vmem [thread:$0]  %s2187_s2, 256, %s47_s9, [#allocation6]  }
  0x57   :  { %s1830_s23 = scalar_lea.hbm %s2189_s4, 40960 }
  0x58   :  { %p1831_p12 = scmp.ne.s32.totalorder %s2189_s4, %s1830_s23  ;;  %p1834_p13 = scmp.lt.u32.totalorder %s1830_s23, %s2189_s4 }
  0x5a   :  { %p1836_p0 = pnand %p1834_p13, %p1831_p12 }
  0x5c   :  { %1839 = shalt.err (!%p1836_p0)
}
  0x5d   :  { %s1840_s27 = scalar_lea.vmem %s2037_s12, 40960  ;;  %p1845_p2 = scmp.lt.s32.totalorder %s2037_s12, %s2037_s12 }
  0x5e   :  { %p1841_p1 = scmp.ne.s32.totalorder %s2037_s12, %s1840_s27  ;;  %p1846_p3 = scmp.lt.s32.totalorder %s1840_s27, %s1840_s27 }
  0x60   :  { %p1847_p4 = por %p1846_p3, %p1845_p2 }
  0x62   :  { %p1848_p5 = pnand %p1847_p4, %p1841_p1 }
  0x64   :  { %1851 = shalt.err (!%p1848_p5)
}
  0x65   :  { %71 = dma.hbm_to_vmem [thread:$0]  %s2189_s4, 40960, %s2037_s12, [#allocation9], %s1934_s30, %s1934_s30, %s1935_s18  }
  0x66   :  { %s1938_s28 = smov [#allocation13]   ;;  %s1852_s13 = scalar_lea.hbm %s2191_s6, 160 }
  0x67   :  { %s90_s29 = sshll.u32 %s1938_s28, 4  ;;  %p1853_p6 = scmp.ne.s32.totalorder %s2191_s6, %s1852_s13  ;;  %s91_s29 = int_to_ptr.vmem [resolvable:$true] %s90_s29 }
  0x68   :  { %p1856_p7 = scmp.lt.u32.totalorder %s1852_s13, %s2191_s6 }
  0x6a   :  { %p1858_p8 = pnand %p1856_p7, %p1853_p6 }
  0x6c   :  { %1861 = shalt.err (!%p1858_p8)
}
  0x6d   :  { %s1862_s3 = scalar_lea.vmem %s91_s29, 160  ;;  %p1867_p10 = scmp.lt.s32.totalorder %s91_s29, %s91_s29 }
  0x6e   :  { %p1863_p9 = scmp.ne.s32.totalorder %s91_s29, %s1862_s3  ;;  %p1868_p11 = scmp.lt.s32.totalorder %s1862_s3, %s1862_s3 }
  0x70   :  { %p1869_p12 = por %p1868_p11, %p1867_p10 }
  0x72   :  { %p1870_p13 = pnand %p1869_p12, %p1863_p9 }
  0x74   :  { %1873 = shalt.err (!%p1870_p13)
}
  0x75   :  { %93 = dma.hbm_to_vmem [thread:$0]  %s2191_s6, 160, %s91_s29, [#allocation12]  }
  0x76   :  { %1918 = dma.done.wait [#allocation3], 256  }
  0x77   :  { %1919 = vsyncadd [#allocation3], 4294967040 }
  0x78   :  { %1920 = dma.done.wait [#allocation6], 512  }
  0x79   :  { %1921 = vsyncadd [#allocation6], 4294966784 }
  0x7a   :  { %1922 = dma.done.wait [#allocation9], 41216  }
  0x7b   :  { %1923 = vsyncadd [#allocation9], 4294926080 }
  0x7c   :  { %1924 = dma.done.wait [#allocation12], 41120  }
  0x7d   :  { %1925 = vsyncadd [#allocation12], 4294926176  ;;  %v604_v0 = vld [vmem:[#allocation11 + $0x8] sm:$0xff]  ;;  %v614_v1 = vld [vmem:[#allocation11 + $0x58] sm:$0xff]  ;;  %s1939_s6 = smov [#allocation15]  }
  0x7e   :  { %v606_v2 = vld [vmem:[#allocation11 + $0x18] sm:$0xff]  ;;  %v924_v3 = vpack.c.bf16 %v614_v1, %v604_v0  ;;  %v616_v4 = vld [vmem:[#allocation11 + $0x68] sm:$0xff]  ;;  %v603_v5 = vld [vmem:[#allocation11] sm:$0xff]  ;;  %s1645_s18 = sshll.u32 %s1939_s6, 4  ;;  %s1646_s18 = int_to_ptr.vmem [resolvable:$true] %s1645_s18 }
  0x7f   :  { %v613_v6 = vld [vmem:[#allocation11 + $0x50] sm:$0xff]  ;;  %v926_v7 = vpack.c.bf16 %v616_v4, %v606_v2  ;;  %v615_v10 = vld [vmem:[#allocation11 + $0x60] sm:$0xff]  ;;  %v624_v11 = vld [vmem:[#allocation11 + $0xa8] sm:$0xff]  ;;  %s1874_s12 = scalar_lea.vmem %s1646_s18, 256  ;;  %p1879_p1 = scmp.lt.s32.totalorder %s1646_s18, %s1646_s18 }
  0x80   :  { %v923_v8 = vpack.c.bf16 %v613_v6, %v603_v5  ;;  %v605_v9 = vld [vmem:[#allocation11 + $0x10] sm:$0xff]  ;;  %1083 = vmatprep.subr.bf16.mxu0 %v924_v3  ;;  %v634_v13 = vld [vmem:[#allocation11 + $0xf8] sm:$0xff]  ;;  %v636_v15 = vld [vmem:[#allocation11 + $0x108] sm:$0xff]  ;;  %p1875_p0 = scmp.ne.s32.totalorder %s1646_s18, %s1874_s12  ;;  %p1880_p2 = scmp.lt.s32.totalorder %s1874_s12, %s1874_s12 }
  0x81   :  { %v925_v12 = vpack.c.bf16 %v615_v10, %v605_v9  ;;  %v626_v14 = vld [vmem:[#allocation11 + $0xb8] sm:$0xff]  ;;  %1124 = vmatprep.subr.bf16.mxu1 %v926_v7  ;;  %v934_v16 = vpack.c.bf16 %v634_v13, %v624_v11  ;;  %v623_v18 = vld [vmem:[#allocation11 + $0xa0] sm:$0xff]  ;;  %v633_v19 = vld [vmem:[#allocation11 + $0xf0] sm:$0xff] }
  0x82   :  { %1084 = vmatpush1.bf16.msra.mxu0 %v923_v8  ;;  %v936_v17 = vpack.c.bf16 %v636_v15, %v626_v14  ;;  %v625_v20 = vld [vmem:[#allocation11 + $0xb0] sm:$0xff]  ;;  %v933_v21 = vpack.c.bf16 %v633_v19, %v623_v18  ;;  %v635_v22 = vld [vmem:[#allocation11 + $0x100] sm:$0xff]  ;;  %v644_v23 = vld [vmem:[#allocation11 + $0x148] sm:$0xff]  ;;  %p1881_p3 = por %p1880_p2, %p1879_p1 }
  0x83   :  { %1125 = vmatpush1.bf16.msra.mxu1 %v925_v12  ;;  %v654_v24 = vld [vmem:[#allocation11 + $0x198] sm:$0xff]  ;;  %1085 = vmatprep.subr.bf16.mxu0 %v934_v16  ;;  %v935_v25 = vpack.c.bf16 %v635_v22, %v625_v20  ;;  %v656_v28 = vld [vmem:[#allocation11 + $0x1a8] sm:$0xff]  ;;  %v643_v29 = vld [vmem:[#allocation11 + $0x140] sm:$0xff] }
  0x84   :  { %1126 = vmatprep.subr.bf16.mxu1 %v936_v17  ;;  %v944_v26 = vpack.c.bf16 %v654_v24, %v644_v23  ;;  %v646_v27 = vld [vmem:[#allocation11 + $0x158] sm:$0xff]  ;;  %v653_v31 = vld [vmem:[#allocation11 + $0x190] sm:$0xff]  ;;  %v655_v33 = vld [vmem:[#allocation11 + $0x1a0] sm:$0xff]  ;;  %p1882_p4 = pnand %p1881_p3, %p1875_p0 }
  0x85   :  { %v946_v30 = vpack.c.bf16 %v656_v28, %v646_v27  ;;  %v645_v32 = vld [vmem:[#allocation11 + $0x150] sm:$0xff]  ;;  %v943_v34 = vpack.c.bf16 %v653_v31, %v643_v29  ;;  %v664_v35 = vld [vmem:[#allocation11 + $0x1e8] sm:$0xff]  ;;  %v674_v36 = vld [vmem:[#allocation11 + $0x238] sm:$0xff] }
  0x86   :  { %1086 = vmatpush1.bf16.msra.mxu0 %v933_v21  ;;  %v666_v37 = vld [vmem:[#allocation11 + $0x1f8] sm:$0xff]  ;;  %v945_v38 = vpack.c.bf16 %v655_v33, %v645_v32  ;;  %v954_v39 = vpack.c.bf16 %v674_v36, %v664_v35  ;;  %v676_v40 = vld [vmem:[#allocation11 + $0x248] sm:$0xff]  ;;  %v663_v41 = vld [vmem:[#allocation11 + $0x1e0] sm:$0xff] }
  0x87   :  { %1127 = vmatpush1.bf16.msra.mxu1 %v935_v25  ;;  %1087 = vmatprep.subr.bf16.mxu0 %v944_v26  ;;  %v673_v42 = vld [vmem:[#allocation11 + $0x230] sm:$0xff]  ;;  %v956_v43 = vpack.c.bf16 %v676_v40, %v666_v37  ;;  %v675_v45 = vld [vmem:[#allocation11 + $0x240] sm:$0xff]  ;;  %v684_v46 = vld [vmem:[#allocation11 + $0x288] sm:$0xff] }
  0x88   :  { %1128 = vmatprep.subr.bf16.mxu1 %v946_v30  ;;  %v665_v44 = vld [vmem:[#allocation11 + $0x1f0] sm:$0xff]  ;;  %v694_v47 = vld [vmem:[#allocation11 + $0x2d8] sm:$0xff]  ;;  %v696_v49 = vld [vmem:[#allocation11 + $0x2e8] sm:$0xff]  ;;  %v953_v50 = vpack.c.bf16 %v673_v42, %v663_v41 }
  0x89   :  { %v686_v48 = vld [vmem:[#allocation11 + $0x298] sm:$0xff]  ;;  %v955_v51 = vpack.c.bf16 %v675_v45, %v665_v44  ;;  %v964_v52 = vpack.c.bf16 %v694_v47, %v684_v46  ;;  %v683_v53 = vld [vmem:[#allocation11 + $0x280] sm:$0xff]  ;;  %v693_v54 = vld [vmem:[#allocation11 + $0x2d0] sm:$0xff] }
  0x8a   :  { %1088 = vmatpush1.bf16.msra.mxu0 %v943_v34  ;;  %v685_v55 = vld [vmem:[#allocation11 + $0x290] sm:$0xff]  ;;  %v966_v56 = vpack.c.bf16 %v696_v49, %v686_v48  ;;  %v695_v57 = vld [vmem:[#allocation11 + $0x2e0] sm:$0xff]  ;;  %v704_v58 = vld [vmem:[#allocation11 + $0x328] sm:$0xff]  ;;  %v963_v62 = vpack.c.bf16 %v693_v54, %v683_v53 }
  0x8b   :  { %1129 = vmatpush1.bf16.msra.mxu1 %v945_v38  ;;  %1089 = vmatprep.subr.bf16.mxu0 %v954_v39  ;;  %v714_v59 = vld [vmem:[#allocation11 + $0x378] sm:$0xff]  ;;  %v716_v61 = vld [vmem:[#allocation11 + $0x388] sm:$0xff]  ;;  %v965_v63 = vpack.c.bf16 %v695_v57, %v685_v55  ;;  %v703_v1 = vld [vmem:[#allocation11 + $0x320] sm:$0xff] }
  0x8c   :  { %1130 = vmatprep.subr.bf16.mxu1 %v956_v43  ;;  %v706_v60 = vld [vmem:[#allocation11 + $0x338] sm:$0xff]  ;;  %v974_v0 = vpack.c.bf16 %v714_v59, %v704_v58  ;;  %v713_v2 = vld [vmem:[#allocation11 + $0x370] sm:$0xff]  ;;  %v715_v5 = vld [vmem:[#allocation11 + $0x380] sm:$0xff] }
  0x8d   :  { %v705_v3 = vld [vmem:[#allocation11 + $0x330] sm:$0xff]  ;;  %v976_v4 = vpack.c.bf16 %v716_v61, %v706_v60  ;;  %v724_v6 = vld [vmem:[#allocation11 + $0x3c8] sm:$0xff]  ;;  %v734_v7 = vld [vmem:[#allocation11 + $0x418] sm:$0xff]  ;;  %v973_v10 = vpack.c.bf16 %v713_v2, %v703_v1 }
  0x8e   :  { %1090 = vmatpush1.bf16.msra.mxu0 %v953_v50  ;;  %v726_v8 = vld [vmem:[#allocation11 + $0x3d8] sm:$0xff]  ;;  %v736_v9 = vld [vmem:[#allocation11 + $0x428] sm:$0xff]  ;;  %v975_v11 = vpack.c.bf16 %v715_v5, %v705_v3  ;;  %v984_v12 = vpack.c.bf16 %v734_v7, %v724_v6  ;;  %v723_v13 = vld [vmem:[#allocation11 + $0x3c0] sm:$0xff] }
  0x8f   :  { %1131 = vmatpush1.bf16.msra.mxu1 %v955_v51  ;;  %1091 = vmatprep.subr.bf16.mxu0 %v964_v52  ;;  %v733_v14 = vld [vmem:[#allocation11 + $0x410] sm:$0xff]  ;;  %v986_v16 = vpack.c.bf16 %v736_v9, %v726_v8  ;;  %v735_v17 = vld [vmem:[#allocation11 + $0x420] sm:$0xff]  ;;  %v744_v18 = vld [vmem:[#allocation11 + $0x468] sm:$0xff] }
  0x90   :  { %1132 = vmatprep.subr.bf16.mxu1 %v966_v56  ;;  %v725_v15 = vld [vmem:[#allocation11 + $0x3d0] sm:$0xff]  ;;  %v754_v19 = vld [vmem:[#allocation11 + $0x4b8] sm:$0xff]  ;;  %v756_v21 = vld [vmem:[#allocation11 + $0x4c8] sm:$0xff]  ;;  %v983_v22 = vpack.c.bf16 %v733_v14, %v723_v13 }
  0x91   :  { %v746_v20 = vld [vmem:[#allocation11 + $0x478] sm:$0xff]  ;;  %v985_v23 = vpack.c.bf16 %v735_v17, %v725_v15  ;;  %v994_v24 = vpack.c.bf16 %v754_v19, %v744_v18  ;;  %v743_v25 = vld [vmem:[#allocation11 + $0x460] sm:$0xff]  ;;  %v753_v26 = vld [vmem:[#allocation11 + $0x4b0] sm:$0xff] }
  0x92   :  { %1092 = vmatpush1.bf16.msra.mxu0 %v963_v62  ;;  %v745_v27 = vld [vmem:[#allocation11 + $0x470] sm:$0xff]  ;;  %v996_v28 = vpack.c.bf16 %v756_v21, %v746_v20  ;;  %v755_v29 = vld [vmem:[#allocation11 + $0x4c0] sm:$0xff]  ;;  %v764_v30 = vld [vmem:[#allocation11 + $0x508] sm:$0xff]  ;;  %v993_v34 = vpack.c.bf16 %v753_v26, %v743_v25 }
  0x93   :  { %1133 = vmatpush1.bf16.msra.mxu1 %v965_v63  ;;  %1093 = vmatprep.subr.bf16.mxu0 %v974_v0  ;;  %v774_v31 = vld [vmem:[#allocation11 + $0x558] sm:$0xff]  ;;  %v776_v33 = vld [vmem:[#allocation11 + $0x568] sm:$0xff]  ;;  %v995_v35 = vpack.c.bf16 %v755_v29, %v745_v27  ;;  %v763_v37 = vld [vmem:[#allocation11 + $0x500] sm:$0xff] }
  0x94   :  { %1134 = vmatprep.subr.bf16.mxu1 %v976_v4  ;;  %v766_v32 = vld [vmem:[#allocation11 + $0x518] sm:$0xff]  ;;  %v1004_v36 = vpack.c.bf16 %v774_v31, %v764_v30  ;;  %v773_v38 = vld [vmem:[#allocation11 + $0x550] sm:$0xff]  ;;  %v775_v41 = vld [vmem:[#allocation11 + $0x560] sm:$0xff] }
  0x95   :  { %v765_v39 = vld [vmem:[#allocation11 + $0x510] sm:$0xff]  ;;  %v1006_v40 = vpack.c.bf16 %v776_v33, %v766_v32  ;;  %v784_v42 = vld [vmem:[#allocation11 + $0x5a8] sm:$0xff]  ;;  %v794_v43 = vld [vmem:[#allocation11 + $0x5f8] sm:$0xff]  ;;  %v1003_v46 = vpack.c.bf16 %v773_v38, %v763_v37 }
  0x96   :  { %1094 = vmatpush1.bf16.msra.mxu0 %v973_v10  ;;  %v786_v44 = vld [vmem:[#allocation11 + $0x5b8] sm:$0xff]  ;;  %v796_v45 = vld [vmem:[#allocation11 + $0x608] sm:$0xff]  ;;  %v1005_v47 = vpack.c.bf16 %v775_v41, %v765_v39  ;;  %v1014_v48 = vpack.c.bf16 %v794_v43, %v784_v42  ;;  %v783_v49 = vld [vmem:[#allocation11 + $0x5a0] sm:$0xff] }
  0x97   :  { %1135 = vmatpush1.bf16.msra.mxu1 %v975_v11  ;;  %1095 = vmatprep.subr.bf16.mxu0 %v984_v12  ;;  %v793_v50 = vld [vmem:[#allocation11 + $0x5f0] sm:$0xff]  ;;  %v1016_v52 = vpack.c.bf16 %v796_v45, %v786_v44  ;;  %v795_v53 = vld [vmem:[#allocation11 + $0x600] sm:$0xff]  ;;  %v804_v54 = vld [vmem:[#allocation11 + $0x648] sm:$0xff] }
  0x98   :  { %1136 = vmatprep.subr.bf16.mxu1 %v986_v16  ;;  %v785_v51 = vld [vmem:[#allocation11 + $0x5b0] sm:$0xff]  ;;  %v814_v55 = vld [vmem:[#allocation11 + $0x698] sm:$0xff]  ;;  %v816_v57 = vld [vmem:[#allocation11 + $0x6a8] sm:$0xff]  ;;  %v1013_v58 = vpack.c.bf16 %v793_v50, %v783_v49 }
  0x99   :  { %v806_v56 = vld [vmem:[#allocation11 + $0x658] sm:$0xff]  ;;  %v1015_v59 = vpack.c.bf16 %v795_v53, %v785_v51  ;;  %v1024_v60 = vpack.c.bf16 %v814_v55, %v804_v54  ;;  %v803_v61 = vld [vmem:[#allocation11 + $0x640] sm:$0xff]  ;;  %v813_v62 = vld [vmem:[#allocation11 + $0x690] sm:$0xff] }
  0x9a   :  { %1096 = vmatpush1.bf16.msra.mxu0 %v983_v22  ;;  %v805_v63 = vld [vmem:[#allocation11 + $0x650] sm:$0xff]  ;;  %v1026_v0 = vpack.c.bf16 %v816_v57, %v806_v56  ;;  %v815_v1 = vld [vmem:[#allocation11 + $0x6a0] sm:$0xff]  ;;  %v824_v2 = vld [vmem:[#allocation11 + $0x6e8] sm:$0xff]  ;;  %v1023_v6 = vpack.c.bf16 %v813_v62, %v803_v61 }
  0x9b   :  { %1137 = vmatpush1.bf16.msra.mxu1 %v985_v23  ;;  %1097 = vmatprep.subr.bf16.mxu0 %v994_v24  ;;  %v834_v3 = vld [vmem:[#allocation11 + $0x738] sm:$0xff]  ;;  %v836_v5 = vld [vmem:[#allocation11 + $0x748] sm:$0xff]  ;;  %v823_v7 = vld [vmem:[#allocation11 + $0x6e0] sm:$0xff]  ;;  %v1025_v8 = vpack.c.bf16 %v815_v1, %v805_v63 }
  0x9c   :  { %1138 = vmatprep.subr.bf16.mxu1 %v996_v28  ;;  %v826_v4 = vld [vmem:[#allocation11 + $0x6f8] sm:$0xff]  ;;  %v1034_v9 = vpack.c.bf16 %v834_v3, %v824_v2  ;;  %v833_v10 = vld [vmem:[#allocation11 + $0x730] sm:$0xff]  ;;  %v835_v12 = vld [vmem:[#allocation11 + $0x740] sm:$0xff] }
  0x9d   :  { %v825_v11 = vld [vmem:[#allocation11 + $0x6f0] sm:$0xff]  ;;  %v1036_v13 = vpack.c.bf16 %v836_v5, %v826_v4  ;;  %v844_v14 = vld [vmem:[#allocation11 + $0x788] sm:$0xff]  ;;  %v854_v15 = vld [vmem:[#allocation11 + $0x7d8] sm:$0xff]  ;;  %v1033_v20 = vpack.c.bf16 %v833_v10, %v823_v7 }
  0x9e   :  { %1098 = vmatpush1.bf16.msra.mxu0 %v993_v34  ;;  %v120_v16 = vld [vmem:[#allocation5 + $0x8] sm:$0xff]  ;;  %v856_v18 = vld [vmem:[#allocation11 + $0x7e8] sm:$0xff]  ;;  %v1035_v21 = vpack.c.bf16 %v835_v12, %v825_v11  ;;  %v1044_v22 = vpack.c.bf16 %v854_v15, %v844_v14  ;;  %v843_v23 = vld [vmem:[#allocation11 + $0x780] sm:$0xff] }
  0x9f   :  { %1139 = vmatpush1.bf16.msra.mxu1 %v995_v35  ;;  %1099 = vmatprep.subr.bf16.mxu0 %v1004_v36  ;;  %v846_v17 = vld [vmem:[#allocation11 + $0x798] sm:$0xff]  ;;  %v2083_v19 = vpack.c.bf16 %v120_v16, %v120_v16  ;;  %v853_v24 = vld [vmem:[#allocation11 + $0x7d0] sm:$0xff]  ;;  %v855_v27 = vld [vmem:[#allocation11 + $0x7e0] sm:$0xff] }
  0xa0   :  { %1140 = vmatprep.subr.bf16.mxu1 %v1006_v40  ;;  %v845_v25 = vld [vmem:[#allocation11 + $0x790] sm:$0xff]  ;;  %v1046_v26 = vpack.c.bf16 %v856_v18, %v846_v17  ;;  %v864_v28 = vld [vmem:[#allocation11 + $0x828] sm:$0xff]  ;;  %v874_v29 = vld [vmem:[#allocation11 + $0x878] sm:$0xff]  ;;  %v1043_v32 = vpack.c.bf16 %v853_v24, %v843_v23 }
  0xa1   :  { %1115 = vmatprep.mubr.bf16.mxu0 %v2083_v19  ;;  %v866_v30 = vld [vmem:[#allocation11 + $0x838] sm:$0xff]  ;;  %v876_v31 = vld [vmem:[#allocation11 + $0x888] sm:$0xff]  ;;  %1156 = vmatprep.mubr.bf16.mxu1 %v2083_v19  ;;  %v1045_v33 = vpack.c.bf16 %v855_v27, %v845_v25  ;;  %v1054_v34 = vpack.c.bf16 %v874_v29, %v864_v28  ;;  %v863_v35 = vld [vmem:[#allocation11 + $0x820] sm:$0xff] }
  0xa2   :  { %1100 = vmatpush1.bf16.msra.mxu0 %v1003_v46  ;;  %v873_v36 = vld [vmem:[#allocation11 + $0x870] sm:$0xff]  ;;  %v1056_v38 = vpack.c.bf16 %v876_v31, %v866_v30  ;;  %v875_v39 = vld [vmem:[#allocation11 + $0x880] sm:$0xff]  ;;  %v884_v40 = vld [vmem:[#allocation11 + $0x8c8] sm:$0xff] }
  0xa3   :  { %1141 = vmatpush1.bf16.msra.mxu1 %v1005_v47  ;;  %1101 = vmatprep.subr.bf16.mxu0 %v1014_v48  ;;  %v865_v37 = vld [vmem:[#allocation11 + $0x830] sm:$0xff]  ;;  %v894_v41 = vld [vmem:[#allocation11 + $0x918] sm:$0xff]  ;;  %v896_v43 = vld [vmem:[#allocation11 + $0x928] sm:$0xff]  ;;  %v1053_v44 = vpack.c.bf16 %v873_v36, %v863_v35 }
  0xa4   :  { %1142 = vmatprep.subr.bf16.mxu1 %v1016_v52  ;;  %v886_v42 = vld [vmem:[#allocation11 + $0x8d8] sm:$0xff]  ;;  %v1055_v45 = vpack.c.bf16 %v875_v39, %v865_v37  ;;  %v1064_v46 = vpack.c.bf16 %v894_v41, %v884_v40  ;;  %v883_v47 = vld [vmem:[#allocation11 + $0x8c0] sm:$0xff]  ;;  %v893_v48 = vld [vmem:[#allocation11 + $0x910] sm:$0xff] }
  0xa5   :  { %v885_v49 = vld [vmem:[#allocation11 + $0x8d0] sm:$0xff]  ;;  %v1066_v50 = vpack.c.bf16 %v896_v43, %v886_v42  ;;  %v895_v51 = vld [vmem:[#allocation11 + $0x920] sm:$0xff]  ;;  %v904_v52 = vld [vmem:[#allocation11 + $0x968] sm:$0xff]  ;;  %v1063_v56 = vpack.c.bf16 %v893_v48, %v883_v47 }
  0xa6   :  { %1102 = vmatpush1.bf16.msra.mxu0 %v1013_v58  ;;  %v914_v53 = vld [vmem:[#allocation11 + $0x9b8] sm:$0xff]  ;;  %v916_v55 = vld [vmem:[#allocation11 + $0x9c8] sm:$0xff]  ;;  %v1065_v57 = vpack.c.bf16 %v895_v51, %v885_v49  ;;  %v905_v61 = vld [vmem:[#allocation11 + $0x970] sm:$0xff] }
  0xa7   :  { %1143 = vmatpush1.bf16.msra.mxu1 %v1015_v59  ;;  %1103 = vmatprep.subr.bf16.mxu0 %v1024_v60  ;;  %v906_v54 = vld [vmem:[#allocation11 + $0x978] sm:$0xff]  ;;  %v1074_v58 = vpack.c.bf16 %v914_v53, %v904_v52  ;;  %v903_v59 = vld [vmem:[#allocation11 + $0x960] sm:$0xff]  ;;  %v913_v60 = vld [vmem:[#allocation11 + $0x9b0] sm:$0xff] }
  0xa8   :  { %1144 = vmatprep.subr.bf16.mxu1 %v1026_v0  ;;  %v1076_v62 = vpack.c.bf16 %v916_v55, %v906_v54  ;;  %v915_v63 = vld [vmem:[#allocation11 + $0x9c0] sm:$0xff]  ;;  %v608_v0 = vld [vmem:[#allocation11 + $0x28] sm:$0xff]  ;;  %v618_v1 = vld [vmem:[#allocation11 + $0x78] sm:$0xff]  ;;  %v1073_v4 = vpack.c.bf16 %v913_v60, %v903_v59 }
  0xa9   :  { %v610_v2 = vld [vmem:[#allocation11 + $0x38] sm:$0xff]  ;;  %v620_v3 = vld [vmem:[#allocation11 + $0x88] sm:$0xff]  ;;  %v119_v5 = vld [vmem:[#allocation5] sm:$0xff]  ;;  %v928_v7 = vpack.c.bf16 %v618_v1, %v608_v0 }
  0xaa   :  { %1104 = vmatpush1.bf16.msra.mxu0 %v1023_v6  ;;  %v1075_v6 = vpack.c.bf16 %v915_v63, %v905_v61  ;;  %v609_v10 = vld [vmem:[#allocation11 + $0x30] sm:$0xff]  ;;  %v930_v11 = vpack.c.bf16 %v620_v3, %v610_v2  ;;  %v619_v12 = vld [vmem:[#allocation11 + $0x80] sm:$0xff]  ;;  %v638_v14 = vld [vmem:[#allocation11 + $0x118] sm:$0xff]  ;;  %v2087_v15 = vpack.c.bf16 %v119_v5, %v119_v5 }
  0xab   :  { %1145 = vmatpush1.bf16.msra.mxu1 %v1025_v8  ;;  %1105 = vmatprep.subr.bf16.mxu0 %v1034_v9  ;;  %v607_v8 = vld [vmem:[#allocation11 + $0x20] sm:$0xff]  ;;  %v617_v9 = vld [vmem:[#allocation11 + $0x70] sm:$0xff]  ;;  %v630_v16 = vld [vmem:[#allocation11 + $0xd8] sm:$0xff] }
  0xac   :  { %1146 = vmatprep.subr.bf16.mxu1 %v1036_v13  ;;  %v628_v13 = vld [vmem:[#allocation11 + $0xc8] sm:$0xff]  ;;  %v927_v18 = vpack.c.bf16 %v617_v9, %v607_v8  ;;  %v637_v23 = vld [vmem:[#allocation11 + $0x110] sm:$0xff]  ;;  %v658_v28 = vld [vmem:[#allocation11 + $0x1b8] sm:$0xff] }
  0xad   :  { %v640_v17 = vld [vmem:[#allocation11 + $0x128] sm:$0xff]  ;;  %v629_v24 = vld [vmem:[#allocation11 + $0xd0] sm:$0xff]  ;;  %v650_v29 = vld [vmem:[#allocation11 + $0x178] sm:$0xff] }
  0xae   :  { %1106 = vmatpush1.bf16.msra.mxu0 %v1033_v20  ;;  %v929_v20 = vpack.c.bf16 %v619_v12, %v609_v10  ;;  %v940_v25 = vpack.c.bf16 %v640_v17, %v630_v16  ;;  %v648_v27 = vld [vmem:[#allocation11 + $0x168] sm:$0xff]  ;;  %v657_v35 = vld [vmem:[#allocation11 + $0x1b0] sm:$0xff]  ;;  %v678_v40 = vld [vmem:[#allocation11 + $0x258] sm:$0xff] }
  0xaf   :  { %1147 = vmatpush1.bf16.msra.mxu1 %v1035_v21  ;;  %1107 = vmatprep.subr.bf16.mxu0 %v1044_v22  ;;  %v938_v21 = vpack.c.bf16 %v638_v14, %v628_v13  ;;  %v627_v22 = vld [vmem:[#allocation11 + $0xc0] sm:$0xff]  ;;  %v660_v30 = vld [vmem:[#allocation11 + $0x1c8] sm:$0xff]  ;;  %v649_v36 = vld [vmem:[#allocation11 + $0x170] sm:$0xff] }
  0xb0   :  { %1148 = vmatprep.subr.bf16.mxu1 %v1046_v26  ;;  %v639_v26 = vld [vmem:[#allocation11 + $0x120] sm:$0xff]  ;;  %v937_v31 = vpack.c.bf16 %v637_v23, %v627_v22  ;;  %v950_v37 = vpack.c.bf16 %v660_v30, %v650_v29  ;;  %v668_v39 = vld [vmem:[#allocation11 + $0x208] sm:$0xff]  ;;  %v670_v41 = vld [vmem:[#allocation11 + $0x218] sm:$0xff] }
  0xb1   :  { %v680_v42 = vld [vmem:[#allocation11 + $0x268] sm:$0xff]  ;;  %v677_v47 = vld [vmem:[#allocation11 + $0x250] sm:$0xff]  ;;  %v698_v52 = vld [vmem:[#allocation11 + $0x2f8] sm:$0xff] }
  0xb2   :  { %1108 = vmatpush1.bf16.msra.mxu0 %v1043_v32  ;;  %v939_v32 = vpack.c.bf16 %v639_v26, %v629_v24  ;;  %v669_v48 = vld [vmem:[#allocation11 + $0x210] sm:$0xff]  ;;  %v960_v49 = vpack.c.bf16 %v680_v42, %v670_v41  ;;  %v688_v51 = vld [vmem:[#allocation11 + $0x2a8] sm:$0xff]  ;;  %v690_v53 = vld [vmem:[#allocation11 + $0x2b8] sm:$0xff] }
  0xb3   :  { %1149 = vmatpush1.bf16.msra.mxu1 %v1045_v33  ;;  %1109 = vmatprep.subr.bf16.mxu0 %v1054_v34  ;;  %v948_v33 = vpack.c.bf16 %v658_v28, %v648_v27  ;;  %v647_v34 = vld [vmem:[#allocation11 + $0x160] sm:$0xff]  ;;  %v700_v54 = vld [vmem:[#allocation11 + $0x308] sm:$0xff]  ;;  %v697_v59 = vld [vmem:[#allocation11 + $0x2f0] sm:$0xff] }
  0xb4   :  { %1150 = vmatprep.subr.bf16.mxu1 %v1056_v38  ;;  %v659_v38 = vld [vmem:[#allocation11 + $0x1c0] sm:$0xff]  ;;  %v947_v43 = vpack.c.bf16 %v657_v35, %v647_v34  ;;  %v689_v60 = vld [vmem:[#allocation11 + $0x2b0] sm:$0xff]  ;;  %v970_v61 = vpack.c.bf16 %v700_v54, %v690_v53  ;;  %v708_v63 = vld [vmem:[#allocation11 + $0x348] sm:$0xff] }
  0xb5   :  { %v718_v0 = vld [vmem:[#allocation11 + $0x398] sm:$0xff]  ;;  %v720_v2 = vld [vmem:[#allocation11 + $0x3a8] sm:$0xff]  ;;  %v709_v8 = vld [vmem:[#allocation11 + $0x350] sm:$0xff] }
  0xb6   :  { %1110 = vmatpush1.bf16.msra.mxu0 %v1053_v44  ;;  %v949_v44 = vpack.c.bf16 %v659_v38, %v649_v36  ;;  %v710_v1 = vld [vmem:[#allocation11 + $0x358] sm:$0xff]  ;;  %v978_v5 = vpack.c.bf16 %v718_v0, %v708_v63  ;;  %v719_v10 = vld [vmem:[#allocation11 + $0x3a0] sm:$0xff]  ;;  %v740_v14 = vld [vmem:[#allocation11 + $0x448] sm:$0xff] }
  0xb7   :  { %1151 = vmatpush1.bf16.msra.mxu1 %v1055_v45  ;;  %1111 = vmatprep.subr.bf16.mxu0 %v1064_v46  ;;  %v958_v45 = vpack.c.bf16 %v678_v40, %v668_v39  ;;  %v667_v46 = vld [vmem:[#allocation11 + $0x200] sm:$0xff]  ;;  %v980_v9 = vpack.c.bf16 %v720_v2, %v710_v1  ;;  %v738_v12 = vld [vmem:[#allocation11 + $0x438] sm:$0xff]  ;;  %v979_v17 = vpack.c.bf16 %v719_v10, %v709_v8  ;;  %v729_v22 = vld [vmem:[#allocation11 + $0x3f0] sm:$0xff] }
  0xb8   :  { %1152 = vmatprep.subr.bf16.mxu1 %v1066_v50  ;;  %v679_v50 = vld [vmem:[#allocation11 + $0x260] sm:$0xff]  ;;  %v957_v55 = vpack.c.bf16 %v677_v47, %v667_v46  ;;  %v730_v13 = vld [vmem:[#allocation11 + $0x3f8] sm:$0xff]  ;;  %v760_v28 = vld [vmem:[#allocation11 + $0x4e8] sm:$0xff] }
  0xb9   :  { %v990_v23 = vpack.c.bf16 %v740_v14, %v730_v13  ;;  %v739_v24 = vld [vmem:[#allocation11 + $0x440] sm:$0xff]  ;;  %v758_v26 = vld [vmem:[#allocation11 + $0x4d8] sm:$0xff]  ;;  %v749_v34 = vld [vmem:[#allocation11 + $0x490] sm:$0xff] }
  0xba   :  { %1112 = vmatpush1.bf16.msra.mxu0 %v1063_v56  ;;  %v959_v56 = vpack.c.bf16 %v679_v50, %v669_v48  ;;  %v750_v27 = vld [vmem:[#allocation11 + $0x498] sm:$0xff]  ;;  %v989_v30 = vpack.c.bf16 %v739_v24, %v729_v22  ;;  %v759_v36 = vld [vmem:[#allocation11 + $0x4e0] sm:$0xff]  ;;  %v780_v40 = vld [vmem:[#allocation11 + $0x588] sm:$0xff] }
  0xbb   :  { %1153 = vmatpush1.bf16.msra.mxu1 %v1065_v57  ;;  %1113 = vmatprep.subr.bf16.mxu0 %v1074_v58  ;;  %v968_v57 = vpack.c.bf16 %v698_v52, %v688_v51  ;;  %v687_v58 = vld [vmem:[#allocation11 + $0x2a0] sm:$0xff]  ;;  %v1000_v35 = vpack.c.bf16 %v760_v28, %v750_v27  ;;  %v778_v38 = vld [vmem:[#allocation11 + $0x578] sm:$0xff]  ;;  %v999_v42 = vpack.c.bf16 %v759_v36, %v749_v34  ;;  %v769_v46 = vld [vmem:[#allocation11 + $0x530] sm:$0xff] }
  0xbc   :  { %1154 = vmatprep.subr.bf16.mxu1 %v1076_v62  ;;  %v699_v62 = vld [vmem:[#allocation11 + $0x300] sm:$0xff]  ;;  %v967_v3 = vpack.c.bf16 %v697_v59, %v687_v58  ;;  %v770_v39 = vld [vmem:[#allocation11 + $0x538] sm:$0xff]  ;;  %v800_v52 = vld [vmem:[#allocation11 + $0x628] sm:$0xff] }
  0xbd   :  { %v1010_v47 = vpack.c.bf16 %v780_v40, %v770_v39  ;;  %v779_v48 = vld [vmem:[#allocation11 + $0x580] sm:$0xff]  ;;  %v798_v50 = vld [vmem:[#allocation11 + $0x618] sm:$0xff]  ;;  %v789_v58 = vld [vmem:[#allocation11 + $0x5d0] sm:$0xff] }
  0xbe   :  { %1114 = vmatpush1.bf16.msra.mxu0 %v1073_v4  ;;  %v969_v4 = vpack.c.bf16 %v699_v62, %v689_v60  ;;  %v790_v51 = vld [vmem:[#allocation11 + $0x5d8] sm:$0xff]  ;;  %v1009_v54 = vpack.c.bf16 %v779_v48, %v769_v46  ;;  %v799_v60 = vld [vmem:[#allocation11 + $0x620] sm:$0xff]  ;;  %v820_v0 = vld [vmem:[#allocation11 + $0x6c8] sm:$0xff] }
  0xbf   :  { %1155 = vmatpush1.bf16.msra.mxu1 %v1075_v6  ;;  %1165 = vmatprep.subr.bf16.mxu0 %v928_v7  ;;  %v707_v6 = vld [vmem:[#allocation11 + $0x340] sm:$0xff]  ;;  %v717_v7 = vld [vmem:[#allocation11 + $0x390] sm:$0xff]  ;;  %v1020_v59 = vpack.c.bf16 %v800_v52, %v790_v51  ;;  %v818_v62 = vld [vmem:[#allocation11 + $0x6b8] sm:$0xff]  ;;  %v1019_v2 = vpack.c.bf16 %v799_v60, %v789_v58 }
  0xc0   :  { %1206 = vmatprep.subr.bf16.mxu1 %v930_v11  ;;  %v728_v11 = vld [vmem:[#allocation11 + $0x3e8] sm:$0xff]  ;;  %v977_v16 = vpack.c.bf16 %v717_v7, %v707_v6  ;;  %v810_v63 = vld [vmem:[#allocation11 + $0x678] sm:$0xff]  ;;  %v809_v6 = vld [vmem:[#allocation11 + $0x670] sm:$0xff] }
  0xc1   :  { %1116 = vmatmul.mubr.bf16.vlgmr.msra.gmra.mrb[0].mxu0 %v2087_v15  ;;  %v1030_v7 = vpack.c.bf16 %v820_v0, %v810_v63  ;;  %v819_v8 = vld [vmem:[#allocation11 + $0x6c0] sm:$0xff]  ;;  %v838_v10 = vld [vmem:[#allocation11 + $0x758] sm:$0xff] }
  0xc2   :  { %1157 = vmatmul.mubr.bf16.vlgmr.msra.gmra.mrb[0].mxu1 %v2087_v15  ;;  %1166 = vmatpush1.bf16.msra.mxu0 %v927_v18  ;;  %v988_v18 = vpack.c.bf16 %v738_v12, %v728_v11  ;;  %v830_v11 = vld [vmem:[#allocation11 + $0x718] sm:$0xff]  ;;  %v840_v12 = vld [vmem:[#allocation11 + $0x768] sm:$0xff]  ;;  %v1029_v14 = vpack.c.bf16 %v819_v8, %v809_v6  ;;  %v839_v22 = vld [vmem:[#allocation11 + $0x760] sm:$0xff] }
  0xc3   :  { %1207 = vmatpush1.bf16.msra.mxu1 %v929_v20  ;;  %1167 = vmatprep.subr.bf16.mxu0 %v938_v21  ;;  %v727_v20 = vld [vmem:[#allocation11 + $0x3e0] sm:$0xff]  ;;  %v737_v21 = vld [vmem:[#allocation11 + $0x430] sm:$0xff]  ;;  %v858_v24 = vld [vmem:[#allocation11 + $0x7f8] sm:$0xff] }
  0xc4   :  { %1208 = vmatprep.subr.bf16.mxu1 %v940_v25  ;;  %1197 = vmatprep.mubr.bf16.mxu0 %v2083_v19  ;;  %v748_v25 = vld [vmem:[#allocation11 + $0x488] sm:$0xff]  ;;  %v987_v29 = vpack.c.bf16 %v737_v21, %v727_v20  ;;  %v829_v20 = vld [vmem:[#allocation11 + $0x710] sm:$0xff]  ;;  %v1040_v21 = vpack.c.bf16 %v840_v12, %v830_v11  ;;  %v859_v34 = vld [vmem:[#allocation11 + $0x800] sm:$0xff] }
  0xc5   :  { %1238 = vmatprep.mubr.bf16.mxu1 %v2083_v19  ;;  %v1039_v28 = vpack.c.bf16 %v839_v22, %v829_v20  ;;  %v878_v36 = vld [vmem:[#allocation11 + $0x898] sm:$0xff]  ;;  %v879_v46 = vld [vmem:[#allocation11 + $0x8a0] sm:$0xff]  ;;  %v133_v20 = vld [vmem:[#allocation10 + $0x50] sm:$0xff] }
  0xc6   :  { %1168 = vmatpush1.bf16.msra.mxu0 %v937_v31  ;;  %v998_v31 = vpack.c.bf16 %v758_v26, %v748_v25  ;;  %v850_v25 = vld [vmem:[#allocation11 + $0x7b8] sm:$0xff]  ;;  %v860_v26 = vld [vmem:[#allocation11 + $0x808] sm:$0xff]  ;;  %v899_v58 = vld [vmem:[#allocation11 + $0x940] sm:$0xff] }
  0xc7   :  { %1209 = vmatpush1.bf16.msra.mxu1 %v939_v32  ;;  %1169 = vmatprep.subr.bf16.mxu0 %v948_v33  ;;  %v747_v32 = vld [vmem:[#allocation11 + $0x480] sm:$0xff]  ;;  %v757_v33 = vld [vmem:[#allocation11 + $0x4d0] sm:$0xff]  ;;  %v898_v48 = vld [vmem:[#allocation11 + $0x938] sm:$0xff] }
  0xc8   :  { %1210 = vmatprep.subr.bf16.mxu1 %v950_v37  ;;  %v768_v37 = vld [vmem:[#allocation11 + $0x528] sm:$0xff]  ;;  %v997_v41 = vpack.c.bf16 %v757_v33, %v747_v32  ;;  %v849_v32 = vld [vmem:[#allocation11 + $0x7b0] sm:$0xff]  ;;  %v1050_v33 = vpack.c.bf16 %v860_v26, %v850_v25  ;;  %v918_v60 = vld [vmem:[#allocation11 + $0x9d8] sm:$0xff] }
  0xc9   :  { %v1049_v40 = vpack.c.bf16 %v859_v34, %v849_v32  ;;  %v919_v6 = vld [vmem:[#allocation11 + $0x9e0] sm:$0xff]  ;;  %v622_v8 = vld [vmem:[#allocation11 + $0x98] sm:$0xff]  ;;  %v116_v26 = vld [vmem:[#allocation2 + $0x8] sm:$0xff] }
  0xca   :  { %1170 = vmatpush1.bf16.msra.mxu0 %v947_v43  ;;  %v1008_v43 = vpack.c.bf16 %v778_v38, %v768_v37  ;;  %v870_v37 = vld [vmem:[#allocation11 + $0x858] sm:$0xff]  ;;  %v880_v38 = vld [vmem:[#allocation11 + $0x8a8] sm:$0xff] }
  0xcb   :  { %1211 = vmatpush1.bf16.msra.mxu1 %v949_v44  ;;  %1171 = vmatprep.subr.bf16.mxu0 %v958_v45  ;;  %v767_v44 = vld [vmem:[#allocation11 + $0x520] sm:$0xff]  ;;  %v777_v45 = vld [vmem:[#allocation11 + $0x570] sm:$0xff]  ;;  %v642_v22 = vld [vmem:[#allocation11 + $0x138] sm:$0xff] }
  0xcc   :  { %1212 = vmatprep.subr.bf16.mxu1 %v960_v49  ;;  %v788_v49 = vld [vmem:[#allocation11 + $0x5c8] sm:$0xff]  ;;  %v1007_v53 = vpack.c.bf16 %v777_v45, %v767_v44  ;;  %v869_v44 = vld [vmem:[#allocation11 + $0x850] sm:$0xff]  ;;  %v1060_v45 = vpack.c.bf16 %v880_v38, %v870_v37  ;;  %v174_v37 = vld [vmem:[#allocation10 + $0x198] sm:$0xff]  ;;  %v2094_v38 = vpack.c.bf16 %v116_v26, %v116_v26 }
  0xcd   :  { %v1059_v52 = vpack.c.bf16 %v879_v46, %v869_v44  ;;  %v652_v34 = vld [vmem:[#allocation11 + $0x188] sm:$0xff]  ;;  %v163_v44 = vld [vmem:[#allocation10 + $0x140] sm:$0xff]  ;;  %v173_v46 = vld [vmem:[#allocation10 + $0x190] sm:$0xff] }
  0xce   :  { %1172 = vmatpush1.bf16.msra.mxu0 %v957_v55  ;;  %v1018_v55 = vpack.c.bf16 %v798_v50, %v788_v49  ;;  %v890_v49 = vld [vmem:[#allocation11 + $0x8f8] sm:$0xff]  ;;  %v900_v50 = vld [vmem:[#allocation11 + $0x948] sm:$0xff] }
  0xcf   :  { %1213 = vmatpush1.bf16.msra.mxu1 %v959_v56  ;;  %1173 = vmatprep.subr.bf16.mxu0 %v968_v57  ;;  %v787_v56 = vld [vmem:[#allocation11 + $0x5c0] sm:$0xff]  ;;  %v797_v57 = vld [vmem:[#allocation11 + $0x610] sm:$0xff] }
  0xd0   :  { %1214 = vmatprep.subr.bf16.mxu1 %v970_v61  ;;  %v808_v61 = vld [vmem:[#allocation11 + $0x668] sm:$0xff]  ;;  %v1017_v1 = vpack.c.bf16 %v797_v57, %v787_v56  ;;  %v889_v56 = vld [vmem:[#allocation11 + $0x8f0] sm:$0xff]  ;;  %v1070_v57 = vpack.c.bf16 %v900_v50, %v890_v49  ;;  %v194_v50 = vld [vmem:[#allocation10 + $0x238] sm:$0xff] }
  0xd1   :  { %v1069_v0 = vpack.c.bf16 %v899_v58, %v889_v56  ;;  %v184_v49 = vld [vmem:[#allocation10 + $0x1e8] sm:$0xff]  ;;  %v183_v56 = vld [vmem:[#allocation10 + $0x1e0] sm:$0xff]  ;;  %v193_v58 = vld [vmem:[#allocation10 + $0x230] sm:$0xff] }
  0xd2   :  { %1174 = vmatpush1.bf16.msra.mxu0 %v967_v3  ;;  %v1028_v3 = vpack.c.bf16 %v818_v62, %v808_v61  ;;  %v910_v61 = vld [vmem:[#allocation11 + $0x998] sm:$0xff]  ;;  %v920_v62 = vld [vmem:[#allocation11 + $0x9e8] sm:$0xff] }
  0xd3   :  { %1215 = vmatpush1.bf16.msra.mxu1 %v969_v4  ;;  %1175 = vmatprep.subr.bf16.mxu0 %v978_v5  ;;  %v807_v4 = vld [vmem:[#allocation11 + $0x660] sm:$0xff]  ;;  %v817_v5 = vld [vmem:[#allocation11 + $0x6b0] sm:$0xff] }
  0xd4   :  { %1216 = vmatprep.subr.bf16.mxu1 %v980_v9  ;;  %v828_v9 = vld [vmem:[#allocation11 + $0x708] sm:$0xff]  ;;  %v1027_v13 = vpack.c.bf16 %v817_v5, %v807_v4  ;;  %v909_v4 = vld [vmem:[#allocation11 + $0x990] sm:$0xff]  ;;  %v1080_v5 = vpack.c.bf16 %v920_v62, %v910_v61 }
  0xd5   :  { %v1079_v12 = vpack.c.bf16 %v919_v6, %v909_v4  ;;  %v204_v61 = vld [vmem:[#allocation10 + $0x288] sm:$0xff] }
  0xd6   :  { %1176 = vmatpush1.bf16.msra.mxu0 %v977_v16  ;;  %v1038_v16 = vpack.c.bf16 %v838_v10, %v828_v9  ;;  %v124_v9 = vld [vmem:[#allocation10 + $0x8] sm:$0xff]  ;;  %v134_v10 = vld [vmem:[#allocation10 + $0x58] sm:$0xff] }
  0xd7   :  { %1217 = vmatpush1.bf16.msra.mxu1 %v979_v17  ;;  %1177 = vmatprep.subr.bf16.mxu0 %v988_v18  ;;  %v827_v17 = vld [vmem:[#allocation11 + $0x700] sm:$0xff]  ;;  %v837_v18 = vld [vmem:[#allocation11 + $0x750] sm:$0xff]  ;;  %v712_v6 = vld [vmem:[#allocation11 + $0x368] sm:$0xff] }
  0xd8   :  { %1218 = vmatprep.subr.bf16.mxu1 %v990_v23  ;;  %v848_v23 = vld [vmem:[#allocation11 + $0x7a8] sm:$0xff]  ;;  %v1037_v27 = vpack.c.bf16 %v837_v18, %v827_v17  ;;  %v123_v17 = vld [vmem:[#allocation10] sm:$0xff]  ;;  %v444_v18 = vpack.c.bf16 %v134_v10, %v124_v9  ;;  %v234_v9 = vld [vmem:[#allocation10 + $0x378] sm:$0xff] }
  0xda   :  { %1178 = vmatpush1.bf16.msra.mxu0 %v987_v29  ;;  %v1048_v29 = vpack.c.bf16 %v858_v24, %v848_v23  ;;  %v144_v23 = vld [vmem:[#allocation10 + $0xa8] sm:$0xff]  ;;  %v154_v24 = vld [vmem:[#allocation10 + $0xf8] sm:$0xff] }
  0xdb   :  { %1219 = vmatpush1.bf16.msra.mxu1 %v989_v30  ;;  %1179 = vmatprep.subr.bf16.mxu0 %v998_v31  ;;  %v847_v30 = vld [vmem:[#allocation11 + $0x7a0] sm:$0xff]  ;;  %v857_v31 = vld [vmem:[#allocation11 + $0x7f0] sm:$0xff]  ;;  %v454_v32 = vpack.c.bf16 %v154_v24, %v144_v23  ;;  %v254_v23 = vld [vmem:[#allocation10 + $0x418] sm:$0xff] }
  0xdc   :  { %1220 = vmatprep.subr.bf16.mxu1 %v1000_v35  ;;  %v868_v35 = vld [vmem:[#allocation11 + $0x848] sm:$0xff]  ;;  %v1047_v39 = vpack.c.bf16 %v857_v31, %v847_v30  ;;  %v641_v30 = vld [vmem:[#allocation11 + $0x130] sm:$0xff]  ;;  %v143_v31 = vld [vmem:[#allocation10 + $0xa0] sm:$0xff] }
  0xde   :  { %1180 = vmatpush1.bf16.msra.mxu0 %v997_v41  ;;  %v1058_v41 = vpack.c.bf16 %v878_v36, %v868_v35  ;;  %v662_v35 = vld [vmem:[#allocation11 + $0x1d8] sm:$0xff]  ;;  %v164_v36 = vld [vmem:[#allocation10 + $0x148] sm:$0xff] }
  0xdf   :  { %1221 = vmatpush1.bf16.msra.mxu1 %v999_v42  ;;  %1181 = vmatprep.subr.bf16.mxu0 %v1008_v43  ;;  %v867_v42 = vld [vmem:[#allocation11 + $0x840] sm:$0xff]  ;;  %v877_v43 = vld [vmem:[#allocation11 + $0x890] sm:$0xff] }
  0xe0   :  { %1222 = vmatprep.subr.bf16.mxu1 %v1010_v47  ;;  %v888_v47 = vld [vmem:[#allocation11 + $0x8e8] sm:$0xff]  ;;  %v1057_v51 = vpack.c.bf16 %v877_v43, %v867_v42  ;;  %v651_v42 = vld [vmem:[#allocation11 + $0x180] sm:$0xff]  ;;  %v661_v43 = vld [vmem:[#allocation11 + $0x1d0] sm:$0xff] }
  0xe2   :  { %1182 = vmatpush1.bf16.msra.mxu0 %v1007_v53  ;;  %v1068_v53 = vpack.c.bf16 %v898_v48, %v888_v47  ;;  %v672_v47 = vld [vmem:[#allocation11 + $0x228] sm:$0xff]  ;;  %v682_v48 = vld [vmem:[#allocation11 + $0x278] sm:$0xff] }
  0xe3   :  { %1223 = vmatpush1.bf16.msra.mxu1 %v1009_v54  ;;  %1183 = vmatprep.subr.bf16.mxu0 %v1018_v55  ;;  %v887_v54 = vld [vmem:[#allocation11 + $0x8e0] sm:$0xff]  ;;  %v897_v55 = vld [vmem:[#allocation11 + $0x930] sm:$0xff] }
  0xe4   :  { %1224 = vmatprep.subr.bf16.mxu1 %v1020_v59  ;;  %v908_v59 = vld [vmem:[#allocation11 + $0x988] sm:$0xff]  ;;  %v1067_v63 = vpack.c.bf16 %v897_v55, %v887_v54  ;;  %v671_v54 = vld [vmem:[#allocation11 + $0x220] sm:$0xff]  ;;  %v681_v55 = vld [vmem:[#allocation11 + $0x270] sm:$0xff] }
  0xe5   :  { %v961_v62 = vpack.c.bf16 %v681_v55, %v671_v54  ;;  %v283_v54 = vld [vmem:[#allocation10 + $0x500] sm:$0xff] }
  0xe6   :  { %1184 = vmatpush1.bf16.msra.mxu0 %v1017_v1  ;;  %v1078_v1 = vpack.c.bf16 %v918_v60, %v908_v59  ;;  %v692_v59 = vld [vmem:[#allocation11 + $0x2c8] sm:$0xff]  ;;  %v702_v60 = vld [vmem:[#allocation11 + $0x318] sm:$0xff] }
  0xe7   :  { %1225 = vmatpush1.bf16.msra.mxu1 %v1019_v2  ;;  %1185 = vmatprep.subr.bf16.mxu0 %v1028_v3  ;;  %v907_v2 = vld [vmem:[#allocation11 + $0x980] sm:$0xff]  ;;  %v917_v3 = vld [vmem:[#allocation11 + $0x9d0] sm:$0xff] }
  0xe8   :  { %1226 = vmatprep.subr.bf16.mxu1 %v1030_v7  ;;  %v612_v7 = vld [vmem:[#allocation11 + $0x48] sm:$0xff]  ;;  %v1077_v11 = vpack.c.bf16 %v917_v3, %v907_v2  ;;  %v701_v2 = vld [vmem:[#allocation11 + $0x310] sm:$0xff]  ;;  %v203_v3 = vld [vmem:[#allocation10 + $0x280] sm:$0xff] }
  0xea   :  { %1186 = vmatpush1.bf16.msra.mxu0 %v1027_v13  ;;  %v932_v13 = vpack.c.bf16 %v622_v8, %v612_v7  ;;  %v722_v7 = vld [vmem:[#allocation11 + $0x3b8] sm:$0xff]  ;;  %v224_v8 = vld [vmem:[#allocation10 + $0x328] sm:$0xff] }
  0xeb   :  { %1227 = vmatpush1.bf16.msra.mxu1 %v1029_v14  ;;  %1187 = vmatprep.subr.bf16.mxu0 %v1038_v16  ;;  %v611_v14 = vld [vmem:[#allocation11 + $0x40] sm:$0xff]  ;;  %v621_v16 = vld [vmem:[#allocation11 + $0x90] sm:$0xff] }
  0xec   :  { %1228 = vmatprep.subr.bf16.mxu1 %v1040_v21  ;;  %v632_v21 = vld [vmem:[#allocation11 + $0xe8] sm:$0xff]  ;;  %v931_v25 = vpack.c.bf16 %v621_v16, %v611_v14  ;;  %v721_v14 = vld [vmem:[#allocation11 + $0x3b0] sm:$0xff]  ;;  %v223_v16 = vld [vmem:[#allocation10 + $0x320] sm:$0xff] }
  0xee   :  { %1188 = vmatpush1.bf16.msra.mxu0 %v1037_v27  ;;  %v443_v27 = vpack.c.bf16 %v133_v20, %v123_v17  ;;  %v494_v17 = vpack.c.bf16 %v234_v9, %v224_v8  ;;  %v732_v20 = vld [vmem:[#allocation11 + $0x408] sm:$0xff] }
  0xef   :  { %1229 = vmatpush1.bf16.msra.mxu1 %v1039_v28  ;;  %1189 = vmatprep.subr.bf16.mxu0 %v1048_v29  ;;  %v942_v28 = vpack.c.bf16 %v642_v22, %v632_v21  ;;  %v631_v29 = vld [vmem:[#allocation11 + $0xe0] sm:$0xff]  ;;  %v742_v21 = vld [vmem:[#allocation11 + $0x458] sm:$0xff]  ;;  %v244_v22 = vld [vmem:[#allocation10 + $0x3c8] sm:$0xff] }
  0xf0   :  { %1230 = vmatprep.subr.bf16.mxu1 %v1050_v33  ;;  %v153_v33 = vld [vmem:[#allocation10 + $0xf0] sm:$0xff]  ;;  %v992_v26 = vpack.c.bf16 %v742_v21, %v732_v20  ;;  %v344_v20 = vld [vmem:[#allocation10 + $0x6e8] sm:$0xff]  ;;  %v354_v21 = vld [vmem:[#allocation10 + $0x738] sm:$0xff] }
  0xf2   :  { %1190 = vmatpush1.bf16.msra.mxu0 %v1047_v39  ;;  %v941_v39 = vpack.c.bf16 %v641_v30, %v631_v29  ;;  %v243_v29 = vld [vmem:[#allocation10 + $0x3c0] sm:$0xff]  ;;  %v504_v30 = vpack.c.bf16 %v254_v23, %v244_v22 }
  0xf3   :  { %1231 = vmatpush1.bf16.msra.mxu1 %v1049_v40  ;;  %1191 = vmatprep.subr.bf16.mxu0 %v1058_v41  ;;  %v453_v40 = vpack.c.bf16 %v153_v33, %v143_v31  ;;  %v952_v41 = vpack.c.bf16 %v662_v35, %v652_v34  ;;  %v253_v31 = vld [vmem:[#allocation10 + $0x410] sm:$0xff]  ;;  %v762_v33 = vld [vmem:[#allocation11 + $0x4f8] sm:$0xff]  ;;  %v264_v34 = vld [vmem:[#allocation10 + $0x468] sm:$0xff] }
  0xf4   :  { %1232 = vmatprep.subr.bf16.mxu1 %v1060_v45  ;;  %v464_v45 = vpack.c.bf16 %v174_v37, %v164_v36  ;;  %v274_v35 = vld [vmem:[#allocation10 + $0x4b8] sm:$0xff]  ;;  %v503_v37 = vpack.c.bf16 %v253_v31, %v243_v29  ;;  %v353_v29 = vld [vmem:[#allocation10 + $0x730] sm:$0xff] }
  0xf5   :  { %v862_v31 = vld [vmem:[#allocation11 + $0x818] sm:$0xff] }
  0xf6   :  { %1192 = vmatpush1.bf16.msra.mxu0 %v1057_v51  ;;  %v951_v51 = vpack.c.bf16 %v661_v43, %v651_v42  ;;  %v263_v42 = vld [vmem:[#allocation10 + $0x460] sm:$0xff]  ;;  %v514_v43 = vpack.c.bf16 %v274_v35, %v264_v34 }
  0xf7   :  { %1233 = vmatpush1.bf16.msra.mxu1 %v1059_v52  ;;  %1193 = vmatprep.subr.bf16.mxu0 %v1068_v53  ;;  %v463_v52 = vpack.c.bf16 %v173_v46, %v163_v44  ;;  %v962_v53 = vpack.c.bf16 %v682_v48, %v672_v47  ;;  %v273_v44 = vld [vmem:[#allocation10 + $0x4b0] sm:$0xff]  ;;  %v782_v46 = vld [vmem:[#allocation11 + $0x598] sm:$0xff]  ;;  %v284_v47 = vld [vmem:[#allocation10 + $0x508] sm:$0xff] }
  0xf8   :  { %1234 = vmatprep.subr.bf16.mxu1 %v1070_v57  ;;  %v474_v57 = vpack.c.bf16 %v194_v50, %v184_v49  ;;  %v294_v48 = vld [vmem:[#allocation10 + $0x558] sm:$0xff]  ;;  %v513_v50 = vpack.c.bf16 %v273_v44, %v263_v42  ;;  %v373_v42 = vld [vmem:[#allocation10 + $0x7d0] sm:$0xff] }
  0xf9   :  { %v524_v55 = vpack.c.bf16 %v294_v48, %v284_v47  ;;  %v882_v44 = vld [vmem:[#allocation11 + $0x8b8] sm:$0xff] }
  0xfa   :  { %1194 = vmatpush1.bf16.msra.mxu0 %v1067_v63  ;;  %v473_v63 = vpack.c.bf16 %v193_v58, %v183_v56  ;;  %v293_v56 = vld [vmem:[#allocation10 + $0x550] sm:$0xff]  ;;  %v802_v58 = vld [vmem:[#allocation11 + $0x638] sm:$0xff] }
  0xfb   :  { %1235 = vmatpush1.bf16.msra.mxu1 %v1069_v0  ;;  %1195 = vmatprep.subr.bf16.mxu0 %v1078_v1  ;;  %v972_v0 = vpack.c.bf16 %v702_v60, %v692_v59  ;;  %v691_v1 = vld [vmem:[#allocation11 + $0x2c0] sm:$0xff]  ;;  %v304_v59 = vld [vmem:[#allocation10 + $0x5a8] sm:$0xff]  ;;  %v314_v60 = vld [vmem:[#allocation10 + $0x5f8] sm:$0xff] }
  0xfc   :  { %1236 = vmatprep.subr.bf16.mxu1 %v1080_v5  ;;  %v213_v5 = vld [vmem:[#allocation10 + $0x2d0] sm:$0xff]  ;;  %v971_v10 = vpack.c.bf16 %v701_v2, %v691_v1  ;;  %v303_v1 = vld [vmem:[#allocation10 + $0x5a0] sm:$0xff]  ;;  %v534_v2 = vpack.c.bf16 %v314_v60, %v304_v59 }
  0xfe   :  { %1196 = vmatpush1.bf16.msra.mxu0 %v1077_v11  ;;  %v483_v11 = vpack.c.bf16 %v213_v5, %v203_v3  ;;  %v313_v3 = vld [vmem:[#allocation10 + $0x5f0] sm:$0xff]  ;;  %v822_v5 = vld [vmem:[#allocation11 + $0x6d8] sm:$0xff] }
  0xff   :  { %1237 = vmatpush1.bf16.msra.mxu1 %v1079_v12  ;;  %1247 = vmatprep.subr.bf16.mxu0 %v932_v13  ;;  %v982_v12 = vpack.c.bf16 %v722_v7, %v712_v6  ;;  %v711_v13 = vld [vmem:[#allocation11 + $0x360] sm:$0xff]  ;;  %v324_v6 = vld [vmem:[#allocation10 + $0x648] sm:$0xff]  ;;  %v334_v7 = vld [vmem:[#allocation10 + $0x698] sm:$0xff]  ;;  %v533_v9 = vpack.c.bf16 %v313_v3, %v303_v1 }
 0x100   :  { %1288 = vmatprep.subr.bf16.mxu1 %v444_v18  ;;  %v233_v18 = vld [vmem:[#allocation10 + $0x370] sm:$0xff]  ;;  %v981_v24 = vpack.c.bf16 %v721_v14, %v711_v13  ;;  %v323_v13 = vld [vmem:[#allocation10 + $0x640] sm:$0xff]  ;;  %v544_v14 = vpack.c.bf16 %v334_v7, %v324_v6  ;;  %v922_v3 = vld [vmem:[#allocation11 + $0x9f8] sm:$0xff] }
 0x101   :  { %1198 = vmatmul.mubr.bf16.vlgmr.msra.gmra.mrb[4].mxu0 %v2087_v15  ;;  %v413_v1 = vld [vmem:[#allocation10 + $0x910] sm:$0xff] }
 0x102   :  { %1239 = vmatmul.mubr.bf16.vlgmr.msra.gmra.mrb[4].mxu1 %v2087_v15  ;;  %1248 = vmatpush1.bf16.msra.mxu0 %v931_v25  ;;  %v493_v25 = vpack.c.bf16 %v233_v18, %v223_v16  ;;  %v333_v16 = vld [vmem:[#allocation10 + $0x690] sm:$0xff]  ;;  %v842_v18 = vld [vmem:[#allocation11 + $0x778] sm:$0xff] }
 0x103   :  { %1289 = vmatpush1.bf16.msra.mxu1 %v443_v27  ;;  %1249 = vmatprep.subr.bf16.mxu0 %v942_v28  ;;  %v731_v27 = vld [vmem:[#allocation11 + $0x400] sm:$0xff]  ;;  %v741_v28 = vld [vmem:[#allocation11 + $0x450] sm:$0xff]  ;;  %v543_v23 = vpack.c.bf16 %v333_v16, %v323_v13  ;;  %v136_v16 = vld [vmem:[#allocation10 + $0x68] sm:$0xff] }
 0x104   :  { %1290 = vmatprep.subr.bf16.mxu1 %v454_v32  ;;  %1279 = vmatprep.mubr.bf16.mxu0 %v2083_v19  ;;  %v214_v19 = vld [vmem:[#allocation10 + $0x2d8] sm:$0xff]  ;;  %v752_v32 = vld [vmem:[#allocation11 + $0x4a8] sm:$0xff]  ;;  %v991_v36 = vpack.c.bf16 %v741_v28, %v731_v27  ;;  %v343_v27 = vld [vmem:[#allocation10 + $0x6e0] sm:$0xff]  ;;  %v554_v28 = vpack.c.bf16 %v354_v21, %v344_v20 }
 0x105   :  { %1320 = vmatprep.mubr.bf16.mxu1 %v2094_v38  ;;  %v484_v4 = vpack.c.bf16 %v214_v19, %v204_v61  ;;  %v523_v19 = vpack.c.bf16 %v293_v56, %v283_v54  ;;  %v553_v35 = vpack.c.bf16 %v353_v29, %v343_v27  ;;  %v393_v54 = vld [vmem:[#allocation10 + $0x870] sm:$0xff]  ;;  %v902_v56 = vld [vmem:[#allocation11 + $0x958] sm:$0xff]  ;;  %v115_v21 = vld [vmem:[#allocation2] sm:$0xff] }
 0x106   :  { %1250 = vmatpush1.bf16.msra.mxu0 %v941_v39  ;;  %v1002_v39 = vpack.c.bf16 %v762_v33, %v752_v32  ;;  %v364_v32 = vld [vmem:[#allocation10 + $0x788] sm:$0xff]  ;;  %v374_v33 = vld [vmem:[#allocation10 + $0x7d8] sm:$0xff]  ;;  %v433_v13 = vld [vmem:[#allocation10 + $0x9b0] sm:$0xff] }
 0x107   :  { %1291 = vmatpush1.bf16.msra.mxu1 %v453_v40  ;;  %1251 = vmatprep.subr.bf16.mxu0 %v952_v41  ;;  %v751_v40 = vld [vmem:[#allocation11 + $0x4a0] sm:$0xff]  ;;  %v761_v41 = vld [vmem:[#allocation11 + $0x4f0] sm:$0xff]  ;;  %v146_v29 = vld [vmem:[#allocation10 + $0xb8] sm:$0xff] }
 0x108   :  { %1292 = vmatprep.subr.bf16.mxu1 %v464_v45  ;;  %v772_v45 = vld [vmem:[#allocation11 + $0x548] sm:$0xff]  ;;  %v1001_v49 = vpack.c.bf16 %v761_v41, %v751_v40  ;;  %v363_v40 = vld [vmem:[#allocation10 + $0x780] sm:$0xff]  ;;  %v564_v41 = vpack.c.bf16 %v374_v33, %v364_v32  ;;  %v158_v32 = vld [vmem:[#allocation10 + $0x118] sm:$0xff]  ;;  %v2099_v33 = vpack.c.bf16 %v115_v21, %v115_v21 }
 0x109   :  { %v563_v48 = vpack.c.bf16 %v373_v42, %v363_v40  ;;  %v147_v40 = vld [vmem:[#allocation10 + $0xc0] sm:$0xff]  ;;  %v157_v42 = vld [vmem:[#allocation10 + $0x110] sm:$0xff] }
 0x10a   :  { %1252 = vmatpush1.bf16.msra.mxu0 %v951_v51  ;;  %v1012_v51 = vpack.c.bf16 %v782_v46, %v772_v45  ;;  %v384_v45 = vld [vmem:[#allocation10 + $0x828] sm:$0xff]  ;;  %v394_v46 = vld [vmem:[#allocation10 + $0x878] sm:$0xff] }
 0x10b   :  { %1293 = vmatpush1.bf16.msra.mxu1 %v463_v52  ;;  %1253 = vmatprep.subr.bf16.mxu0 %v962_v53  ;;  %v771_v52 = vld [vmem:[#allocation11 + $0x540] sm:$0xff]  ;;  %v781_v53 = vld [vmem:[#allocation11 + $0x590] sm:$0xff] }
 0x10c   :  { %1294 = vmatprep.subr.bf16.mxu1 %v474_v57  ;;  %v792_v57 = vld [vmem:[#allocation11 + $0x5e8] sm:$0xff]  ;;  %v1011_v61 = vpack.c.bf16 %v781_v53, %v771_v52  ;;  %v383_v52 = vld [vmem:[#allocation10 + $0x820] sm:$0xff]  ;;  %v574_v53 = vpack.c.bf16 %v394_v46, %v384_v45  ;;  %v178_v46 = vld [vmem:[#allocation10 + $0x1b8] sm:$0xff] }
 0x10d   :  { %v573_v60 = vpack.c.bf16 %v393_v54, %v383_v52  ;;  %v168_v45 = vld [vmem:[#allocation10 + $0x168] sm:$0xff]  ;;  %v167_v52 = vld [vmem:[#allocation10 + $0x160] sm:$0xff]  ;;  %v177_v54 = vld [vmem:[#allocation10 + $0x1b0] sm:$0xff] }
 0x10e   :  { %1254 = vmatpush1.bf16.msra.mxu0 %v961_v62  ;;  %v1022_v62 = vpack.c.bf16 %v802_v58, %v792_v57  ;;  %v404_v57 = vld [vmem:[#allocation10 + $0x8c8] sm:$0xff]  ;;  %v414_v58 = vld [vmem:[#allocation10 + $0x918] sm:$0xff] }
 0x10f   :  { %1295 = vmatpush1.bf16.msra.mxu1 %v473_v63  ;;  %1255 = vmatprep.subr.bf16.mxu0 %v972_v0  ;;  %v791_v63 = vld [vmem:[#allocation11 + $0x5e0] sm:$0xff]  ;;  %v801_v0 = vld [vmem:[#allocation11 + $0x630] sm:$0xff] }
 0x110   :  { %1296 = vmatprep.subr.bf16.mxu1 %v484_v4  ;;  %v812_v4 = vld [vmem:[#allocation11 + $0x688] sm:$0xff]  ;;  %v1021_v8 = vpack.c.bf16 %v801_v0, %v791_v63  ;;  %v403_v63 = vld [vmem:[#allocation10 + $0x8c0] sm:$0xff]  ;;  %v584_v0 = vpack.c.bf16 %v414_v58, %v404_v57  ;;  %v198_v57 = vld [vmem:[#allocation10 + $0x258] sm:$0xff] }
 0x111   :  { %v583_v7 = vpack.c.bf16 %v413_v1, %v403_v63  ;;  %v206_v1 = vld [vmem:[#allocation10 + $0x298] sm:$0xff] }
 0x112   :  { %1256 = vmatpush1.bf16.msra.mxu0 %v971_v10  ;;  %v1032_v10 = vpack.c.bf16 %v822_v5, %v812_v4  ;;  %v424_v4 = vld [vmem:[#allocation10 + $0x968] sm:$0xff]  ;;  %v434_v5 = vld [vmem:[#allocation10 + $0x9b8] sm:$0xff] }
 0x113   :  { %1297 = vmatpush1.bf16.msra.mxu1 %v483_v11  ;;  %1257 = vmatprep.subr.bf16.mxu0 %v982_v12  ;;  %v811_v11 = vld [vmem:[#allocation11 + $0x680] sm:$0xff]  ;;  %v821_v12 = vld [vmem:[#allocation11 + $0x6d0] sm:$0xff] }
 0x114   :  { %1298 = vmatprep.subr.bf16.mxu1 %v494_v17  ;;  %v832_v17 = vld [vmem:[#allocation11 + $0x728] sm:$0xff]  ;;  %v1031_v22 = vpack.c.bf16 %v821_v12, %v811_v11  ;;  %v423_v11 = vld [vmem:[#allocation10 + $0x960] sm:$0xff]  ;;  %v594_v12 = vpack.c.bf16 %v434_v5, %v424_v4  ;;  %v218_v4 = vld [vmem:[#allocation10 + $0x2f8] sm:$0xff] }
 0x116   :  { %1258 = vmatpush1.bf16.msra.mxu0 %v981_v24  ;;  %v1042_v24 = vpack.c.bf16 %v842_v18, %v832_v17  ;;  %v128_v17 = vld [vmem:[#allocation10 + $0x28] sm:$0xff]  ;;  %v138_v18 = vld [vmem:[#allocation10 + $0x78] sm:$0xff] }
 0x117   :  { %1299 = vmatpush1.bf16.msra.mxu1 %v493_v25  ;;  %1259 = vmatprep.subr.bf16.mxu0 %v992_v26  ;;  %v831_v25 = vld [vmem:[#allocation11 + $0x720] sm:$0xff]  ;;  %v841_v26 = vld [vmem:[#allocation11 + $0x770] sm:$0xff]  ;;  %v448_v27 = vpack.c.bf16 %v138_v18, %v128_v17  ;;  %v238_v17 = vld [vmem:[#allocation10 + $0x398] sm:$0xff] }
 0x118   :  { %1300 = vmatprep.subr.bf16.mxu1 %v504_v30  ;;  %v852_v30 = vld [vmem:[#allocation11 + $0x7c8] sm:$0xff]  ;;  %v1041_v34 = vpack.c.bf16 %v841_v26, %v831_v25  ;;  %v135_v25 = vld [vmem:[#allocation10 + $0x60] sm:$0xff] }
 0x119   :  { %v127_v26 = vld [vmem:[#allocation10 + $0x20] sm:$0xff] }
 0x11a   :  { %1260 = vmatpush1.bf16.msra.mxu0 %v991_v36  ;;  %v1052_v36 = vpack.c.bf16 %v862_v31, %v852_v30  ;;  %v156_v30 = vld [vmem:[#allocation10 + $0x108] sm:$0xff] }
 0x11b   :  { %1301 = vmatpush1.bf16.msra.mxu1 %v503_v37  ;;  %1261 = vmatprep.subr.bf16.mxu0 %v1002_v39  ;;  %v851_v37 = vld [vmem:[#allocation11 + $0x7c0] sm:$0xff]  ;;  %v861_v39 = vld [vmem:[#allocation11 + $0x810] sm:$0xff]  ;;  %v148_v31 = vld [vmem:[#allocation10 + $0xc8] sm:$0xff] }
 0x11c   :  { %1302 = vmatprep.subr.bf16.mxu1 %v514_v43  ;;  %v872_v43 = vld [vmem:[#allocation11 + $0x868] sm:$0xff]  ;;  %v1051_v47 = vpack.c.bf16 %v861_v39, %v851_v37  ;;  %v145_v37 = vld [vmem:[#allocation10 + $0xb0] sm:$0xff]  ;;  %v155_v39 = vld [vmem:[#allocation10 + $0x100] sm:$0xff] }
 0x11e   :  { %1262 = vmatpush1.bf16.msra.mxu0 %v1001_v49  ;;  %v1062_v49 = vpack.c.bf16 %v882_v44, %v872_v43  ;;  %v166_v43 = vld [vmem:[#allocation10 + $0x158] sm:$0xff]  ;;  %v176_v44 = vld [vmem:[#allocation10 + $0x1a8] sm:$0xff] }
 0x11f   :  { %1303 = vmatpush1.bf16.msra.mxu1 %v513_v50  ;;  %1263 = vmatprep.subr.bf16.mxu0 %v1012_v51  ;;  %v871_v50 = vld [vmem:[#allocation11 + $0x860] sm:$0xff]  ;;  %v881_v51 = vld [vmem:[#allocation11 + $0x8b0] sm:$0xff] }
 0x120   :  { %1304 = vmatprep.subr.bf16.mxu1 %v524_v55  ;;  %v892_v55 = vld [vmem:[#allocation11 + $0x908] sm:$0xff]  ;;  %v1061_v59 = vpack.c.bf16 %v881_v51, %v871_v50  ;;  %v165_v50 = vld [vmem:[#allocation10 + $0x150] sm:$0xff]  ;;  %v175_v51 = vld [vmem:[#allocation10 + $0x1a0] sm:$0xff] }
 0x121   :  { %v465_v58 = vpack.c.bf16 %v175_v51, %v165_v50  ;;  %v267_v50 = vld [vmem:[#allocation10 + $0x480] sm:$0xff] }
 0x122   :  { %1264 = vmatpush1.bf16.msra.mxu0 %v1011_v61  ;;  %v1072_v61 = vpack.c.bf16 %v902_v56, %v892_v55  ;;  %v186_v55 = vld [vmem:[#allocation10 + $0x1f8] sm:$0xff]  ;;  %v196_v56 = vld [vmem:[#allocation10 + $0x248] sm:$0xff] }
 0x123   :  { %1305 = vmatpush1.bf16.msra.mxu1 %v523_v19  ;;  %1265 = vmatprep.subr.bf16.mxu0 %v1022_v62  ;;  %v891_v19 = vld [vmem:[#allocation11 + $0x900] sm:$0xff]  ;;  %v901_v62 = vld [vmem:[#allocation11 + $0x950] sm:$0xff] }
 0x124   :  { %1306 = vmatprep.subr.bf16.mxu1 %v534_v2  ;;  %v912_v2 = vld [vmem:[#allocation11 + $0x9a8] sm:$0xff]  ;;  %v1071_v6 = vpack.c.bf16 %v901_v62, %v891_v19  ;;  %v195_v19 = vld [vmem:[#allocation10 + $0x240] sm:$0xff] }
 0x125   :  { %v187_v62 = vld [vmem:[#allocation10 + $0x200] sm:$0xff] }
 0x126   :  { %1266 = vmatpush1.bf16.msra.mxu0 %v1021_v8  ;;  %v1082_v8 = vpack.c.bf16 %v922_v3, %v912_v2  ;;  %v216_v2 = vld [vmem:[#allocation10 + $0x2e8] sm:$0xff] }
 0x127   :  { %1307 = vmatpush1.bf16.msra.mxu1 %v533_v9  ;;  %1267 = vmatprep.subr.bf16.mxu0 %v1032_v10  ;;  %v911_v9 = vld [vmem:[#allocation11 + $0x9a0] sm:$0xff]  ;;  %v921_v10 = vld [vmem:[#allocation11 + $0x9f0] sm:$0xff]  ;;  %v208_v3 = vld [vmem:[#allocation10 + $0x2a8] sm:$0xff] }
 0x128   :  { %1308 = vmatprep.subr.bf16.mxu1 %v544_v14  ;;  %v126_v14 = vld [vmem:[#allocation10 + $0x18] sm:$0xff]  ;;  %v1081_v20 = vpack.c.bf16 %v921_v10, %v911_v9  ;;  %v215_v9 = vld [vmem:[#allocation10 + $0x2e0] sm:$0xff] }
 0x129   :  { %v207_v10 = vld [vmem:[#allocation10 + $0x2a0] sm:$0xff] }
 0x12a   :  { %1268 = vmatpush1.bf16.msra.mxu0 %v1031_v22  ;;  %v593_v22 = vpack.c.bf16 %v433_v13, %v423_v11  ;;  %v488_v11 = vpack.c.bf16 %v218_v4, %v208_v3  ;;  %v226_v13 = vld [vmem:[#allocation10 + $0x338] sm:$0xff] }
 0x12b   :  { %1309 = vmatpush1.bf16.msra.mxu1 %v543_v23  ;;  %1269 = vmatprep.subr.bf16.mxu0 %v1042_v24  ;;  %v446_v23 = vpack.c.bf16 %v136_v16, %v126_v14  ;;  %v125_v24 = vld [vmem:[#allocation10 + $0x10] sm:$0xff]  ;;  %v236_v14 = vld [vmem:[#allocation10 + $0x388] sm:$0xff] }
 0x12c   :  { %1310 = vmatprep.subr.bf16.mxu1 %v554_v28  ;;  %v137_v28 = vld [vmem:[#allocation10 + $0x70] sm:$0xff]  ;;  %v228_v16 = vld [vmem:[#allocation10 + $0x348] sm:$0xff]  ;;  %v496_v21 = vpack.c.bf16 %v236_v14, %v226_v13  ;;  %v338_v14 = vld [vmem:[#allocation10 + $0x6b8] sm:$0xff] }
 0x12d   :  { %v328_v13 = vld [vmem:[#allocation10 + $0x668] sm:$0xff] }
 0x12e   :  { %1270 = vmatpush1.bf16.msra.mxu0 %v1041_v34  ;;  %v445_v34 = vpack.c.bf16 %v135_v25, %v125_v24  ;;  %v227_v24 = vld [vmem:[#allocation10 + $0x340] sm:$0xff]  ;;  %v498_v25 = vpack.c.bf16 %v238_v17, %v228_v16 }
 0x12f   :  { %1311 = vmatpush1.bf16.msra.mxu1 %v553_v35  ;;  %1271 = vmatprep.subr.bf16.mxu0 %v1052_v36  ;;  %v447_v35 = vpack.c.bf16 %v137_v28, %v127_v26  ;;  %v456_v36 = vpack.c.bf16 %v156_v30, %v146_v29  ;;  %v237_v26 = vld [vmem:[#allocation10 + $0x390] sm:$0xff]  ;;  %v256_v28 = vld [vmem:[#allocation10 + $0x428] sm:$0xff]  ;;  %v258_v30 = vld [vmem:[#allocation10 + $0x438] sm:$0xff] }
 0x130   :  { %1312 = vmatprep.subr.bf16.mxu1 %v564_v41  ;;  %v458_v41 = vpack.c.bf16 %v158_v32, %v148_v31  ;;  %v248_v29 = vld [vmem:[#allocation10 + $0x3e8] sm:$0xff]  ;;  %v497_v32 = vpack.c.bf16 %v237_v26, %v227_v24  ;;  %v337_v24 = vld [vmem:[#allocation10 + $0x6b0] sm:$0xff] }
 0x131   :  { %v356_v26 = vld [vmem:[#allocation10 + $0x748] sm:$0xff] }
 0x132   :  { %1272 = vmatpush1.bf16.msra.mxu0 %v1051_v47  ;;  %v455_v47 = vpack.c.bf16 %v155_v39, %v145_v37  ;;  %v247_v37 = vld [vmem:[#allocation10 + $0x3e0] sm:$0xff]  ;;  %v508_v39 = vpack.c.bf16 %v258_v30, %v248_v29 }
 0x133   :  { %1313 = vmatpush1.bf16.msra.mxu1 %v563_v48  ;;  %1273 = vmatprep.subr.bf16.mxu0 %v1062_v49  ;;  %v457_v48 = vpack.c.bf16 %v157_v42, %v147_v40  ;;  %v466_v49 = vpack.c.bf16 %v176_v44, %v166_v43  ;;  %v257_v40 = vld [vmem:[#allocation10 + $0x430] sm:$0xff]  ;;  %v276_v42 = vld [vmem:[#allocation10 + $0x4c8] sm:$0xff]  ;;  %v278_v44 = vld [vmem:[#allocation10 + $0x4d8] sm:$0xff] }
 0x134   :  { %1314 = vmatprep.subr.bf16.mxu1 %v574_v53  ;;  %v468_v53 = vpack.c.bf16 %v178_v46, %v168_v45  ;;  %v268_v43 = vld [vmem:[#allocation10 + $0x488] sm:$0xff]  ;;  %v507_v46 = vpack.c.bf16 %v257_v40, %v247_v37  ;;  %v357_v37 = vld [vmem:[#allocation10 + $0x750] sm:$0xff] }
 0x135   :  { %v518_v51 = vpack.c.bf16 %v278_v44, %v268_v43  ;;  %v376_v40 = vld [vmem:[#allocation10 + $0x7e8] sm:$0xff] }
 0x136   :  { %1274 = vmatpush1.bf16.msra.mxu0 %v1061_v59  ;;  %v467_v59 = vpack.c.bf16 %v177_v54, %v167_v52  ;;  %v277_v52 = vld [vmem:[#allocation10 + $0x4d0] sm:$0xff]  ;;  %v296_v54 = vld [vmem:[#allocation10 + $0x568] sm:$0xff] }
 0x137   :  { %1315 = vmatpush1.bf16.msra.mxu1 %v573_v60  ;;  %1275 = vmatprep.subr.bf16.mxu0 %v1072_v61  ;;  %v476_v60 = vpack.c.bf16 %v196_v56, %v186_v55  ;;  %v185_v61 = vld [vmem:[#allocation10 + $0x1f0] sm:$0xff]  ;;  %v288_v55 = vld [vmem:[#allocation10 + $0x528] sm:$0xff]  ;;  %v298_v56 = vld [vmem:[#allocation10 + $0x578] sm:$0xff] }
 0x138   :  { %1316 = vmatprep.subr.bf16.mxu1 %v584_v0  ;;  %v197_v0 = vld [vmem:[#allocation10 + $0x250] sm:$0xff]  ;;  %v475_v5 = vpack.c.bf16 %v195_v19, %v185_v61  ;;  %v287_v61 = vld [vmem:[#allocation10 + $0x520] sm:$0xff]  ;;  %v528_v19 = vpack.c.bf16 %v298_v56, %v288_v55 }
 0x13a   :  { %1276 = vmatpush1.bf16.msra.mxu0 %v1071_v6  ;;  %v477_v6 = vpack.c.bf16 %v197_v0, %v187_v62  ;;  %v297_v62 = vld [vmem:[#allocation10 + $0x570] sm:$0xff]  ;;  %v316_v0 = vld [vmem:[#allocation10 + $0x608] sm:$0xff] }
 0x13b   :  { %1317 = vmatpush1.bf16.msra.mxu1 %v583_v7  ;;  %1277 = vmatprep.subr.bf16.mxu0 %v1082_v8  ;;  %v486_v7 = vpack.c.bf16 %v216_v2, %v206_v1  ;;  %v205_v8 = vld [vmem:[#allocation10 + $0x290] sm:$0xff]  ;;  %v308_v1 = vld [vmem:[#allocation10 + $0x5c8] sm:$0xff]  ;;  %v318_v2 = vld [vmem:[#allocation10 + $0x618] sm:$0xff]  ;;  %v527_v4 = vpack.c.bf16 %v297_v62, %v287_v61 }
 0x13c   :  { %1318 = vmatprep.subr.bf16.mxu1 %v594_v12  ;;  %v217_v12 = vld [vmem:[#allocation10 + $0x2f0] sm:$0xff]  ;;  %v485_v18 = vpack.c.bf16 %v215_v9, %v205_v8  ;;  %v307_v8 = vld [vmem:[#allocation10 + $0x5c0] sm:$0xff]  ;;  %v538_v9 = vpack.c.bf16 %v318_v2, %v308_v1  ;;  %v416_v62 = vld [vmem:[#allocation10 + $0x928] sm:$0xff] }
 0x13d   :  { %v397_v61 = vld [vmem:[#allocation10 + $0x890] sm:$0xff] }
 0x13e   :  { %1278 = vmatpush1.bf16.msra.mxu0 %v1081_v20  ;;  %v487_v20 = vpack.c.bf16 %v217_v12, %v207_v10  ;;  %v317_v10 = vld [vmem:[#allocation10 + $0x610] sm:$0xff]  ;;  %v336_v12 = vld [vmem:[#allocation10 + $0x6a8] sm:$0xff] }
 0x13f   :  { %1319 = vmatpush1.bf16.msra.mxu1 %v593_v22  ;;  %1329 = vmatprep.subr.bf16.mxu0 %v446_v23  ;;  %v225_v22 = vld [vmem:[#allocation10 + $0x330] sm:$0xff]  ;;  %v235_v23 = vld [vmem:[#allocation10 + $0x380] sm:$0xff]  ;;  %v537_v17 = vpack.c.bf16 %v317_v10, %v307_v8  ;;  %v436_v10 = vld [vmem:[#allocation10 + $0x9c8] sm:$0xff] }
 0x140   :  { %1370 = vmatprep.subr.bf16.mxu1 %v448_v27  ;;  %v246_v27 = vld [vmem:[#allocation10 + $0x3d8] sm:$0xff]  ;;  %v495_v31 = vpack.c.bf16 %v235_v23, %v225_v22  ;;  %v327_v22 = vld [vmem:[#allocation10 + $0x660] sm:$0xff]  ;;  %v548_v23 = vpack.c.bf16 %v338_v14, %v328_v13  ;;  %v417_v8 = vld [vmem:[#allocation10 + $0x930] sm:$0xff] }
 0x141   :  { %1280 = vmatmul.mubr.bf16.vlgmr.msra.gmra.mrb[8].mxu0 %v2087_v15  ;;  %v188_v15 = vld [vmem:[#allocation10 + $0x208] sm:$0xff]  ;;  %v547_v30 = vpack.c.bf16 %v337_v24, %v327_v22  ;;  %v437_v22 = vld [vmem:[#allocation10 + $0x9d0] sm:$0xff] }
 0x142   :  { %1321 = vmatmul.mubr.bf16.vlgmr.msra.gmra.mrb[8].mxu1 %v2099_v33  ;;  %1330 = vmatpush1.bf16.msra.mxu0 %v445_v34  ;;  %v478_v63 = vpack.c.bf16 %v198_v57, %v188_v15  ;;  %v506_v34 = vpack.c.bf16 %v256_v28, %v246_v27  ;;  %v517_v57 = vpack.c.bf16 %v277_v52, %v267_v50  ;;  %v348_v27 = vld [vmem:[#allocation10 + $0x708] sm:$0xff]  ;;  %v358_v28 = vld [vmem:[#allocation10 + $0x758] sm:$0xff]  ;;  %v377_v50 = vld [vmem:[#allocation10 + $0x7f0] sm:$0xff] }
 0x143   :  { %1371 = vmatpush1.bf16.msra.mxu1 %v447_v35  ;;  %1331 = vmatprep.subr.bf16.mxu0 %v456_v36  ;;  %v245_v35 = vld [vmem:[#allocation10 + $0x3d0] sm:$0xff]  ;;  %v255_v36 = vld [vmem:[#allocation10 + $0x420] sm:$0xff]  ;;  %v396_v52 = vld [vmem:[#allocation10 + $0x888] sm:$0xff] }
 0x144   :  { %1372 = vmatprep.subr.bf16.mxu1 %v458_v41  ;;  %1361 = vmatprep.mubr.bf16.mxu0 %v2094_v38  ;;  %v266_v41 = vld [vmem:[#allocation10 + $0x478] sm:$0xff]  ;;  %v505_v45 = vpack.c.bf16 %v255_v36, %v245_v35  ;;  %v347_v35 = vld [vmem:[#allocation10 + $0x700] sm:$0xff]  ;;  %v558_v36 = vpack.c.bf16 %v358_v28, %v348_v27  ;;  %v140_v24 = vld [vmem:[#allocation10 + $0x88] sm:$0xff] }
 0x145   :  { %1402 = vmatprep.mubr.bf16.mxu1 %v2094_v38  ;;  %v557_v44 = vpack.c.bf16 %v357_v37, %v347_v35  ;;  %v141_v35 = vld [vmem:[#allocation10 + $0x90] sm:$0xff]  ;;  %v160_v37 = vld [vmem:[#allocation10 + $0x128] sm:$0xff] }
 0x146   :  { %1332 = vmatpush1.bf16.msra.mxu0 %v455_v47  ;;  %v516_v47 = vpack.c.bf16 %v276_v42, %v266_v41  ;;  %v368_v41 = vld [vmem:[#allocation10 + $0x7a8] sm:$0xff]  ;;  %v378_v42 = vld [vmem:[#allocation10 + $0x7f8] sm:$0xff] }
 0x147   :  { %1373 = vmatpush1.bf16.msra.mxu1 %v457_v48  ;;  %1333 = vmatprep.subr.bf16.mxu0 %v466_v49  ;;  %v265_v48 = vld [vmem:[#allocation10 + $0x470] sm:$0xff]  ;;  %v275_v49 = vld [vmem:[#allocation10 + $0x4c0] sm:$0xff] }
 0x148   :  { %1374 = vmatprep.subr.bf16.mxu1 %v468_v53  ;;  %v286_v53 = vld [vmem:[#allocation10 + $0x518] sm:$0xff]  ;;  %v515_v15 = vpack.c.bf16 %v275_v49, %v265_v48  ;;  %v367_v48 = vld [vmem:[#allocation10 + $0x7a0] sm:$0xff]  ;;  %v568_v49 = vpack.c.bf16 %v378_v42, %v368_v41 }
 0x149   :  { %v567_v56 = vpack.c.bf16 %v377_v50, %v367_v48  ;;  %v161_v48 = vld [vmem:[#allocation10 + $0x130] sm:$0xff]  ;;  %v180_v50 = vld [vmem:[#allocation10 + $0x1c8] sm:$0xff] }
 0x14a   :  { %1334 = vmatpush1.bf16.msra.mxu0 %v465_v58  ;;  %v526_v58 = vpack.c.bf16 %v296_v54, %v286_v53  ;;  %v388_v53 = vld [vmem:[#allocation10 + $0x848] sm:$0xff]  ;;  %v398_v54 = vld [vmem:[#allocation10 + $0x898] sm:$0xff] }
 0x14b   :  { %1375 = vmatpush1.bf16.msra.mxu1 %v467_v59  ;;  %1335 = vmatprep.subr.bf16.mxu0 %v476_v60  ;;  %v285_v59 = vld [vmem:[#allocation10 + $0x510] sm:$0xff]  ;;  %v295_v60 = vld [vmem:[#allocation10 + $0x560] sm:$0xff] }
 0x14c   :  { %1376 = vmatprep.subr.bf16.mxu1 %v478_v63  ;;  %v306_v63 = vld [vmem:[#allocation10 + $0x5b8] sm:$0xff]  ;;  %v525_v3 = vpack.c.bf16 %v295_v60, %v285_v59  ;;  %v387_v59 = vld [vmem:[#allocation10 + $0x840] sm:$0xff]  ;;  %v578_v60 = vpack.c.bf16 %v398_v54, %v388_v53 }
 0x14d   :  { %v577_v2 = vpack.c.bf16 %v397_v61, %v387_v59  ;;  %v181_v59 = vld [vmem:[#allocation10 + $0x1d0] sm:$0xff]  ;;  %v200_v61 = vld [vmem:[#allocation10 + $0x268] sm:$0xff] }
 0x14e   :  { %1336 = vmatpush1.bf16.msra.mxu0 %v475_v5  ;;  %v536_v5 = vpack.c.bf16 %v316_v0, %v306_v63  ;;  %v408_v63 = vld [vmem:[#allocation10 + $0x8e8] sm:$0xff]  ;;  %v418_v0 = vld [vmem:[#allocation10 + $0x938] sm:$0xff] }
 0x14f   :  { %1377 = vmatpush1.bf16.msra.mxu1 %v477_v6  ;;  %1337 = vmatprep.subr.bf16.mxu0 %v486_v7  ;;  %v305_v6 = vld [vmem:[#allocation10 + $0x5b0] sm:$0xff]  ;;  %v315_v7 = vld [vmem:[#allocation10 + $0x600] sm:$0xff] }
 0x150   :  { %1378 = vmatprep.subr.bf16.mxu1 %v488_v11  ;;  %v326_v11 = vld [vmem:[#allocation10 + $0x658] sm:$0xff]  ;;  %v535_v16 = vpack.c.bf16 %v315_v7, %v305_v6  ;;  %v407_v6 = vld [vmem:[#allocation10 + $0x8e0] sm:$0xff]  ;;  %v588_v7 = vpack.c.bf16 %v418_v0, %v408_v63 }
 0x151   :  { %v587_v14 = vpack.c.bf16 %v417_v8, %v407_v6  ;;  %v201_v6 = vld [vmem:[#allocation10 + $0x270] sm:$0xff]  ;;  %v220_v8 = vld [vmem:[#allocation10 + $0x308] sm:$0xff] }
 0x152   :  { %1338 = vmatpush1.bf16.msra.mxu0 %v485_v18  ;;  %v546_v18 = vpack.c.bf16 %v336_v12, %v326_v11  ;;  %v428_v11 = vld [vmem:[#allocation10 + $0x988] sm:$0xff]  ;;  %v438_v12 = vld [vmem:[#allocation10 + $0x9d8] sm:$0xff] }
 0x153   :  { %1379 = vmatpush1.bf16.msra.mxu1 %v487_v20  ;;  %1339 = vmatprep.subr.bf16.mxu0 %v496_v21  ;;  %v325_v20 = vld [vmem:[#allocation10 + $0x650] sm:$0xff]  ;;  %v335_v21 = vld [vmem:[#allocation10 + $0x6a0] sm:$0xff] }
 0x154   :  { %1380 = vmatprep.subr.bf16.mxu1 %v498_v25  ;;  %v346_v25 = vld [vmem:[#allocation10 + $0x6f8] sm:$0xff]  ;;  %v545_v29 = vpack.c.bf16 %v335_v21, %v325_v20  ;;  %v427_v20 = vld [vmem:[#allocation10 + $0x980] sm:$0xff]  ;;  %v598_v21 = vpack.c.bf16 %v438_v12, %v428_v11 }
 0x155   :  { %v597_v28 = vpack.c.bf16 %v437_v22, %v427_v20  ;;  %v230_v20 = vld [vmem:[#allocation10 + $0x358] sm:$0xff]  ;;  %v232_v22 = vld [vmem:[#allocation10 + $0x368] sm:$0xff] }
 0x156   :  { %1340 = vmatpush1.bf16.msra.mxu0 %v495_v31  ;;  %v556_v31 = vpack.c.bf16 %v356_v26, %v346_v25  ;;  %v132_v25 = vld [vmem:[#allocation10 + $0x48] sm:$0xff]  ;;  %v142_v26 = vld [vmem:[#allocation10 + $0x98] sm:$0xff] }
 0x157   :  { %1381 = vmatpush1.bf16.msra.mxu1 %v497_v32  ;;  %1341 = vmatprep.subr.bf16.mxu0 %v506_v34  ;;  %v345_v32 = vld [vmem:[#allocation10 + $0x6f0] sm:$0xff]  ;;  %v355_v34 = vld [vmem:[#allocation10 + $0x740] sm:$0xff] }
 0x158   :  { %1382 = vmatprep.subr.bf16.mxu1 %v508_v39  ;;  %v366_v39 = vld [vmem:[#allocation10 + $0x798] sm:$0xff]  ;;  %v555_v43 = vpack.c.bf16 %v355_v34, %v345_v32  ;;  %v131_v32 = vld [vmem:[#allocation10 + $0x40] sm:$0xff]  ;;  %v452_v34 = vpack.c.bf16 %v142_v26, %v132_v25 }
 0x159   :  { %v451_v42 = vpack.c.bf16 %v141_v35, %v131_v32  ;;  %v250_v32 = vld [vmem:[#allocation10 + $0x3f8] sm:$0xff]  ;;  %v252_v35 = vld [vmem:[#allocation10 + $0x408] sm:$0xff] }
 0x15a   :  { %1342 = vmatpush1.bf16.msra.mxu0 %v505_v45  ;;  %v566_v45 = vpack.c.bf16 %v376_v40, %v366_v39  ;;  %v152_v39 = vld [vmem:[#allocation10 + $0xe8] sm:$0xff]  ;;  %v162_v40 = vld [vmem:[#allocation10 + $0x138] sm:$0xff] }
 0x15b   :  { %1383 = vmatpush1.bf16.msra.mxu1 %v507_v46  ;;  %1343 = vmatprep.subr.bf16.mxu0 %v516_v47  ;;  %v365_v46 = vld [vmem:[#allocation10 + $0x790] sm:$0xff]  ;;  %v375_v47 = vld [vmem:[#allocation10 + $0x7e0] sm:$0xff] }
 0x15c   :  { %1384 = vmatprep.subr.bf16.mxu1 %v518_v51  ;;  %v386_v51 = vld [vmem:[#allocation10 + $0x838] sm:$0xff]  ;;  %v565_v55 = vpack.c.bf16 %v375_v47, %v365_v46  ;;  %v151_v46 = vld [vmem:[#allocation10 + $0xe0] sm:$0xff]  ;;  %v462_v47 = vpack.c.bf16 %v162_v40, %v152_v39 }
 0x15d   :  { %v461_v54 = vpack.c.bf16 %v161_v48, %v151_v46  ;;  %v261_v46 = vld [vmem:[#allocation10 + $0x450] sm:$0xff]  ;;  %v280_v48 = vld [vmem:[#allocation10 + $0x4e8] sm:$0xff] }
 0x15e   :  { %1344 = vmatpush1.bf16.msra.mxu0 %v515_v15  ;;  %v576_v15 = vpack.c.bf16 %v396_v52, %v386_v51  ;;  %v172_v51 = vld [vmem:[#allocation10 + $0x188] sm:$0xff]  ;;  %v182_v52 = vld [vmem:[#allocation10 + $0x1d8] sm:$0xff] }
 0x15f   :  { %1385 = vmatpush1.bf16.msra.mxu1 %v517_v57  ;;  %1345 = vmatprep.subr.bf16.mxu0 %v526_v58  ;;  %v385_v57 = vld [vmem:[#allocation10 + $0x830] sm:$0xff]  ;;  %v395_v58 = vld [vmem:[#allocation10 + $0x880] sm:$0xff] }
 0x160   :  { %1386 = vmatprep.subr.bf16.mxu1 %v528_v19  ;;  %v406_v19 = vld [vmem:[#allocation10 + $0x8d8] sm:$0xff]  ;;  %v575_v1 = vpack.c.bf16 %v395_v58, %v385_v57  ;;  %v171_v57 = vld [vmem:[#allocation10 + $0x180] sm:$0xff]  ;;  %v472_v58 = vpack.c.bf16 %v182_v52, %v172_v51  ;;  %v272_v51 = vld [vmem:[#allocation10 + $0x4a8] sm:$0xff] }
 0x161   :  { %v471_v0 = vpack.c.bf16 %v181_v59, %v171_v57  ;;  %v282_v52 = vld [vmem:[#allocation10 + $0x4f8] sm:$0xff]  ;;  %v269_v59 = vld [vmem:[#allocation10 + $0x490] sm:$0xff] }
 0x162   :  { %1346 = vmatpush1.bf16.msra.mxu0 %v525_v3  ;;  %v586_v3 = vpack.c.bf16 %v416_v62, %v406_v19  ;;  %v192_v19 = vld [vmem:[#allocation10 + $0x228] sm:$0xff]  ;;  %v202_v62 = vld [vmem:[#allocation10 + $0x278] sm:$0xff] }
 0x163   :  { %1387 = vmatpush1.bf16.msra.mxu1 %v527_v4  ;;  %1347 = vmatprep.subr.bf16.mxu0 %v536_v5  ;;  %v405_v4 = vld [vmem:[#allocation10 + $0x8d0] sm:$0xff]  ;;  %v415_v5 = vld [vmem:[#allocation10 + $0x920] sm:$0xff] }
 0x164   :  { %1388 = vmatprep.subr.bf16.mxu1 %v538_v9  ;;  %v426_v9 = vld [vmem:[#allocation10 + $0x978] sm:$0xff]  ;;  %v585_v13 = vpack.c.bf16 %v415_v5, %v405_v4  ;;  %v191_v4 = vld [vmem:[#allocation10 + $0x220] sm:$0xff]  ;;  %v482_v5 = vpack.c.bf16 %v202_v62, %v192_v19  ;;  %v522_v62 = vpack.c.bf16 %v282_v52, %v272_v51 }
 0x165   :  { %v351_v51 = vld [vmem:[#allocation10 + $0x720] sm:$0xff] }
 0x166   :  { %1348 = vmatpush1.bf16.msra.mxu0 %v535_v16  ;;  %v596_v16 = vpack.c.bf16 %v436_v10, %v426_v9  ;;  %v212_v9 = vld [vmem:[#allocation10 + $0x2c8] sm:$0xff]  ;;  %v222_v10 = vld [vmem:[#allocation10 + $0x318] sm:$0xff] }
 0x167   :  { %1389 = vmatpush1.bf16.msra.mxu1 %v537_v17  ;;  %1349 = vmatprep.subr.bf16.mxu0 %v546_v18  ;;  %v425_v17 = vld [vmem:[#allocation10 + $0x970] sm:$0xff]  ;;  %v435_v18 = vld [vmem:[#allocation10 + $0x9c0] sm:$0xff] }
 0x168   :  { %1390 = vmatprep.subr.bf16.mxu1 %v548_v23  ;;  %v130_v23 = vld [vmem:[#allocation10 + $0x38] sm:$0xff]  ;;  %v595_v27 = vpack.c.bf16 %v435_v18, %v425_v17  ;;  %v492_v17 = vpack.c.bf16 %v222_v10, %v212_v9  ;;  %v221_v18 = vld [vmem:[#allocation10 + $0x310] sm:$0xff]  ;;  %v291_v9 = vld [vmem:[#allocation10 + $0x540] sm:$0xff] }
 0x16a   :  { %1350 = vmatpush1.bf16.msra.mxu0 %v545_v29  ;;  %v450_v29 = vpack.c.bf16 %v140_v24, %v130_v23  ;;  %v242_v23 = vld [vmem:[#allocation10 + $0x3b8] sm:$0xff] }
 0x16b   :  { %1391 = vmatpush1.bf16.msra.mxu1 %v547_v30  ;;  %1351 = vmatprep.subr.bf16.mxu0 %v556_v31  ;;  %v129_v30 = vld [vmem:[#allocation10 + $0x30] sm:$0xff]  ;;  %v139_v31 = vld [vmem:[#allocation10 + $0x80] sm:$0xff] }
 0x16c   :  { %1392 = vmatprep.subr.bf16.mxu1 %v558_v36  ;;  %v150_v36 = vld [vmem:[#allocation10 + $0xd8] sm:$0xff]  ;;  %v449_v41 = vpack.c.bf16 %v139_v31, %v129_v30  ;;  %v502_v30 = vpack.c.bf16 %v242_v23, %v232_v22  ;;  %v241_v31 = vld [vmem:[#allocation10 + $0x3b0] sm:$0xff]  ;;  %v311_v22 = vld [vmem:[#allocation10 + $0x5e0] sm:$0xff] }
 0x16e   :  { %1352 = vmatpush1.bf16.msra.mxu0 %v555_v43  ;;  %v460_v43 = vpack.c.bf16 %v160_v37, %v150_v36  ;;  %v262_v36 = vld [vmem:[#allocation10 + $0x458] sm:$0xff] }
 0x16f   :  { %1393 = vmatpush1.bf16.msra.mxu1 %v557_v44  ;;  %1353 = vmatprep.subr.bf16.mxu0 %v566_v45  ;;  %v149_v44 = vld [vmem:[#allocation10 + $0xd0] sm:$0xff]  ;;  %v159_v45 = vld [vmem:[#allocation10 + $0x120] sm:$0xff] }
 0x170   :  { %1394 = vmatprep.subr.bf16.mxu1 %v568_v49  ;;  %v170_v49 = vld [vmem:[#allocation10 + $0x178] sm:$0xff]  ;;  %v459_v53 = vpack.c.bf16 %v159_v45, %v149_v44  ;;  %v512_v45 = vpack.c.bf16 %v262_v36, %v252_v35  ;;  %v331_v35 = vld [vmem:[#allocation10 + $0x680] sm:$0xff] }
 0x172   :  { %1354 = vmatpush1.bf16.msra.mxu0 %v565_v55  ;;  %v470_v55 = vpack.c.bf16 %v180_v50, %v170_v49 }
 0x173   :  { %1395 = vmatpush1.bf16.msra.mxu1 %v567_v56  ;;  %1355 = vmatprep.subr.bf16.mxu0 %v576_v15  ;;  %v169_v56 = vld [vmem:[#allocation10 + $0x170] sm:$0xff]  ;;  %v179_v15 = vld [vmem:[#allocation10 + $0x1c0] sm:$0xff] }
 0x174   :  { %1396 = vmatprep.subr.bf16.mxu1 %v578_v60  ;;  %v190_v60 = vld [vmem:[#allocation10 + $0x218] sm:$0xff]  ;;  %v469_v63 = vpack.c.bf16 %v179_v15, %v169_v56 }
 0x176   :  { %1356 = vmatpush1.bf16.msra.mxu0 %v575_v1  ;;  %v480_v1 = vpack.c.bf16 %v200_v61, %v190_v60  ;;  %v279_v60 = vld [vmem:[#allocation10 + $0x4e0] sm:$0xff] }
 0x177   :  { %1397 = vmatpush1.bf16.msra.mxu1 %v577_v2  ;;  %1357 = vmatprep.subr.bf16.mxu0 %v586_v3  ;;  %v189_v2 = vld [vmem:[#allocation10 + $0x210] sm:$0xff]  ;;  %v199_v3 = vld [vmem:[#allocation10 + $0x260] sm:$0xff] }
 0x178   :  { %1398 = vmatprep.subr.bf16.mxu1 %v588_v7  ;;  %v210_v7 = vld [vmem:[#allocation10 + $0x2b8] sm:$0xff]  ;;  %v479_v11 = vpack.c.bf16 %v199_v3, %v189_v2  ;;  %v271_v61 = vld [vmem:[#allocation10 + $0x4a0] sm:$0xff]  ;;  %v292_v2 = vld [vmem:[#allocation10 + $0x548] sm:$0xff] }
 0x179   :  { %v490_v12 = vpack.c.bf16 %v220_v8, %v210_v7  ;;  %v302_v3 = vld [vmem:[#allocation10 + $0x598] sm:$0xff]  ;;  %v289_v7 = vld [vmem:[#allocation10 + $0x530] sm:$0xff]  ;;  %v299_v8 = vld [vmem:[#allocation10 + $0x580] sm:$0xff] }
 0x17a   :  { %1358 = vmatpush1.bf16.msra.mxu0 %v585_v13  ;;  %v209_v13 = vld [vmem:[#allocation10 + $0x2b0] sm:$0xff]  ;;  %v532_v10 = vpack.c.bf16 %v302_v3, %v292_v2  ;;  %v400_v2 = vld [vmem:[#allocation10 + $0x8a8] sm:$0xff] }
 0x17b   :  { %1399 = vmatpush1.bf16.msra.mxu1 %v587_v14  ;;  %1359 = vmatprep.subr.bf16.mxu0 %v596_v16  ;;  %v219_v14 = vld [vmem:[#allocation10 + $0x300] sm:$0xff]  ;;  %v392_v3 = vld [vmem:[#allocation10 + $0x868] sm:$0xff] }
 0x17c   :  { %1400 = vmatprep.subr.bf16.mxu1 %v598_v21  ;;  %v211_v16 = vld [vmem:[#allocation10 + $0x2c0] sm:$0xff]  ;;  %v240_v21 = vld [vmem:[#allocation10 + $0x3a8] sm:$0xff]  ;;  %v489_v24 = vpack.c.bf16 %v219_v14, %v209_v13  ;;  %v322_v14 = vld [vmem:[#allocation10 + $0x638] sm:$0xff] }
 0x17d   :  { %v491_v25 = vpack.c.bf16 %v221_v18, %v211_v16  ;;  %v500_v26 = vpack.c.bf16 %v240_v21, %v230_v20  ;;  %v312_v13 = vld [vmem:[#allocation10 + $0x5e8] sm:$0xff]  ;;  %v529_v16 = vpack.c.bf16 %v299_v8, %v289_v7  ;;  %v309_v20 = vld [vmem:[#allocation10 + $0x5d0] sm:$0xff]  ;;  %v319_v21 = vld [vmem:[#allocation10 + $0x620] sm:$0xff] }
 0x17e   :  { %1360 = vmatpush1.bf16.msra.mxu0 %v595_v27  ;;  %v229_v27 = vld [vmem:[#allocation10 + $0x350] sm:$0xff]  ;;  %v542_v23 = vpack.c.bf16 %v322_v14, %v312_v13  ;;  %v420_v13 = vld [vmem:[#allocation10 + $0x948] sm:$0xff] }
 0x17f   :  { %1401 = vmatpush1.bf16.msra.mxu1 %v597_v28  ;;  %1411 = vmatprep.subr.bf16.mxu0 %v450_v29  ;;  %v239_v28 = vld [vmem:[#allocation10 + $0x3a0] sm:$0xff]  ;;  %v389_v8 = vld [vmem:[#allocation10 + $0x850] sm:$0xff]  ;;  %v412_v14 = vld [vmem:[#allocation10 + $0x908] sm:$0xff] }
 0x180   :  { %1452 = vmatprep.subr.bf16.mxu1 %v452_v34  ;;  %v231_v29 = vld [vmem:[#allocation10 + $0x360] sm:$0xff]  ;;  %v260_v34 = vld [vmem:[#allocation10 + $0x448] sm:$0xff]  ;;  %v499_v37 = vpack.c.bf16 %v239_v28, %v229_v27  ;;  %v342_v28 = vld [vmem:[#allocation10 + $0x6d8] sm:$0xff] }
 0x181   :  { %1362 = vmatmul.mubr.bf16.vlgmr.msra.gmra.mrb[12].mxu0 %v2099_v33  ;;  %v501_v39 = vpack.c.bf16 %v241_v31, %v231_v29  ;;  %v510_v40 = vpack.c.bf16 %v260_v34, %v250_v32  ;;  %v332_v27 = vld [vmem:[#allocation10 + $0x688] sm:$0xff]  ;;  %v539_v29 = vpack.c.bf16 %v319_v21, %v309_v20  ;;  %v329_v32 = vld [vmem:[#allocation10 + $0x670] sm:$0xff]  ;;  %v339_v34 = vld [vmem:[#allocation10 + $0x6c0] sm:$0xff] }
 0x182   :  { %1403 = vmatmul.mubr.bf16.vlgmr.msra.gmra.mrb[12].mxu1 %v2099_v33  ;;  %1412 = vmatpush1.bf16.msra.mxu0 %v449_v41  ;;  %v249_v41 = vld [vmem:[#allocation10 + $0x3f0] sm:$0xff]  ;;  %v552_v36 = vpack.c.bf16 %v342_v28, %v332_v27  ;;  %v440_v27 = vld [vmem:[#allocation10 + $0x9e8] sm:$0xff] }
 0x183   :  { %1453 = vmatpush1.bf16.msra.mxu1 %v451_v42  ;;  %1413 = vmatprep.subr.bf16.mxu0 %v460_v43  ;;  %v259_v42 = vld [vmem:[#allocation10 + $0x440] sm:$0xff]  ;;  %v409_v21 = vld [vmem:[#allocation10 + $0x8f0] sm:$0xff]  ;;  %v432_v28 = vld [vmem:[#allocation10 + $0x9a8] sm:$0xff] }
 0x184   :  { %1454 = vmatprep.subr.bf16.mxu1 %v462_v47  ;;  %1443 = vmatprep.mubr.bf16.mxu0 %v2094_v38  ;;  %v251_v43 = vld [vmem:[#allocation10 + $0x400] sm:$0xff]  ;;  %v270_v47 = vld [vmem:[#allocation10 + $0x498] sm:$0xff] }
 0x185   :  { %1484 = vmatprep.mubr.bf16.mxu1 %v2094_v38  ;;  %v481_v38 = vpack.c.bf16 %v201_v6, %v191_v4  ;;  %v511_v57 = vpack.c.bf16 %v261_v46, %v251_v43  ;;  %v519_v4 = vpack.c.bf16 %v279_v60, %v269_v59  ;;  %v549_v43 = vpack.c.bf16 %v339_v34, %v329_v32  ;;  %v429_v34 = vld [vmem:[#allocation10 + $0x990] sm:$0xff] }
 0x186   :  { %1414 = vmatpush1.bf16.msra.mxu0 %v459_v53 }
 0x187   :  { %1455 = vmatpush1.bf16.msra.mxu1 %v461_v54  ;;  %1415 = vmatprep.subr.bf16.mxu0 %v470_v55  ;;  %v509_v55 = vpack.c.bf16 %v259_v42, %v249_v41  ;;  %v352_v41 = vld [vmem:[#allocation10 + $0x728] sm:$0xff]  ;;  %v362_v42 = vld [vmem:[#allocation10 + $0x778] sm:$0xff] }
 0x188   :  { %1456 = vmatprep.subr.bf16.mxu1 %v472_v58  ;;  %v520_v58 = vpack.c.bf16 %v280_v48, %v270_v47  ;;  %v349_v47 = vld [vmem:[#allocation10 + $0x710] sm:$0xff]  ;;  %v359_v48 = vld [vmem:[#allocation10 + $0x760] sm:$0xff]  ;;  %v562_v52 = vpack.c.bf16 %v362_v42, %v352_v41 }
 0x18a   :  { %1416 = vmatpush1.bf16.msra.mxu0 %v469_v63  ;;  %v281_v63 = vld [vmem:[#allocation10 + $0x4f0] sm:$0xff] }
 0x18b   :  { %1457 = vmatpush1.bf16.msra.mxu1 %v471_v0  ;;  %1417 = vmatprep.subr.bf16.mxu0 %v480_v1  ;;  %v290_v0 = vld [vmem:[#allocation10 + $0x538] sm:$0xff]  ;;  %v300_v1 = vld [vmem:[#allocation10 + $0x588] sm:$0xff] }
 0x18c   :  { %1458 = vmatprep.subr.bf16.mxu1 %v482_v5  ;;  %v521_v5 = vpack.c.bf16 %v281_v63, %v271_v61  ;;  %v530_v6 = vpack.c.bf16 %v300_v1, %v290_v0  ;;  %v369_v61 = vld [vmem:[#allocation10 + $0x7b0] sm:$0xff]  ;;  %v390_v1 = vld [vmem:[#allocation10 + $0x858] sm:$0xff] }
 0x18d   :  { %v381_v0 = vld [vmem:[#allocation10 + $0x810] sm:$0xff]  ;;  %v580_v7 = vpack.c.bf16 %v400_v2, %v390_v1  ;;  %v2139_v2 = vld [vmem:[#allocation13] sm:$0xff] }
 0x18e   :  { %1418 = vmatpush1.bf16.msra.mxu0 %v479_v11  ;;  %v301_v11 = vld [vmem:[#allocation10 + $0x590] sm:$0xff] }
 0x18f   :  { %1459 = vmatpush1.bf16.msra.mxu1 %v481_v38  ;;  %1419 = vmatprep.subr.bf16.mxu0 %v490_v12  ;;  %v310_v38 = vld [vmem:[#allocation10 + $0x5d8] sm:$0xff]  ;;  %v320_v12 = vld [vmem:[#allocation10 + $0x628] sm:$0xff] }
 0x190   :  { %1460 = vmatprep.subr.bf16.mxu1 %v492_v17  ;;  %v531_v17 = vpack.c.bf16 %v301_v11, %v291_v9  ;;  %v540_v18 = vpack.c.bf16 %v320_v12, %v310_v38  ;;  %v399_v9 = vld [vmem:[#allocation10 + $0x8a0] sm:$0xff]  ;;  %v401_v38 = vld [vmem:[#allocation10 + $0x8b0] sm:$0xff]  ;;  %v410_v12 = vld [vmem:[#allocation10 + $0x8f8] sm:$0xff] }
 0x191   :  { %v590_v20 = vpack.c.bf16 %v420_v13, %v410_v12 }
 0x192   :  { %1420 = vmatpush1.bf16.msra.mxu0 %v489_v24  ;;  %v321_v24 = vld [vmem:[#allocation10 + $0x630] sm:$0xff] }
 0x193   :  { %1461 = vmatpush1.bf16.msra.mxu1 %v491_v25  ;;  %1421 = vmatprep.subr.bf16.mxu0 %v500_v26  ;;  %v330_v25 = vld [vmem:[#allocation10 + $0x678] sm:$0xff]  ;;  %v340_v26 = vld [vmem:[#allocation10 + $0x6c8] sm:$0xff] }
 0x194   :  { %v2109_v44 = vpop.f32.mrb[0].mxu0  ;;  %1462 = vmatprep.subr.bf16.mxu1 %v502_v30  ;;  %v541_v30 = vpack.c.bf16 %v321_v24, %v311_v22  ;;  %v550_v31 = vpack.c.bf16 %v340_v26, %v330_v25  ;;  %v419_v22 = vld [vmem:[#allocation10 + $0x940] sm:$0xff]  ;;  %v421_v25 = vld [vmem:[#allocation10 + $0x950] sm:$0xff]  ;;  %v430_v26 = vld [vmem:[#allocation10 + $0x998] sm:$0xff] }
 0x195   :  { %v2111_v49 = vpop.f32.mrb[0].mxu1  ;;  %v2113_v50 = vpop.f32.mrb[1].mxu0  ;;  %v600_v32 = vpack.c.bf16 %v440_v27, %v430_v26 }
 0x196   :  { %v2115_v53 = vpop.f32.mrb[1].mxu1  ;;  %v1121_v54 = vpop.f32.mrb[2].mxu0  ;;  %1422 = vmatpush1.bf16.msra.mxu0 %v499_v37  ;;  %v341_v37 = vld [vmem:[#allocation10 + $0x6d0] sm:$0xff] }
 0x197   :  { %v1162_v56 = vpop.f32.mrb[2].mxu1  ;;  %1463 = vmatpush1.bf16.msra.mxu1 %v501_v39  ;;  %v1122_v15 = vpop.f32.mrb[3].mxu0  ;;  %1423 = vmatprep.subr.bf16.mxu0 %v510_v40  ;;  %v350_v39 = vld [vmem:[#allocation10 + $0x718] sm:$0xff]  ;;  %v360_v40 = vld [vmem:[#allocation10 + $0x768] sm:$0xff]  ;;  %v361_v54 = vld [vmem:[#allocation10 + $0x770] sm:$0xff] }
 0x198   :  { %v1163_v19 = vpop.f32.mrb[3].mxu1  ;;  %1464 = vmatprep.subr.bf16.mxu1 %v512_v45  ;;  %v551_v45 = vpack.c.bf16 %v341_v37, %v331_v35  ;;  %v560_v46 = vpack.c.bf16 %v360_v40, %v350_v39  ;;  %v380_v56 = vld [vmem:[#allocation10 + $0x808] sm:$0xff]  ;;  %v561_v59 = vpack.c.bf16 %v361_v54, %v351_v51  ;;  %v439_v35 = vld [vmem:[#allocation10 + $0x9e0] sm:$0xff]  ;;  %v441_v39 = vld [vmem:[#allocation10 + $0x9f0] sm:$0xff] }
 0x199   :  { %v372_v15 = vld [vmem:[#allocation10 + $0x7c8] sm:$0xff]  ;;  %v379_v19 = vld [vmem:[#allocation10 + $0x800] sm:$0xff]  ;;  %v599_v40 = vpack.c.bf16 %v439_v35, %v429_v34  ;;  %v1559_v35 = vld [vmem:[#allocation8] sm:$0xff] }
 0x19a   :  { %1424 = vmatpush1.bf16.msra.mxu0 %v509_v55  ;;  %v370_v55 = vld [vmem:[#allocation10 + $0x7b8] sm:$0xff]  ;;  %v431_v37 = vld [vmem:[#allocation10 + $0x9a0] sm:$0xff] }
 0x19b   :  { %1465 = vmatpush1.bf16.msra.mxu1 %v511_v57  ;;  %1425 = vmatprep.subr.bf16.mxu0 %v520_v58  ;;  %v382_v57 = vld [vmem:[#allocation10 + $0x818] sm:$0xff]  ;;  %v559_v58 = vpack.c.bf16 %v359_v48, %v349_v47  ;;  %v570_v60 = vpack.c.bf16 %v380_v56, %v370_v55  ;;  %v601_v41 = vpack.c.bf16 %v441_v39, %v431_v37  ;;  %v1557_v34 = vld [vmem:[#allocation7] sm:$0xff]  ;;  %v1558_v37 = vld [vmem:[#allocation7 + $0x8] sm:$0xff] }
 0x19c   :  { %1466 = vmatprep.subr.bf16.mxu1 %v522_v62  ;;  %v371_v62 = vld [vmem:[#allocation10 + $0x7c0] sm:$0xff]  ;;  %v572_v63 = vpack.c.bf16 %v382_v57, %v372_v15 }
 0x19e   :  { %1426 = vmatpush1.bf16.msra.mxu0 %v519_v4  ;;  %v402_v4 = vld [vmem:[#allocation10 + $0x8b8] sm:$0xff] }
 0x19f   :  { %1467 = vmatpush1.bf16.msra.mxu1 %v521_v5  ;;  %1427 = vmatprep.subr.bf16.mxu0 %v530_v6  ;;  %v569_v5 = vpack.c.bf16 %v379_v19, %v369_v61  ;;  %v571_v6 = vpack.c.bf16 %v381_v0, %v371_v62  ;;  %v582_v11 = vpack.c.bf16 %v402_v4, %v392_v3  ;;  %v1497_v19 = vlaneseq }
 0x1a0   :  { %1468 = vmatprep.subr.bf16.mxu1 %v532_v10  ;;  %v391_v10 = vld [vmem:[#allocation10 + $0x860] sm:$0xff] }
 0x1a1   :  { %v2133_v62 = vshrl.u32 %v1497_v19, 7 }
 0x1a2   :  { %1428 = vmatpush1.bf16.msra.mxu0 %v529_v16  ;;  %v422_v16 = vld [vmem:[#allocation10 + $0x958] sm:$0xff] }
 0x1a3   :  { %1469 = vmatpush1.bf16.msra.mxu1 %v531_v17  ;;  %1429 = vmatprep.subr.bf16.mxu0 %v540_v18  ;;  %v579_v17 = vpack.c.bf16 %v399_v9, %v389_v8  ;;  %v581_v18 = vpack.c.bf16 %v401_v38, %v391_v10  ;;  %v592_v24 = vpack.c.bf16 %v422_v16, %v412_v14  ;;  %v1515_v0 = vsub.s32 4, %v2133_v62 }
 0x1a4   :  { %1470 = vmatprep.subr.bf16.mxu1 %v542_v23  ;;  %v411_v23 = vld [vmem:[#allocation10 + $0x900] sm:$0xff]  ;;  %v1511_v1 = vsub.s32 3, %v2133_v62 }
 0x1a5   :  { %v1516_v4 = vrot.slane %v2139_v2, %v1515_v0 }
 0x1a6   :  { %1430 = vmatpush1.bf16.msra.mxu0 %v539_v29  ;;  %v442_v29 = vld [vmem:[#allocation10 + $0x9f8] sm:$0xff] }
 0x1a7   :  { %1471 = vmatpush1.bf16.msra.mxu1 %v541_v30  ;;  %1431 = vmatprep.subr.bf16.mxu0 %v550_v31  ;;  %v589_v30 = vpack.c.bf16 %v419_v22, %v409_v21  ;;  %v591_v31 = vpack.c.bf16 %v421_v25, %v411_v23 }
 0x1a8   :  { %1472 = vmatprep.subr.bf16.mxu1 %v552_v36  ;;  %v602_v36 = vpack.c.bf16 %v442_v29, %v432_v28 }
 0x1aa   :  { %1432 = vmatpush1.bf16.msra.mxu0 %v549_v43 }
 0x1ab   :  { %1473 = vmatpush1.bf16.msra.mxu1 %v551_v45  ;;  %1433 = vmatprep.subr.bf16.mxu0 %v560_v46 }
 0x1ac   :  { %1474 = vmatprep.subr.bf16.mxu1 %v562_v52 }
 0x1ae   :  { %1434 = vmatpush1.bf16.msra.mxu0 %v559_v58 }
 0x1af   :  { %1475 = vmatpush1.bf16.msra.mxu1 %v561_v59  ;;  %1435 = vmatprep.subr.bf16.mxu0 %v570_v60 }
 0x1b0   :  { %1476 = vmatprep.subr.bf16.mxu1 %v572_v63  ;;  %v1507_v63 = vsub.s32 2, %v2133_v62 }
 0x1b2   :  { %1436 = vmatpush1.bf16.msra.mxu0 %v569_v5  ;;  %v1508_v3 = vrot.slane %v2139_v2, %v1507_v63  ;;  %v1512_v5 = vrot.slane %v2139_v2, %v1511_v1  ;;  %v1523_v1 = vsub.s32 6, %v2133_v62 }
 0x1b3   :  { %1477 = vmatpush1.bf16.msra.mxu1 %v571_v6  ;;  %1437 = vmatprep.subr.bf16.mxu0 %v580_v7 }
 0x1b4   :  { %1478 = vmatprep.subr.bf16.mxu1 %v582_v11 }
 0x1b6   :  { %1438 = vmatpush1.bf16.msra.mxu0 %v579_v17 }
 0x1b7   :  { %1479 = vmatpush1.bf16.msra.mxu1 %v581_v18  ;;  %1439 = vmatprep.subr.bf16.mxu0 %v590_v20 }
 0x1b8   :  { %1480 = vmatprep.subr.bf16.mxu1 %v592_v24 }
 0x1ba   :  { %1440 = vmatpush1.bf16.msra.mxu0 %v589_v30 }
 0x1bb   :  { %1481 = vmatpush1.bf16.msra.mxu1 %v591_v31  ;;  %1441 = vmatprep.subr.bf16.mxu0 %v600_v32 }
 0x1bc   :  { %1482 = vmatprep.subr.bf16.mxu1 %v602_v36 }
 0x1be   :  { %1442 = vmatpush1.bf16.msra.mxu0 %v599_v40 }
 0x1bf   :  { %1483 = vmatpush1.bf16.msra.mxu1 %v601_v41  ;;  %v1560_v41 = vld [vmem:[#allocation8 + $0x8] sm:$0xff] }
 0x1c1   :  { %1444 = vmatmul.mubr.bf16.vlgmr.msra.gmra.mrb[16].mxu0 %v2099_v33 }
 0x1c2   :  { %1485 = vmatmul.mubr.bf16.vlgmr.msra.gmra.mrb[16].mxu1 %v2099_v33 }
 0x1d4   :  { %v1199_v42 = vpop.f32.mrb[4].mxu0 }
 0x1d5   :  { %v2119_v43 = vpop.f32.mrb[4].mxu1  ;;  %v1201_v45 = vpop.f32.mrb[5].mxu0 }
 0x1d6   :  { %v2121_v46 = vpop.f32.mrb[5].mxu1  ;;  %v1203_v47 = vpop.f32.mrb[6].mxu0 }
 0x1d7   :  { %v1244_v48 = vpop.f32.mrb[6].mxu1  ;;  %v1204_v51 = vpop.f32.mrb[7].mxu0 }
 0x1d8   :  { %v1245_v52 = vpop.f32.mrb[7].mxu1 }
 0x214   :  { %v2123_v54 = vpop.f32.mrb[8].mxu0 }
 0x215   :  { %v1322_v55 = vpop.f32.mrb[8].mxu1  ;;  %v2125_v56 = vpop.f32.mrb[9].mxu0 }
 0x216   :  { %v2128_v15 = vadd.f32 %v1322_v55, %v2109_v44  ;;  %v1324_v57 = vpop.f32.mrb[9].mxu1  ;;  %v1285_v33 = vpop.f32.mrb[10].mxu0  ;;  %v1519_v44 = vsub.s32 5, %v2133_v62  ;;  %v1499_v55 = vsub.s32 0, %v2133_v62 }
 0x217   :  { %v2131_v58 = vadd.f32 %v1324_v57, %v2113_v50  ;;  %v1326_v59 = vpop.f32.mrb[10].mxu1  ;;  %v1286_v60 = vpop.f32.mrb[11].mxu0  ;;  %v1503_v57 = vsub.s32 1, %v2133_v62 }
 0x218   :  { %v1327_v61 = vpop.f32.mrb[11].mxu1  ;;  %v1520_v9 = vrot.slane %v2139_v2, %v1519_v44  ;;  %v1500_v59 = vrot.slane %v2139_v2, %v1499_v55  ;;  %v1527_v44 = vsub.s32 7, %v2133_v62 }
 0x219   :  { %v1504_v60 = vrot.slane %v2139_v2, %v1503_v57 }
 0x21a   :  { %v1547_v61 = vadd.f32 %v1500_v59, %v2128_v15  ;;  %v1528_v15 = vrot.slane %v2139_v2, %v1527_v44 }
 0x21b   :  { %v1548_v19 = vadd.f32 %v1504_v60, %v2131_v58 }
 0x21c   :  { %v1665_v63 = vmul.f32 -1.442695, %v1547_v61 }
 0x21d   :  { %v1666_v0 = vmul.f32 -1.442695, %v1548_v19 }
 0x254   :  { %v1363_v50 = vpop.f32.mrb[12].mxu0 }
 0x255   :  { %v1364_v6 = vadd.f32 %v1363_v50, %v2111_v49  ;;  %v1404_v7 = vpop.f32.mrb[12].mxu1  ;;  %v1365_v8 = vpop.f32.mrb[13].mxu0  ;;  %v1494_v50 = vld [vmem:[#allocation13 + $0x8] sm:$0x3] }
 0x256   :  { %v1405_v10 = vadd.f32 %v1404_v7, %v1199_v42  ;;  %v1366_v11 = vadd.f32 %v1365_v8, %v2115_v53  ;;  %v1406_v38 = vpop.f32.mrb[13].mxu1  ;;  %v1367_v12 = vpop.f32.mrb[14].mxu0  ;;  %v1532_v8 = vrot.slane %v1494_v50, %v1499_v55 }
 0x257   :  { %v1549_v13 = vadd.f32 %v1508_v3, %v1364_v6  ;;  %v1407_v14 = vadd.f32 %v1406_v38, %v1201_v45  ;;  %v1408_v16 = vpop.f32.mrb[14].mxu1  ;;  %v1368_v17 = vpop.f32.mrb[15].mxu0  ;;  %v1536_v38 = vrot.slane %v1494_v50, %v1503_v57 }
 0x258   :  { %v1551_v18 = vadd.f32 %v1516_v4, %v1405_v10  ;;  %v1550_v20 = vadd.f32 %v1512_v5, %v1366_v11  ;;  %v1409_v21 = vpop.f32.mrb[15].mxu1  ;;  %v1524_v5 = vrot.slane %v2139_v2, %v1523_v1 }
 0x259   :  { %v1661_v22 = vmul.f32 -1.442695, %v1549_v13  ;;  %v1552_v23 = vadd.f32 %v1520_v9, %v1407_v14 }
 0x25a   :  { %v1663_v24 = vmul.f32 -1.442695, %v1551_v18  ;;  %v1662_v49 = vmul.f32 -1.442695, %v1550_v20 }
 0x25b   :  { %1680 = vpow2.f32 %v1661_v22  ;;  %v1664_v25 = vmul.f32 -1.442695, %v1552_v23 }
 0x25c   :  { %1682 = vpow2.f32 %v1663_v24 }
 0x25d   :  { %1684 = vpow2.f32 %v1662_v49 }
 0x25e   :  { %1686 = vpow2.f32 %v1664_v25 }
 0x265   :  { %v1681_v26 = vpop.eup %1680 }
 0x266   :  { %v1683_v53 = vpop.eup %1682  ;;  %v1567_v27 = vadd.f32 1.0, %v1681_v26 }
 0x267   :  { %v1685_v28 = vpop.eup %1684  ;;  %v1581_v29 = vadd.f32 1.0, %v1683_v53 }
 0x268   :  { %v1687_v30 = vpop.eup %1686  ;;  %1688 = vrcp.f32 %v1567_v27  ;;  %v1568_v31 = vadd.f32 1.0, %v1685_v28 }
 0x269   :  { %1690 = vrcp.f32 %v1581_v29  ;;  %v1582_v32 = vadd.f32 1.0, %v1687_v30 }
 0x26a   :  { %1692 = vrcp.f32 %v1568_v31 }
 0x26b   :  { %1694 = vrcp.f32 %v1582_v32 }
 0x26c   :  { %1696 = vpow2.f32 %v1665_v63 }
 0x26d   :  { %1698 = vpow2.f32 %v1666_v0 }
 0x272   :  { %v1689_v36 = vpop.eup %1688 }
 0x273   :  { %v1691_v39 = vpop.eup %1690  ;;  %v1573_v40 = vmul.f32 %v1689_v36, %v1557_v34 }
 0x274   :  { %v1693_v42 = vpop.eup %1692  ;;  %v1587_v45 = vmul.f32 %v1691_v39, %v1559_v35 }
 0x275   :  { %v1695_v47 = vpop.eup %1694  ;;  %v1574_v48 = vmul.f32 %v1693_v42, %v1558_v37 }
 0x276   :  { %v1588_v51 = vmul.f32 %v1695_v47, %v1560_v41  ;;  %v1589_v52 = vadd.f32 %v1587_v45, %v1573_v40  ;;  %v1697_v3 = vpop.eup %1696 }
 0x277   :  { %v1699_v4 = vpop.eup %1698  ;;  %v1597_v6 = vadd.f32 1.0, %v1697_v3 }
 0x278   :  { %v1590_v33 = vadd.f32 %v1588_v51, %v1574_v48  ;;  %v1598_v9 = vadd.f32 1.0, %v1699_v4 }
 0x279   :  { %1700 = vrcp.f32 %v1597_v6 }
 0x27a   :  { %1702 = vrcp.f32 %v1598_v9 }
 0x294   :  { %v1445_v7 = vpop.f32.mrb[16].mxu0 }
 0x295   :  { %v1446_v58 = vadd.f32 %v1445_v7, %v2119_v43  ;;  %v1486_v10 = vpop.f32.mrb[16].mxu1  ;;  %v1447_v11 = vpop.f32.mrb[17].mxu0 }
 0x296   :  { %v1487_v12 = vadd.f32 %v1486_v10, %v2123_v54  ;;  %v1448_v62 = vadd.f32 %v1447_v11, %v2121_v46  ;;  %v1488_v13 = vpop.f32.mrb[17].mxu1  ;;  %v1449_v14 = vpop.f32.mrb[18].mxu0 }
 0x297   :  { %v1553_v16 = vadd.f32 %v1524_v5, %v1446_v58  ;;  %v1489_v17 = vadd.f32 %v1488_v13, %v2125_v56  ;;  %v1490_v18 = vpop.f32.mrb[18].mxu1  ;;  %v1450_v20 = vpop.f32.mrb[19].mxu0 }
 0x298   :  { %v1555_v21 = vadd.f32 %v1532_v8, %v1487_v12  ;;  %v1554_v2 = vadd.f32 %v1528_v15, %v1448_v62  ;;  %v1491_v22 = vpop.f32.mrb[19].mxu1  ;;  %v1701_v46 = vpop.eup %1700 }
 0x299   :  { %v1667_v43 = vmul.f32 -1.442695, %v1553_v16  ;;  %v1556_v23 = vadd.f32 %v1536_v38, %v1489_v17  ;;  %v1703_v54 = vpop.eup %1702 }
 0x29a   :  { %1704 = vtanh.f32 %v1555_v21  ;;  %v1668_v24 = vmul.f32 -1.442695, %v1554_v2 }
 0x29b   :  { %1706 = vpow2.f32 %v1667_v43 }
 0x29c   :  { %1708 = vpow2.f32 %v1668_v24 }
 0x29d   :  { %1710 = vtanh.f32 %v1556_v23 }
 0x2a4   :  { %v1705_v49 = vpop.eup %1704 }
 0x2a5   :  { %v1707_v25 = vpop.eup %1706  ;;  %v1605_v26 = vmul.f32 %v1705_v49, %v1701_v46 }
 0x2a6   :  { %v1709_v56 = vpop.eup %1708  ;;  %v1615_v53 = vadd.f32 1.0, %v1707_v25 }
 0x2a7   :  { %v1711_v27 = vpop.eup %1710  ;;  %v1607_v28 = vadd.f32 %v1605_v26, %v1589_v52  ;;  %v1616_v29 = vadd.f32 1.0, %v1709_v56 }
 0x2a8   :  { %1712 = vrcp.f32 %v1615_v53  ;;  %v1606_v30 = vmul.f32 %v1711_v27, %v1703_v54 }
 0x2a9   :  { %1627 = vst [vmem:[#allocation15] sm:$0xff] %v1607_v28  ;;  %1714 = vrcp.f32 %v1616_v29 }
 0x2aa   :  { %v1608_v31 = vadd.f32 %v1606_v30, %v1590_v33  ;;  %1716 = vtanh.f32 %v1607_v28 }
 0x2ac   :  { %1628 = vst [vmem:[#allocation15 + $0x8] sm:$0xff] %v1608_v31  ;;  %1718 = vtanh.f32 %v1608_v31 }
 0x2ad   :  { %1885 = shalt.err (!%p1882_p4)
}
 0x2ae   :  { %s1886_s10 = scalar_lea.hbm %s2193_s8, 256 }
 0x2af   :  { %p1887_p5 = scmp.ne.s32.totalorder %s2193_s8, %s1886_s10  ;;  %p1890_p6 = scmp.lt.u32.totalorder %s1886_s10, %s2193_s8 }
 0x2b1   :  { %p1892_p7 = pnand %p1890_p6, %p1887_p5 }
 0x2b3   :  { %1895 = shalt.err (!%p1892_p7)
}
 0x2b4   :  { %1648 = dma.vmem_to_hbm [thread:$0]  %s1646_s18, 256, %s2193_s8, [#allocation16]   ;;  %v1713_v32 = vpop.eup %1712 }
 0x2b5   :  { %v1715_v34 = vpop.eup %1714  ;;  %s1940_s26 = smov [#allocation14]  }
 0x2b6   :  { %v1717_v35 = vpop.eup %1716  ;;  %s1635_s1 = sshll.u32 %s1940_s26, 4  ;;  %s1636_s1 = int_to_ptr.vmem [resolvable:$true] %s1635_s1 }
 0x2b7   :  { %v1623_v36 = vmul.f32 %v1717_v35, %v1713_v32  ;;  %v1719_v37 = vpop.eup %1718  ;;  %s1896_s27 = scalar_lea.vmem %s1636_s1, 256  ;;  %p1901_p9 = scmp.lt.s32.totalorder %s1636_s1, %s1636_s1 }
 0x2b8   :  { %v1624_v39 = vmul.f32 %v1719_v37, %v1715_v34  ;;  %p1897_p8 = scmp.ne.s32.totalorder %s1636_s1, %s1896_s27  ;;  %p1902_p10 = scmp.lt.s32.totalorder %s1896_s27, %s1896_s27 }
 0x2b9   :  { %1625 = vst [vmem:[#allocation14] sm:$0xff] %v1623_v36 }
 0x2ba   :  { %1626 = vst [vmem:[#allocation14 + $0x8] sm:$0xff] %v1624_v39  ;;  %p1903_p11 = por %p1902_p10, %p1901_p9 }
 0x2bc   :  { %p1904_p12 = pnand %p1903_p11, %p1897_p8 }
 0x2be   :  { %1907 = shalt.err (!%p1904_p12)
}
 0x2bf   :  { %s1908_s5 = scalar_lea.hbm %s2192_s7, 256 }
 0x2c0   :  { %p1909_p13 = scmp.ne.s32.totalorder %s2192_s7, %s1908_s5  ;;  %p1912_p0 = scmp.lt.u32.totalorder %s1908_s5, %s2192_s7 }
 0x2c2   :  { %p1914_p1 = pnand %p1912_p0, %p1909_p13 }
 0x2c4   :  { %1917 = shalt.err (!%p1914_p1)
}
 0x2c5   :  { %1638 = dma.vmem_to_hbm [thread:$0]  %s1636_s1, 256, %s2192_s7, [#allocation4]  }
 0x2c6   :  { %1926 = dma.done.wait [#allocation4], 256  }
 0x2c7   :  { %1927 = vsyncadd [#allocation4], 4294967040 }
 0x2c8   :  { %1928 = dma.done.wait [#allocation16], 256  }
 0x2c9   :  { %1929 = vsyncadd [#allocation16], 4294967040 }
 0x2ca   :  { %1655 = vsyncpa [#allocation3], 1 }
 0x2cb   :  { %1656 = vsyncpa [#allocation6], 1 }
 0x2cc   :  { %1657 = vsyncpa [#allocation9], 1 }
 0x2cd   :  { %1658 = vsyncpa [#allocation12], 1 }
 0x2ce   :  { %1659 = vsyncpa [#allocation4], 1 }
 0x2cf   :  { %1660 = vsyncpa [#allocation16], 1 }

</bundles_post_ra>
